<compile_context>
chip_gen: v7x
topology: tpu7x:2x2x1
jax: 0.10.0
libtpu: 0.0.40
codegen_flags: <defaults>
</compile_context>

<pallas_src>
import math

import jax
import jax.numpy as jnp
from jax.experimental import pallas as pl
from jax.experimental.pallas import tpu as pltpu

# ---------------- configuration ----------------
D_MODEL = 32
NHEAD = 4
DIM_FF = 64
T_LEN = 8      # target sequence length
S_LEN = 16     # memory sequence length
BATCH = 2
LN_EPS = 1e-5  # torch.nn.LayerNorm default


# ---------------- fused decoder-layer kernel ----------------

def _make_decoder_layer_kernel(*, B, T, S, D, H, has_qp, has_pos):
    """Builds the fused kernel, statically specialised on pos/query_pos presence."""
    dh = D // H
    bf16 = jnp.bfloat16

    def kernel(*refs):
        refs = list(refs)
        out_ref = refs.pop()                      # single output is the last ref
        it = iter(refs)
        xt_ref = next(it)                         # (B*T, D) f32, batch-major rows
        xm_ref = next(it)                         # (B*S, D) f32
        qp_ref = next(it) if has_qp else None     # (B*T, D) f32
        ps_ref = next(it) if has_pos else None    # (B*S, D) f32
        (sa_wq, sa_bq, sa_wk, sa_bk, sa_wv, sa_bv, sa_wo, sa_bo) = (
            next(it), next(it), next(it), next(it),
            next(it), next(it), next(it), next(it))
        (ca_wq, ca_bq, ca_wk, ca_bk, ca_wv, ca_bv, ca_wo, ca_bo) = (
            next(it), next(it), next(it), next(it),
            next(it), next(it), next(it), next(it))
        w1, b1, w2, b2 = next(it), next(it), next(it), next(it)
        g1, be1, g2, be2, g3, be3 = (next(it), next(it), next(it),
                                     next(it), next(it), next(it))

        def layer_norm(z, g_ref, b_ref):
            mean = jnp.mean(z, axis=-1, keepdims=True)
            var = jnp.mean(jnp.square(z - mean), axis=-1, keepdims=True)
            return (z - mean) * jax.lax.rsqrt(var + LN_EPS) * g_ref[...] + b_ref[...]

        def mha(x_q, x_kv, Lq, Lk, wq, bq, wk, bk, wv, bv, wo, residual):
            """Multi-head attention with the output projection folded into the head
            loop: acc += (softmax(q_h k_h^T) v_h) @ Wo[h].  1/sqrt(dh) is pre-folded
            into wq/bq.  Activations are either full-width or per-head -> no lane
            slices, no head concat.  Matmul inputs bf16, accumulation f32."""
            xq_bf = x_q.astype(bf16)
            xkv_bf = xq_bf if x_kv is x_q else x_kv.astype(bf16)
            acc = residual                                     # (B*Lq, D) f32
            for h in range(H):                                 # static unroll
                q = (jnp.dot(xq_bf, wq[h], preferred_element_type=jnp.float32)
                     + bq[h]).astype(bf16)                     # (B*Lq, dh)
                k = (jnp.dot(xkv_bf, wk[h], preferred_element_type=jnp.float32)
                     + bk[h]).astype(bf16)                     # (B*Lk, dh)
                v = (jnp.dot(xkv_bf, wv[h], preferred_element_type=jnp.float32)
                     + bv[h]).astype(bf16)                     # (B*Lk, dh)
                s = jnp.einsum("bqd,bkd->bqk",
                               q.reshape(B, Lq, dh), k.reshape(B, Lk, dh),
                               preferred_element_type=jnp.float32)    # (B, Lq, Lk)
                s = s - jnp.max(s, axis=-1, keepdims=True)
                p = jnp.exp(s)
                p = p * pl.reciprocal(jnp.sum(p, axis=-1, keepdims=True), approx=True)
                o = jnp.einsum("bqk,bkd->bqd",
                               p.astype(bf16), v.reshape(B, Lk, dh),
                               preferred_element_type=jnp.float32)    # (B, Lq, dh)
                acc = acc + jnp.dot(o.reshape(B * Lq, dh).astype(bf16), wo[h],
                                    preferred_element_type=jnp.float32)
            return acc

        x = xt_ref[...]                                        # residual stream, f32
        mem = xm_ref[...]

        # ---- self attention: q = k = v = tgt + query_pos ----
        x_sa = (x + qp_ref[...]) if has_qp else x
        x = layer_norm(
            mha(x_sa, x_sa, T, T,
                sa_wq, sa_bq, sa_wk, sa_bk, sa_wv, sa_bv, sa_wo, residual=x)
            + sa_bo[...],
            g1, be1)

        # ---- cross attention: q = x + query_pos, k = v = memory + pos ----
        q_in = (x + qp_ref[...]) if has_qp else x
        kv_in = (mem + ps_ref[...]) if has_pos else mem
        x = layer_norm(
            mha(q_in, kv_in, T, S,
                ca_wq, ca_bq, ca_wk, ca_bk, ca_wv, ca_bv, ca_wo, residual=x)
            + ca_bo[...],
            g2, be2)

        # ---- feed forward: linear2(relu(linear1(x))) ----
        h1 = jnp.dot(x.astype(bf16), w1[...],
                     preferred_element_type=jnp.float32) + b1[...]
        h1 = jnp.maximum(h1, 0.0)                 # relu; dropout = identity (eval)
        h2 = jnp.dot(h1.astype(bf16), w2[...],
                     preferred_element_type=jnp.float32) + b2[...]
        x = layer_norm(x + h2, g3, be3)

        out_ref[...] = x.astype(out_ref.dtype)

    return kernel


# ---------------- wrapper (single pallas_call per layer) ----------------

def transformer_decoder_layer(tgt, memory, params, pos=None, query_pos=None):
    """tgt:(T,B,D), memory:(S,B,D) -> (T,B,D).  forward_post (normalize_before=False)."""
    T, B, D = tgt.shape
    S = memory.shape[0]
    H = NHEAD
    assert D % H == 0
    has_qp = query_pos is not None
    has_pos = pos is not None

    # Batch-major 2-D activation layout (row = b*L + l).
    xt = jnp.transpose(tgt, (1, 0, 2)).reshape(B * T, D)
    xm = jnp.transpose(memory, (1, 0, 2)).reshape(B * S, D)

    operands = [xt, xm]
    if has_qp:
        operands.append(jnp.transpose(query_pos, (1, 0, 2)).reshape(B * T, D))
    if has_pos:
        operands.append(jnp.transpose(pos, (1, 0, 2)).reshape(B * S, D))

    p = params
    operands += [
        p["sa_wq"], p["sa_bq"], p["sa_wk"], p["sa_bk"], p["sa_wv"], p["sa_bv"],
        p["sa_wo"], p["sa_bo"],
        p["ca_wq"], p["ca_bq"], p["ca_wk"], p["ca_bk"], p["ca_wv"], p["ca_bv"],
        p["ca_wo"], p["ca_bo"],
        p["w1"], p["b1"], p["w2"], p["b2"],
        p["norm1_g"], p["norm1_b"], p["norm2_g"], p["norm2_b"],
        p["norm3_g"], p["norm3_b"],
    ]

    FF = p["w1"].shape[1]
    dh = D // H
    # Advisory cost hint: lets XLA schedule/overlap neighbours of this tiny kernel.
    flops = (
        2 * B * T * D * D * 3            # self-attn q/k/v projections
        + 2 * B * H * T * T * dh * 2     # self-attn scores + values
        + 2 * B * T * D * D              # self-attn out projection
        + 2 * B * T * D * D              # cross-attn q projection
        + 2 * B * S * D * D * 2          # cross-attn k/v projections
        + 2 * B * H * T * S * dh * 2     # cross-attn scores + values
        + 2 * B * T * D * D              # cross-attn out projection
        + 2 * B * T * D * FF * 2         # FFN
    )
    transcendentals = B * H * (T * T + T * S) + 3 * B * T
    bytes_accessed = (sum(a.size * a.dtype.itemsize for a in operands)
                      + B * T * D * tgt.dtype.itemsize)

    kernel = _make_decoder_layer_kernel(B=B, T=T, S=S, D=D, H=H,
                                        has_qp=has_qp, has_pos=has_pos)

    out2d = pl.pallas_call(
        kernel,
        out_shape=jax.ShapeDtypeStruct((B * T, D), tgt.dtype),
        in_specs=[pl.BlockSpec(memory_space=pltpu.MemorySpace.VMEM)] * len(operands),
        out_specs=pl.BlockSpec(memory_space=pltpu.MemorySpace.VMEM),
        compiler_params=pltpu.CompilerParams(vmem_limit_bytes=32 * 1024 * 1024),
        cost_estimate=pl.CostEstimate(flops=int(flops),
                                      transcendentals=int(transcendentals),
                                      bytes_accessed=int(bytes_accessed)),
    )(*operands)

    return out2d.reshape(B, T, D).transpose(1, 0, 2)


# ---------------- deterministic parameter init (pre-packed, pre-scaled layouts) -------
# Mapping to the PyTorch modules (packing done ONCE at init, no per-forward work):
#   sa_wq[h] = self_attn.in_proj_weight[:D].T[:, h*dh:(h+1)*dh] / sqrt(dh)   (D, dh)
#   sa_bq[h] = self_attn.in_proj_bias[:D][h*dh:(h+1)*dh]        / sqrt(dh)   (1, dh)
#   sa_wk/sa_wv (rows D:2D / 2D:3D, no scale), ca_* analogous for multihead_attn
#   sa_wo[h] = self_attn.out_proj.weight.T[h*dh:(h+1)*dh, :]                 (dh, D)
#   w1 = linear1.weight.T, w2 = linear2.weight.T
# Matmul weights are stored bf16 (halves weight DMA); biases / LN params stay f32.

def init_params(key):
    D, FF, H = D_MODEL, DIM_FF, NHEAD
    dh = D // H
    inv = 1.0 / math.sqrt(dh)
    sc = 0.05
    bf = jnp.bfloat16
    ks = jax.random.split(key, 20)

    def n(k, shape, dtype=jnp.float32, mult=1.0):
        return (jax.random.normal(k, shape, jnp.float32) * (sc * mult)).astype(dtype)

    return {
        "sa_wq": n(ks[0], (H, D, dh), bf, inv), "sa_bq": n(ks[1], (H, 1, dh), mult=inv),
        "sa_wk": n(ks[2], (H, D, dh), bf),      "sa_bk": n(ks[3], (H, 1, dh)),
        "sa_wv": n(ks[4], (H, D, dh), bf),      "sa_bv": n(ks[5], (H, 1, dh)),
        "sa_wo": n(ks[6], (H, dh, D), bf),      "sa_bo": n(ks[7], (1, D)),
        "ca_wq": n(ks[8], (H, D, dh), bf, inv), "ca_bq": n(ks[9], (H, 1, dh), mult=inv),
        "ca_wk": n(ks[10], (H, D, dh), bf),     "ca_bk": n(ks[11], (H, 1, dh)),
        "ca_wv": n(ks[12], (H, D, dh), bf),     "ca_bv": n(ks[13], (H, 1, dh)),
        "ca_wo": n(ks[14], (H, dh, D), bf),     "ca_bo": n(ks[15], (1, D)),
        "w1": n(ks[16], (D, FF), bf),           "b1": n(ks[17], (1, FF)),
        "w2": n(ks[18], (FF, D), bf),           "b2": n(ks[19], (1, D)),
        "norm1_g": jnp.ones((1, D), jnp.float32), "norm1_b": jnp.zeros((1, D), jnp.float32),
        "norm2_g": jnp.ones((1, D), jnp.float32), "norm2_b": jnp.zeros((1, D), jnp.float32),
        "norm3_g": jnp.ones((1, D), jnp.float32), "norm3_b": jnp.zeros((1, D), jnp.float32),
    }


if __name__ == "__main__":
    key = jax.random.PRNGKey(0)
    k_tgt, k_mem, k_qp, k_pos, k_par = jax.random.split(key, 5)

    tgt = jax.random.normal(k_tgt, (T_LEN, BATCH, D_MODEL), jnp.float32)
    memory = jax.random.normal(k_mem, (S_LEN, BATCH, D_MODEL), jnp.float32)
    query_pos = jax.random.normal(k_qp, (T_LEN, BATCH, D_MODEL), jnp.float32)
    pos = jax.random.normal(k_pos, (S_LEN, BATCH, D_MODEL), jnp.float32)
    params = init_params(k_par)

    # DETR-style call with positional embeddings (with_pos_embed active).
    fn_pos = jax.jit(
        lambda t, m, p, ps, qp: transformer_decoder_layer(t, m, p, pos=ps, query_pos=qp))
    out = fn_pos(tgt, memory, params, pos, query_pos)
    jax.block_until_ready(out)
    assert out.shape == (T_LEN, BATCH, D_MODEL)
    assert bool(jnp.all(jnp.isfinite(out)))

    # pos=None / query_pos=None path (statically specialised: no zero tensors / DMAs).
    fn_nopos = jax.jit(lambda t, m, p: transformer_decoder_layer(t, m, p))
    out2 = fn_nopos(tgt, memory, params)
    jax.block_until_ready(out2)
    assert out2.shape == (T_LEN, BATCH, D_MODEL)
    assert bool(jnp.all(jnp.isfinite(out2)))

    print("KERNEL_OK")
</pallas_src>

<mosaic_0001>
module attributes {stable_mosaic.version = 11 : i64} {
  func.func @kernel(%arg0: memref<16x32xf32, #tpu.memory_space<vmem>>, %arg1: memref<32x32xf32, #tpu.memory_space<vmem>>, %arg2: memref<16x32xf32, #tpu.memory_space<vmem>>, %arg3: memref<32x32xf32, #tpu.memory_space<vmem>>, %arg4: memref<4x32x8xbf16, #tpu.memory_space<vmem>>, %arg5: memref<4x1x8xf32, #tpu.memory_space<vmem>>, %arg6: memref<4x32x8xbf16, #tpu.memory_space<vmem>>, %arg7: memref<4x1x8xf32, #tpu.memory_space<vmem>>, %arg8: memref<4x32x8xbf16, #tpu.memory_space<vmem>>, %arg9: memref<4x1x8xf32, #tpu.memory_space<vmem>>, %arg10: memref<4x8x32xbf16, #tpu.memory_space<vmem>>, %arg11: memref<1x32xf32, #tpu.memory_space<vmem>>, %arg12: memref<4x32x8xbf16, #tpu.memory_space<vmem>>, %arg13: memref<4x1x8xf32, #tpu.memory_space<vmem>>, %arg14: memref<4x32x8xbf16, #tpu.memory_space<vmem>>, %arg15: memref<4x1x8xf32, #tpu.memory_space<vmem>>, %arg16: memref<4x32x8xbf16, #tpu.memory_space<vmem>>, %arg17: memref<4x1x8xf32, #tpu.memory_space<vmem>>, %arg18: memref<4x8x32xbf16, #tpu.memory_space<vmem>>, %arg19: memref<1x32xf32, #tpu.memory_space<vmem>>, %arg20: memref<32x64xbf16, #tpu.memory_space<vmem>>, %arg21: memref<1x64xf32, #tpu.memory_space<vmem>>, %arg22: memref<64x32xbf16, #tpu.memory_space<vmem>>, %arg23: memref<1x32xf32, #tpu.memory_space<vmem>>, %arg24: memref<1x32xf32, #tpu.memory_space<vmem>>, %arg25: memref<1x32xf32, #tpu.memory_space<vmem>>, %arg26: memref<1x32xf32, #tpu.memory_space<vmem>>, %arg27: memref<1x32xf32, #tpu.memory_space<vmem>>, %arg28: memref<1x32xf32, #tpu.memory_space<vmem>>, %arg29: memref<1x32xf32, #tpu.memory_space<vmem>>, %arg30: memref<16x32xf32, #tpu.memory_space<vmem>>) attributes {dimension_semantics = [], scalar_prefetch = 0 : i64, scratch_operands = 0 : i64, tpu.core_type = #tpu.core_type<tc>} {
    %c0 = arith.constant 0 : index
    %c0_0 = arith.constant 0 : index
    %0 = vector.load %arg0[%c0, %c0_0] : memref<16x32xf32, #tpu.memory_space<vmem>>, vector<16x32xf32>
    %c0_1 = arith.constant 0 : index
    %c0_2 = arith.constant 0 : index
    %1 = vector.load %arg1[%c0_1, %c0_2] : memref<32x32xf32, #tpu.memory_space<vmem>>, vector<32x32xf32>
    %c0_3 = arith.constant 0 : index
    %c0_4 = arith.constant 0 : index
    %2 = vector.load %arg2[%c0_3, %c0_4] : memref<16x32xf32, #tpu.memory_space<vmem>>, vector<16x32xf32>
    %3 = arith.addf %0, %2 : vector<16x32xf32>
    %4 = arith.truncf %3 : vector<16x32xf32> to vector<16x32xbf16>
    %c0_5 = arith.constant 0 : index
    %c0_6 = arith.constant 0 : index
    %c0_7 = arith.constant 0 : index
    %5 = vector.load %arg4[%c0_5, %c0_6, %c0_7] : memref<4x32x8xbf16, #tpu.memory_space<vmem>>, vector<1x32x8xbf16>
    %6 = vector.shape_cast %5 : vector<1x32x8xbf16> to vector<32x8xbf16>
    %cst = arith.constant dense<0.000000e+00> : vector<16x8xf32>
    %7 = tpu.matmul %4, %6, %cst {dimension_numbers = #tpu.dot_dimension_numbers<[1], [0], [0], [1], [0, 0, 1, 1], [], []>} : vector<16x32xbf16>, vector<32x8xbf16>, vector<16x8xf32> -> vector<16x8xf32>
    %c0_8 = arith.constant 0 : index
    %c0_9 = arith.constant 0 : index
    %c0_10 = arith.constant 0 : index
    %8 = vector.load %arg5[%c0_8, %c0_9, %c0_10] : memref<4x1x8xf32, #tpu.memory_space<vmem>>, vector<1x1x8xf32>
    %9 = vector.shape_cast %8 : vector<1x1x8xf32> to vector<1x8xf32>
    %10 = vector.broadcast %9 : vector<1x8xf32> to vector<16x8xf32>
    %11 = arith.addf %7, %10 : vector<16x8xf32>
    %12 = arith.truncf %11 : vector<16x8xf32> to vector<16x8xbf16>
    %c0_11 = arith.constant 0 : index
    %c0_12 = arith.constant 0 : index
    %c0_13 = arith.constant 0 : index
    %13 = vector.load %arg6[%c0_11, %c0_12, %c0_13] : memref<4x32x8xbf16, #tpu.memory_space<vmem>>, vector<1x32x8xbf16>
    %14 = vector.shape_cast %13 : vector<1x32x8xbf16> to vector<32x8xbf16>
    %cst_14 = arith.constant dense<0.000000e+00> : vector<16x8xf32>
    %15 = tpu.matmul %4, %14, %cst_14 {dimension_numbers = #tpu.dot_dimension_numbers<[1], [0], [0], [1], [0, 0, 1, 1], [], []>} : vector<16x32xbf16>, vector<32x8xbf16>, vector<16x8xf32> -> vector<16x8xf32>
    %c0_15 = arith.constant 0 : index
    %c0_16 = arith.constant 0 : index
    %c0_17 = arith.constant 0 : index
    %16 = vector.load %arg7[%c0_15, %c0_16, %c0_17] : memref<4x1x8xf32, #tpu.memory_space<vmem>>, vector<1x1x8xf32>
    %17 = vector.shape_cast %16 : vector<1x1x8xf32> to vector<1x8xf32>
    %18 = vector.broadcast %17 : vector<1x8xf32> to vector<16x8xf32>
    %19 = arith.addf %15, %18 : vector<16x8xf32>
    %20 = arith.truncf %19 : vector<16x8xf32> to vector<16x8xbf16>
    %c0_18 = arith.constant 0 : index
    %c0_19 = arith.constant 0 : index
    %c0_20 = arith.constant 0 : index
    %21 = vector.load %arg8[%c0_18, %c0_19, %c0_20] : memref<4x32x8xbf16, #tpu.memory_space<vmem>>, vector<1x32x8xbf16>
    %22 = vector.shape_cast %21 : vector<1x32x8xbf16> to vector<32x8xbf16>
    %cst_21 = arith.constant dense<0.000000e+00> : vector<16x8xf32>
    %23 = tpu.matmul %4, %22, %cst_21 {dimension_numbers = #tpu.dot_dimension_numbers<[1], [0], [0], [1], [0, 0, 1, 1], [], []>} : vector<16x32xbf16>, vector<32x8xbf16>, vector<16x8xf32> -> vector<16x8xf32>
    %c0_22 = arith.constant 0 : index
    %c0_23 = arith.constant 0 : index
    %c0_24 = arith.constant 0 : index
    %24 = vector.load %arg9[%c0_22, %c0_23, %c0_24] : memref<4x1x8xf32, #tpu.memory_space<vmem>>, vector<1x1x8xf32>
    %25 = vector.shape_cast %24 : vector<1x1x8xf32> to vector<1x8xf32>
    %26 = vector.broadcast %25 : vector<1x8xf32> to vector<16x8xf32>
    %27 = arith.addf %23, %26 : vector<16x8xf32>
    %28 = arith.truncf %27 : vector<16x8xf32> to vector<16x8xbf16>
    %29 = vector.shape_cast %12 : vector<16x8xbf16> to vector<2x8x8xbf16>
    %30 = vector.shape_cast %20 : vector<16x8xbf16> to vector<2x8x8xbf16>
    "tpu.trace_start"() <{level = 10 : i32, message = "bqd,bkd->bqk"}> : () -> ()
    %cst_25 = arith.constant dense<0.000000e+00> : vector<2x8x8xf32>
    %31 = tpu.matmul %29, %30, %cst_25 {dimension_numbers = #tpu.dot_dimension_numbers<[2], [2], [1], [1], [0, 0, 0, 1, 1, 1], [0], [0]>} : vector<2x8x8xbf16>, vector<2x8x8xbf16>, vector<2x8x8xf32> -> vector<2x8x8xf32>
    "tpu.trace_stop"() : () -> ()
    %cst_26 = arith.constant dense<0xFF800000> : vector<2x8xf32>
    %32 = vector.multi_reduction <maximumf>, %31, %cst_26 [2] : vector<2x8x8xf32> to vector<2x8xf32>
    %33 = vector.shape_cast %32 : vector<2x8xf32> to vector<2x8x1xf32>
    %34 = vector.broadcast %33 : vector<2x8x1xf32> to vector<2x8x8xf32>
    %35 = arith.subf %31, %34 : vector<2x8x8xf32>
    %36 = math.exp %35 : vector<2x8x8xf32>
    %cst_27 = arith.constant dense<0.000000e+00> : vector<2x8xf32>
    %37 = vector.multi_reduction <add>, %36, %cst_27 [2] : vector<2x8x8xf32> to vector<2x8xf32>
    %38 = vector.shape_cast %37 : vector<2x8xf32> to vector<2x8x1xf32>
    %39 = tpu.reciprocal %38 {approx = true} : vector<2x8x1xf32> -> vector<2x8x1xf32>
    %40 = vector.broadcast %39 : vector<2x8x1xf32> to vector<2x8x8xf32>
    %41 = arith.mulf %36, %40 : vector<2x8x8xf32>
    %42 = arith.truncf %41 : vector<2x8x8xf32> to vector<2x8x8xbf16>
    %43 = vector.shape_cast %28 : vector<16x8xbf16> to vector<2x8x8xbf16>
    "tpu.trace_start"() <{level = 10 : i32, message = "bqk,bkd->bqd"}> : () -> ()
    %cst_28 = arith.constant dense<0.000000e+00> : vector<2x8x8xf32>
    %44 = tpu.matmul %42, %43, %cst_28 {dimension_numbers = #tpu.dot_dimension_numbers<[2], [1], [1], [2], [0, 0, 0, 1, 1, 2], [0], [0]>} : vector<2x8x8xbf16>, vector<2x8x8xbf16>, vector<2x8x8xf32> -> vector<2x8x8xf32>
    "tpu.trace_stop"() : () -> ()
    %45 = vector.shape_cast %44 : vector<2x8x8xf32> to vector<16x8xf32>
    %46 = arith.truncf %45 : vector<16x8xf32> to vector<16x8xbf16>
    %c0_29 = arith.constant 0 : index
    %c0_30 = arith.constant 0 : index
    %c0_31 = arith.constant 0 : index
    %47 = vector.load %arg10[%c0_29, %c0_30, %c0_31] : memref<4x8x32xbf16, #tpu.memory_space<vmem>>, vector<1x8x32xbf16>
    %48 = vector.shape_cast %47 : vector<1x8x32xbf16> to vector<8x32xbf16>
    %cst_32 = arith.constant dense<0.000000e+00> : vector<16x32xf32>
    %49 = tpu.matmul %46, %48, %cst_32 {dimension_numbers = #tpu.dot_dimension_numbers<[1], [0], [0], [1], [0, 0, 1, 1], [], []>} : vector<16x8xbf16>, vector<8x32xbf16>, vector<16x32xf32> -> vector<16x32xf32>
    %50 = arith.addf %0, %49 : vector<16x32xf32>
    %c1 = arith.constant 1 : index
    %c0_33 = arith.constant 0 : index
    %c0_34 = arith.constant 0 : index
    %51 = vector.load %arg4[%c1, %c0_33, %c0_34] : memref<4x32x8xbf16, #tpu.memory_space<vmem>>, vector<1x32x8xbf16>
    %52 = vector.shape_cast %51 : vector<1x32x8xbf16> to vector<32x8xbf16>
    %cst_35 = arith.constant dense<0.000000e+00> : vector<16x8xf32>
    %53 = tpu.matmul %4, %52, %cst_35 {dimension_numbers = #tpu.dot_dimension_numbers<[1], [0], [0], [1], [0, 0, 1, 1], [], []>} : vector<16x32xbf16>, vector<32x8xbf16>, vector<16x8xf32> -> vector<16x8xf32>
    %c1_36 = arith.constant 1 : index
    %c0_37 = arith.constant 0 : index
    %c0_38 = arith.constant 0 : index
    %54 = vector.load %arg5[%c1_36, %c0_37, %c0_38] : memref<4x1x8xf32, #tpu.memory_space<vmem>>, vector<1x1x8xf32>
    %55 = vector.shape_cast %54 : vector<1x1x8xf32> to vector<1x8xf32>
    %56 = vector.broadcast %55 : vector<1x8xf32> to vector<16x8xf32>
    %57 = arith.addf %53, %56 : vector<16x8xf32>
    %58 = arith.truncf %57 : vector<16x8xf32> to vector<16x8xbf16>
    %c1_39 = arith.constant 1 : index
    %c0_40 = arith.constant 0 : index
    %c0_41 = arith.constant 0 : index
    %59 = vector.load %arg6[%c1_39, %c0_40, %c0_41] : memref<4x32x8xbf16, #tpu.memory_space<vmem>>, vector<1x32x8xbf16>
    %60 = vector.shape_cast %59 : vector<1x32x8xbf16> to vector<32x8xbf16>
    %cst_42 = arith.constant dense<0.000000e+00> : vector<16x8xf32>
    %61 = tpu.matmul %4, %60, %cst_42 {dimension_numbers = #tpu.dot_dimension_numbers<[1], [0], [0], [1], [0, 0, 1, 1], [], []>} : vector<16x32xbf16>, vector<32x8xbf16>, vector<16x8xf32> -> vector<16x8xf32>
    %c1_43 = arith.constant 1 : index
    %c0_44 = arith.constant 0 : index
    %c0_45 = arith.constant 0 : index
    %62 = vector.load %arg7[%c1_43, %c0_44, %c0_45] : memref<4x1x8xf32, #tpu.memory_space<vmem>>, vector<1x1x8xf32>
    %63 = vector.shape_cast %62 : vector<1x1x8xf32> to vector<1x8xf32>
    %64 = vector.broadcast %63 : vector<1x8xf32> to vector<16x8xf32>
    %65 = arith.addf %61, %64 : vector<16x8xf32>
    %66 = arith.truncf %65 : vector<16x8xf32> to vector<16x8xbf16>
    %c1_46 = arith.constant 1 : index
    %c0_47 = arith.constant 0 : index
    %c0_48 = arith.constant 0 : index
    %67 = vector.load %arg8[%c1_46, %c0_47, %c0_48] : memref<4x32x8xbf16, #tpu.memory_space<vmem>>, vector<1x32x8xbf16>
    %68 = vector.shape_cast %67 : vector<1x32x8xbf16> to vector<32x8xbf16>
    %cst_49 = arith.constant dense<0.000000e+00> : vector<16x8xf32>
    %69 = tpu.matmul %4, %68, %cst_49 {dimension_numbers = #tpu.dot_dimension_numbers<[1], [0], [0], [1], [0, 0, 1, 1], [], []>} : vector<16x32xbf16>, vector<32x8xbf16>, vector<16x8xf32> -> vector<16x8xf32>
    %c1_50 = arith.constant 1 : index
    %c0_51 = arith.constant 0 : index
    %c0_52 = arith.constant 0 : index
    %70 = vector.load %arg9[%c1_50, %c0_51, %c0_52] : memref<4x1x8xf32, #tpu.memory_space<vmem>>, vector<1x1x8xf32>
    %71 = vector.shape_cast %70 : vector<1x1x8xf32> to vector<1x8xf32>
    %72 = vector.broadcast %71 : vector<1x8xf32> to vector<16x8xf32>
    %73 = arith.addf %69, %72 : vector<16x8xf32>
    %74 = arith.truncf %73 : vector<16x8xf32> to vector<16x8xbf16>
    %75 = vector.shape_cast %58 : vector<16x8xbf16> to vector<2x8x8xbf16>
    %76 = vector.shape_cast %66 : vector<16x8xbf16> to vector<2x8x8xbf16>
    "tpu.trace_start"() <{level = 10 : i32, message = "bqd,bkd->bqk"}> : () -> ()
    %cst_53 = arith.constant dense<0.000000e+00> : vector<2x8x8xf32>
    %77 = tpu.matmul %75, %76, %cst_53 {dimension_numbers = #tpu.dot_dimension_numbers<[2], [2], [1], [1], [0, 0, 0, 1, 1, 1], [0], [0]>} : vector<2x8x8xbf16>, vector<2x8x8xbf16>, vector<2x8x8xf32> -> vector<2x8x8xf32>
    "tpu.trace_stop"() : () -> ()
    %cst_54 = arith.constant dense<0xFF800000> : vector<2x8xf32>
    %78 = vector.multi_reduction <maximumf>, %77, %cst_54 [2] : vector<2x8x8xf32> to vector<2x8xf32>
    %79 = vector.shape_cast %78 : vector<2x8xf32> to vector<2x8x1xf32>
    %80 = vector.broadcast %79 : vector<2x8x1xf32> to vector<2x8x8xf32>
    %81 = arith.subf %77, %80 : vector<2x8x8xf32>
    %82 = math.exp %81 : vector<2x8x8xf32>
    %cst_55 = arith.constant dense<0.000000e+00> : vector<2x8xf32>
    %83 = vector.multi_reduction <add>, %82, %cst_55 [2] : vector<2x8x8xf32> to vector<2x8xf32>
    %84 = vector.shape_cast %83 : vector<2x8xf32> to vector<2x8x1xf32>
    %85 = tpu.reciprocal %84 {approx = true} : vector<2x8x1xf32> -> vector<2x8x1xf32>
    %86 = vector.broadcast %85 : vector<2x8x1xf32> to vector<2x8x8xf32>
    %87 = arith.mulf %82, %86 : vector<2x8x8xf32>
    %88 = arith.truncf %87 : vector<2x8x8xf32> to vector<2x8x8xbf16>
    %89 = vector.shape_cast %74 : vector<16x8xbf16> to vector<2x8x8xbf16>
    "tpu.trace_start"() <{level = 10 : i32, message = "bqk,bkd->bqd"}> : () -> ()
    %cst_56 = arith.constant dense<0.000000e+00> : vector<2x8x8xf32>
    %90 = tpu.matmul %88, %89, %cst_56 {dimension_numbers = #tpu.dot_dimension_numbers<[2], [1], [1], [2], [0, 0, 0, 1, 1, 2], [0], [0]>} : vector<2x8x8xbf16>, vector<2x8x8xbf16>, vector<2x8x8xf32> -> vector<2x8x8xf32>
    "tpu.trace_stop"() : () -> ()
    %91 = vector.shape_cast %90 : vector<2x8x8xf32> to vector<16x8xf32>
    %92 = arith.truncf %91 : vector<16x8xf32> to vector<16x8xbf16>
    %c1_57 = arith.constant 1 : index
    %c0_58 = arith.constant 0 : index
    %c0_59 = arith.constant 0 : index
    %93 = vector.load %arg10[%c1_57, %c0_58, %c0_59] : memref<4x8x32xbf16, #tpu.memory_space<vmem>>, vector<1x8x32xbf16>
    %94 = vector.shape_cast %93 : vector<1x8x32xbf16> to vector<8x32xbf16>
    %cst_60 = arith.constant dense<0.000000e+00> : vector<16x32xf32>
    %95 = tpu.matmul %92, %94, %cst_60 {dimension_numbers = #tpu.dot_dimension_numbers<[1], [0], [0], [1], [0, 0, 1, 1], [], []>} : vector<16x8xbf16>, vector<8x32xbf16>, vector<16x32xf32> -> vector<16x32xf32>
    %96 = arith.addf %50, %95 : vector<16x32xf32>
    %c2 = arith.constant 2 : index
    %c0_61 = arith.constant 0 : index
    %c0_62 = arith.constant 0 : index
    %97 = vector.load %arg4[%c2, %c0_61, %c0_62] : memref<4x32x8xbf16, #tpu.memory_space<vmem>>, vector<1x32x8xbf16>
    %98 = vector.shape_cast %97 : vector<1x32x8xbf16> to vector<32x8xbf16>
    %cst_63 = arith.constant dense<0.000000e+00> : vector<16x8xf32>
    %99 = tpu.matmul %4, %98, %cst_63 {dimension_numbers = #tpu.dot_dimension_numbers<[1], [0], [0], [1], [0, 0, 1, 1], [], []>} : vector<16x32xbf16>, vector<32x8xbf16>, vector<16x8xf32> -> vector<16x8xf32>
    %c2_64 = arith.constant 2 : index
    %c0_65 = arith.constant 0 : index
    %c0_66 = arith.constant 0 : index
    %100 = vector.load %arg5[%c2_64, %c0_65, %c0_66] : memref<4x1x8xf32, #tpu.memory_space<vmem>>, vector<1x1x8xf32>
    %101 = vector.shape_cast %100 : vector<1x1x8xf32> to vector<1x8xf32>
    %102 = vector.broadcast %101 : vector<1x8xf32> to vector<16x8xf32>
    %103 = arith.addf %99, %102 : vector<16x8xf32>
    %104 = arith.truncf %103 : vector<16x8xf32> to vector<16x8xbf16>
    %c2_67 = arith.constant 2 : index
    %c0_68 = arith.constant 0 : index
    %c0_69 = arith.constant 0 : index
    %105 = vector.load %arg6[%c2_67, %c0_68, %c0_69] : memref<4x32x8xbf16, #tpu.memory_space<vmem>>, vector<1x32x8xbf16>
    %106 = vector.shape_cast %105 : vector<1x32x8xbf16> to vector<32x8xbf16>
    %cst_70 = arith.constant dense<0.000000e+00> : vector<16x8xf32>
    %107 = tpu.matmul %4, %106, %cst_70 {dimension_numbers = #tpu.dot_dimension_numbers<[1], [0], [0], [1], [0, 0, 1, 1], [], []>} : vector<16x32xbf16>, vector<32x8xbf16>, vector<16x8xf32> -> vector<16x8xf32>
    %c2_71 = arith.constant 2 : index
    %c0_72 = arith.constant 0 : index
    %c0_73 = arith.constant 0 : index
    %108 = vector.load %arg7[%c2_71, %c0_72, %c0_73] : memref<4x1x8xf32, #tpu.memory_space<vmem>>, vector<1x1x8xf32>
    %109 = vector.shape_cast %108 : vector<1x1x8xf32> to vector<1x8xf32>
    %110 = vector.broadcast %109 : vector<1x8xf32> to vector<16x8xf32>
    %111 = arith.addf %107, %110 : vector<16x8xf32>
    %112 = arith.truncf %111 : vector<16x8xf32> to vector<16x8xbf16>
    %c2_74 = arith.constant 2 : index
    %c0_75 = arith.constant 0 : index
    %c0_76 = arith.constant 0 : index
    %113 = vector.load %arg8[%c2_74, %c0_75, %c0_76] : memref<4x32x8xbf16, #tpu.memory_space<vmem>>, vector<1x32x8xbf16>
    %114 = vector.shape_cast %113 : vector<1x32x8xbf16> to vector<32x8xbf16>
    %cst_77 = arith.constant dense<0.000000e+00> : vector<16x8xf32>
    %115 = tpu.matmul %4, %114, %cst_77 {dimension_numbers = #tpu.dot_dimension_numbers<[1], [0], [0], [1], [0, 0, 1, 1], [], []>} : vector<16x32xbf16>, vector<32x8xbf16>, vector<16x8xf32> -> vector<16x8xf32>
    %c2_78 = arith.constant 2 : index
    %c0_79 = arith.constant 0 : index
    %c0_80 = arith.constant 0 : index
    %116 = vector.load %arg9[%c2_78, %c0_79, %c0_80] : memref<4x1x8xf32, #tpu.memory_space<vmem>>, vector<1x1x8xf32>
    %117 = vector.shape_cast %116 : vector<1x1x8xf32> to vector<1x8xf32>
    %118 = vector.broadcast %117 : vector<1x8xf32> to vector<16x8xf32>
    %119 = arith.addf %115, %118 : vector<16x8xf32>
    %120 = arith.truncf %119 : vector<16x8xf32> to vector<16x8xbf16>
    %121 = vector.shape_cast %104 : vector<16x8xbf16> to vector<2x8x8xbf16>
    %122 = vector.shape_cast %112 : vector<16x8xbf16> to vector<2x8x8xbf16>
    "tpu.trace_start"() <{level = 10 : i32, message = "bqd,bkd->bqk"}> : () -> ()
    %cst_81 = arith.constant dense<0.000000e+00> : vector<2x8x8xf32>
    %123 = tpu.matmul %121, %122, %cst_81 {dimension_numbers = #tpu.dot_dimension_numbers<[2], [2], [1], [1], [0, 0, 0, 1, 1, 1], [0], [0]>} : vector<2x8x8xbf16>, vector<2x8x8xbf16>, vector<2x8x8xf32> -> vector<2x8x8xf32>
    "tpu.trace_stop"() : () -> ()
    %cst_82 = arith.constant dense<0xFF800000> : vector<2x8xf32>
    %124 = vector.multi_reduction <maximumf>, %123, %cst_82 [2] : vector<2x8x8xf32> to vector<2x8xf32>
    %125 = vector.shape_cast %124 : vector<2x8xf32> to vector<2x8x1xf32>
    %126 = vector.broadcast %125 : vector<2x8x1xf32> to vector<2x8x8xf32>
    %127 = arith.subf %123, %126 : vector<2x8x8xf32>
    %128 = math.exp %127 : vector<2x8x8xf32>
    %cst_83 = arith.constant dense<0.000000e+00> : vector<2x8xf32>
    %129 = vector.multi_reduction <add>, %128, %cst_83 [2] : vector<2x8x8xf32> to vector<2x8xf32>
    %130 = vector.shape_cast %129 : vector<2x8xf32> to vector<2x8x1xf32>
    %131 = tpu.reciprocal %130 {approx = true} : vector<2x8x1xf32> -> vector<2x8x1xf32>
    %132 = vector.broadcast %131 : vector<2x8x1xf32> to vector<2x8x8xf32>
    %133 = arith.mulf %128, %132 : vector<2x8x8xf32>
    %134 = arith.truncf %133 : vector<2x8x8xf32> to vector<2x8x8xbf16>
    %135 = vector.shape_cast %120 : vector<16x8xbf16> to vector<2x8x8xbf16>
    "tpu.trace_start"() <{level = 10 : i32, message = "bqk,bkd->bqd"}> : () -> ()
    %cst_84 = arith.constant dense<0.000000e+00> : vector<2x8x8xf32>
    %136 = tpu.matmul %134, %135, %cst_84 {dimension_numbers = #tpu.dot_dimension_numbers<[2], [1], [1], [2], [0, 0, 0, 1, 1, 2], [0], [0]>} : vector<2x8x8xbf16>, vector<2x8x8xbf16>, vector<2x8x8xf32> -> vector<2x8x8xf32>
    "tpu.trace_stop"() : () -> ()
    %137 = vector.shape_cast %136 : vector<2x8x8xf32> to vector<16x8xf32>
    %138 = arith.truncf %137 : vector<16x8xf32> to vector<16x8xbf16>
    %c2_85 = arith.constant 2 : index
    %c0_86 = arith.constant 0 : index
    %c0_87 = arith.constant 0 : index
    %139 = vector.load %arg10[%c2_85, %c0_86, %c0_87] : memref<4x8x32xbf16, #tpu.memory_space<vmem>>, vector<1x8x32xbf16>
    %140 = vector.shape_cast %139 : vector<1x8x32xbf16> to vector<8x32xbf16>
    %cst_88 = arith.constant dense<0.000000e+00> : vector<16x32xf32>
    %141 = tpu.matmul %138, %140, %cst_88 {dimension_numbers = #tpu.dot_dimension_numbers<[1], [0], [0], [1], [0, 0, 1, 1], [], []>} : vector<16x8xbf16>, vector<8x32xbf16>, vector<16x32xf32> -> vector<16x32xf32>
    %142 = arith.addf %96, %141 : vector<16x32xf32>
    %c3 = arith.constant 3 : index
    %c0_89 = arith.constant 0 : index
    %c0_90 = arith.constant 0 : index
    %143 = vector.load %arg4[%c3, %c0_89, %c0_90] : memref<4x32x8xbf16, #tpu.memory_space<vmem>>, vector<1x32x8xbf16>
    %144 = vector.shape_cast %143 : vector<1x32x8xbf16> to vector<32x8xbf16>
    %cst_91 = arith.constant dense<0.000000e+00> : vector<16x8xf32>
    %145 = tpu.matmul %4, %144, %cst_91 {dimension_numbers = #tpu.dot_dimension_numbers<[1], [0], [0], [1], [0, 0, 1, 1], [], []>} : vector<16x32xbf16>, vector<32x8xbf16>, vector<16x8xf32> -> vector<16x8xf32>
    %c3_92 = arith.constant 3 : index
    %c0_93 = arith.constant 0 : index
    %c0_94 = arith.constant 0 : index
    %146 = vector.load %arg5[%c3_92, %c0_93, %c0_94] : memref<4x1x8xf32, #tpu.memory_space<vmem>>, vector<1x1x8xf32>
    %147 = vector.shape_cast %146 : vector<1x1x8xf32> to vector<1x8xf32>
    %148 = vector.broadcast %147 : vector<1x8xf32> to vector<16x8xf32>
    %149 = arith.addf %145, %148 : vector<16x8xf32>
    %150 = arith.truncf %149 : vector<16x8xf32> to vector<16x8xbf16>
    %c3_95 = arith.constant 3 : index
    %c0_96 = arith.constant 0 : index
    %c0_97 = arith.constant 0 : index
    %151 = vector.load %arg6[%c3_95, %c0_96, %c0_97] : memref<4x32x8xbf16, #tpu.memory_space<vmem>>, vector<1x32x8xbf16>
    %152 = vector.shape_cast %151 : vector<1x32x8xbf16> to vector<32x8xbf16>
    %cst_98 = arith.constant dense<0.000000e+00> : vector<16x8xf32>
    %153 = tpu.matmul %4, %152, %cst_98 {dimension_numbers = #tpu.dot_dimension_numbers<[1], [0], [0], [1], [0, 0, 1, 1], [], []>} : vector<16x32xbf16>, vector<32x8xbf16>, vector<16x8xf32> -> vector<16x8xf32>
    %c3_99 = arith.constant 3 : index
    %c0_100 = arith.constant 0 : index
    %c0_101 = arith.constant 0 : index
    %154 = vector.load %arg7[%c3_99, %c0_100, %c0_101] : memref<4x1x8xf32, #tpu.memory_space<vmem>>, vector<1x1x8xf32>
    %155 = vector.shape_cast %154 : vector<1x1x8xf32> to vector<1x8xf32>
    %156 = vector.broadcast %155 : vector<1x8xf32> to vector<16x8xf32>
    %157 = arith.addf %153, %156 : vector<16x8xf32>
    %158 = arith.truncf %157 : vector<16x8xf32> to vector<16x8xbf16>
    %c3_102 = arith.constant 3 : index
    %c0_103 = arith.constant 0 : index
    %c0_104 = arith.constant 0 : index
    %159 = vector.load %arg8[%c3_102, %c0_103, %c0_104] : memref<4x32x8xbf16, #tpu.memory_space<vmem>>, vector<1x32x8xbf16>
    %160 = vector.shape_cast %159 : vector<1x32x8xbf16> to vector<32x8xbf16>
    %cst_105 = arith.constant dense<0.000000e+00> : vector<16x8xf32>
    %161 = tpu.matmul %4, %160, %cst_105 {dimension_numbers = #tpu.dot_dimension_numbers<[1], [0], [0], [1], [0, 0, 1, 1], [], []>} : vector<16x32xbf16>, vector<32x8xbf16>, vector<16x8xf32> -> vector<16x8xf32>
    %c3_106 = arith.constant 3 : index
    %c0_107 = arith.constant 0 : index
    %c0_108 = arith.constant 0 : index
    %162 = vector.load %arg9[%c3_106, %c0_107, %c0_108] : memref<4x1x8xf32, #tpu.memory_space<vmem>>, vector<1x1x8xf32>
    %163 = vector.shape_cast %162 : vector<1x1x8xf32> to vector<1x8xf32>
    %164 = vector.broadcast %163 : vector<1x8xf32> to vector<16x8xf32>
    %165 = arith.addf %161, %164 : vector<16x8xf32>
    %166 = arith.truncf %165 : vector<16x8xf32> to vector<16x8xbf16>
    %167 = vector.shape_cast %150 : vector<16x8xbf16> to vector<2x8x8xbf16>
    %168 = vector.shape_cast %158 : vector<16x8xbf16> to vector<2x8x8xbf16>
    "tpu.trace_start"() <{level = 10 : i32, message = "bqd,bkd->bqk"}> : () -> ()
    %cst_109 = arith.constant dense<0.000000e+00> : vector<2x8x8xf32>
    %169 = tpu.matmul %167, %168, %cst_109 {dimension_numbers = #tpu.dot_dimension_numbers<[2], [2], [1], [1], [0, 0, 0, 1, 1, 1], [0], [0]>} : vector<2x8x8xbf16>, vector<2x8x8xbf16>, vector<2x8x8xf32> -> vector<2x8x8xf32>
    "tpu.trace_stop"() : () -> ()
    %cst_110 = arith.constant dense<0xFF800000> : vector<2x8xf32>
    %170 = vector.multi_reduction <maximumf>, %169, %cst_110 [2] : vector<2x8x8xf32> to vector<2x8xf32>
    %171 = vector.shape_cast %170 : vector<2x8xf32> to vector<2x8x1xf32>
    %172 = vector.broadcast %171 : vector<2x8x1xf32> to vector<2x8x8xf32>
    %173 = arith.subf %169, %172 : vector<2x8x8xf32>
    %174 = math.exp %173 : vector<2x8x8xf32>
    %cst_111 = arith.constant dense<0.000000e+00> : vector<2x8xf32>
    %175 = vector.multi_reduction <add>, %174, %cst_111 [2] : vector<2x8x8xf32> to vector<2x8xf32>
    %176 = vector.shape_cast %175 : vector<2x8xf32> to vector<2x8x1xf32>
    %177 = tpu.reciprocal %176 {approx = true} : vector<2x8x1xf32> -> vector<2x8x1xf32>
    %178 = vector.broadcast %177 : vector<2x8x1xf32> to vector<2x8x8xf32>
    %179 = arith.mulf %174, %178 : vector<2x8x8xf32>
    %180 = arith.truncf %179 : vector<2x8x8xf32> to vector<2x8x8xbf16>
    %181 = vector.shape_cast %166 : vector<16x8xbf16> to vector<2x8x8xbf16>
    "tpu.trace_start"() <{level = 10 : i32, message = "bqk,bkd->bqd"}> : () -> ()
    %cst_112 = arith.constant dense<0.000000e+00> : vector<2x8x8xf32>
    %182 = tpu.matmul %180, %181, %cst_112 {dimension_numbers = #tpu.dot_dimension_numbers<[2], [1], [1], [2], [0, 0, 0, 1, 1, 2], [0], [0]>} : vector<2x8x8xbf16>, vector<2x8x8xbf16>, vector<2x8x8xf32> -> vector<2x8x8xf32>
    "tpu.trace_stop"() : () -> ()
    %183 = vector.shape_cast %182 : vector<2x8x8xf32> to vector<16x8xf32>
    %184 = arith.truncf %183 : vector<16x8xf32> to vector<16x8xbf16>
    %c3_113 = arith.constant 3 : index
    %c0_114 = arith.constant 0 : index
    %c0_115 = arith.constant 0 : index
    %185 = vector.load %arg10[%c3_113, %c0_114, %c0_115] : memref<4x8x32xbf16, #tpu.memory_space<vmem>>, vector<1x8x32xbf16>
    %186 = vector.shape_cast %185 : vector<1x8x32xbf16> to vector<8x32xbf16>
    %cst_116 = arith.constant dense<0.000000e+00> : vector<16x32xf32>
    %187 = tpu.matmul %184, %186, %cst_116 {dimension_numbers = #tpu.dot_dimension_numbers<[1], [0], [0], [1], [0, 0, 1, 1], [], []>} : vector<16x8xbf16>, vector<8x32xbf16>, vector<16x32xf32> -> vector<16x32xf32>
    %188 = arith.addf %142, %187 : vector<16x32xf32>
    %c0_117 = arith.constant 0 : index
    %c0_118 = arith.constant 0 : index
    %189 = vector.load %arg11[%c0_117, %c0_118] : memref<1x32xf32, #tpu.memory_space<vmem>>, vector<1x32xf32>
    %190 = vector.broadcast %189 : vector<1x32xf32> to vector<16x32xf32>
    %191 = arith.addf %188, %190 : vector<16x32xf32>
    %cst_119 = arith.constant dense<0.000000e+00> : vector<16xf32>
    %192 = vector.multi_reduction <add>, %191, %cst_119 [1] : vector<16x32xf32> to vector<16xf32>
    %193 = vector.shape_cast %192 : vector<16xf32> to vector<16x1xf32>
    %cst_120 = arith.constant 3.200000e+01 : f32
    %194 = vector.broadcast %cst_120 : f32 to vector<16x1xf32>
    %195 = arith.divf %193, %194 : vector<16x1xf32>
    %196 = vector.broadcast %195 : vector<16x1xf32> to vector<16x32xf32>
    %197 = arith.subf %191, %196 : vector<16x32xf32>
    %198 = arith.mulf %197, %197 : vector<16x32xf32>
    %cst_121 = arith.constant dense<0.000000e+00> : vector<16xf32>
    %199 = vector.multi_reduction <add>, %198, %cst_121 [1] : vector<16x32xf32> to vector<16xf32>
    %200 = vector.shape_cast %199 : vector<16xf32> to vector<16x1xf32>
    %cst_122 = arith.constant 3.200000e+01 : f32
    %201 = vector.broadcast %cst_122 : f32 to vector<16x1xf32>
    %202 = arith.divf %200, %201 : vector<16x1xf32>
    %203 = vector.broadcast %195 : vector<16x1xf32> to vector<16x32xf32>
    %204 = arith.subf %191, %203 : vector<16x32xf32>
    %cst_123 = arith.constant 9.99999974E-6 : f32
    %205 = vector.broadcast %cst_123 : f32 to vector<16x1xf32>
    %206 = arith.addf %202, %205 : vector<16x1xf32>
    %207 = math.rsqrt %206 : vector<16x1xf32>
    %208 = vector.broadcast %207 : vector<16x1xf32> to vector<16x32xf32>
    %209 = arith.mulf %204, %208 : vector<16x32xf32>
    %c0_124 = arith.constant 0 : index
    %c0_125 = arith.constant 0 : index
    %210 = vector.load %arg24[%c0_124, %c0_125] : memref<1x32xf32, #tpu.memory_space<vmem>>, vector<1x32xf32>
    %211 = vector.broadcast %210 : vector<1x32xf32> to vector<16x32xf32>
    %212 = arith.mulf %209, %211 : vector<16x32xf32>
    %c0_126 = arith.constant 0 : index
    %c0_127 = arith.constant 0 : index
    %213 = vector.load %arg25[%c0_126, %c0_127] : memref<1x32xf32, #tpu.memory_space<vmem>>, vector<1x32xf32>
    %214 = vector.broadcast %213 : vector<1x32xf32> to vector<16x32xf32>
    %215 = arith.addf %212, %214 : vector<16x32xf32>
    %c0_128 = arith.constant 0 : index
    %c0_129 = arith.constant 0 : index
    %216 = vector.load %arg2[%c0_128, %c0_129] : memref<16x32xf32, #tpu.memory_space<vmem>>, vector<16x32xf32>
    %217 = arith.addf %215, %216 : vector<16x32xf32>
    %c0_130 = arith.constant 0 : index
    %c0_131 = arith.constant 0 : index
    %218 = vector.load %arg3[%c0_130, %c0_131] : memref<32x32xf32, #tpu.memory_space<vmem>>, vector<32x32xf32>
    %219 = arith.addf %1, %218 : vector<32x32xf32>
    %220 = arith.truncf %217 : vector<16x32xf32> to vector<16x32xbf16>
    %221 = arith.truncf %219 : vector<32x32xf32> to vector<32x32xbf16>
    %c0_132 = arith.constant 0 : index
    %c0_133 = arith.constant 0 : index
    %c0_134 = arith.constant 0 : index
    %222 = vector.load %arg12[%c0_132, %c0_133, %c0_134] : memref<4x32x8xbf16, #tpu.memory_space<vmem>>, vector<1x32x8xbf16>
    %223 = vector.shape_cast %222 : vector<1x32x8xbf16> to vector<32x8xbf16>
    %cst_135 = arith.constant dense<0.000000e+00> : vector<16x8xf32>
    %224 = tpu.matmul %220, %223, %cst_135 {dimension_numbers = #tpu.dot_dimension_numbers<[1], [0], [0], [1], [0, 0, 1, 1], [], []>} : vector<16x32xbf16>, vector<32x8xbf16>, vector<16x8xf32> -> vector<16x8xf32>
    %c0_136 = arith.constant 0 : index
    %c0_137 = arith.constant 0 : index
    %c0_138 = arith.constant 0 : index
    %225 = vector.load %arg13[%c0_136, %c0_137, %c0_138] : memref<4x1x8xf32, #tpu.memory_space<vmem>>, vector<1x1x8xf32>
    %226 = vector.shape_cast %225 : vector<1x1x8xf32> to vector<1x8xf32>
    %227 = vector.broadcast %226 : vector<1x8xf32> to vector<16x8xf32>
    %228 = arith.addf %224, %227 : vector<16x8xf32>
    %229 = arith.truncf %228 : vector<16x8xf32> to vector<16x8xbf16>
    %c0_139 = arith.constant 0 : index
    %c0_140 = arith.constant 0 : index
    %c0_141 = arith.constant 0 : index
    %230 = vector.load %arg14[%c0_139, %c0_140, %c0_141] : memref<4x32x8xbf16, #tpu.memory_space<vmem>>, vector<1x32x8xbf16>
    %231 = vector.shape_cast %230 : vector<1x32x8xbf16> to vector<32x8xbf16>
    %cst_142 = arith.constant dense<0.000000e+00> : vector<32x8xf32>
    %232 = tpu.matmul %221, %231, %cst_142 {dimension_numbers = #tpu.dot_dimension_numbers<[1], [0], [0], [1], [0, 0, 1, 1], [], []>} : vector<32x32xbf16>, vector<32x8xbf16>, vector<32x8xf32> -> vector<32x8xf32>
    %c0_143 = arith.constant 0 : index
    %c0_144 = arith.constant 0 : index
    %c0_145 = arith.constant 0 : index
    %233 = vector.load %arg15[%c0_143, %c0_144, %c0_145] : memref<4x1x8xf32, #tpu.memory_space<vmem>>, vector<1x1x8xf32>
    %234 = vector.shape_cast %233 : vector<1x1x8xf32> to vector<1x8xf32>
    %235 = vector.broadcast %234 : vector<1x8xf32> to vector<32x8xf32>
    %236 = arith.addf %232, %235 : vector<32x8xf32>
    %237 = arith.truncf %236 : vector<32x8xf32> to vector<32x8xbf16>
    %c0_146 = arith.constant 0 : index
    %c0_147 = arith.constant 0 : index
    %c0_148 = arith.constant 0 : index
    %238 = vector.load %arg16[%c0_146, %c0_147, %c0_148] : memref<4x32x8xbf16, #tpu.memory_space<vmem>>, vector<1x32x8xbf16>
    %239 = vector.shape_cast %238 : vector<1x32x8xbf16> to vector<32x8xbf16>
    %cst_149 = arith.constant dense<0.000000e+00> : vector<32x8xf32>
    %240 = tpu.matmul %221, %239, %cst_149 {dimension_numbers = #tpu.dot_dimension_numbers<[1], [0], [0], [1], [0, 0, 1, 1], [], []>} : vector<32x32xbf16>, vector<32x8xbf16>, vector<32x8xf32> -> vector<32x8xf32>
    %c0_150 = arith.constant 0 : index
    %c0_151 = arith.constant 0 : index
    %c0_152 = arith.constant 0 : index
    %241 = vector.load %arg17[%c0_150, %c0_151, %c0_152] : memref<4x1x8xf32, #tpu.memory_space<vmem>>, vector<1x1x8xf32>
    %242 = vector.shape_cast %241 : vector<1x1x8xf32> to vector<1x8xf32>
    %243 = vector.broadcast %242 : vector<1x8xf32> to vector<32x8xf32>
    %244 = arith.addf %240, %243 : vector<32x8xf32>
    %245 = arith.truncf %244 : vector<32x8xf32> to vector<32x8xbf16>
    %246 = vector.shape_cast %229 : vector<16x8xbf16> to vector<2x8x8xbf16>
    %247 = vector.shape_cast %237 : vector<32x8xbf16> to vector<2x16x8xbf16>
    "tpu.trace_start"() <{level = 10 : i32, message = "bqd,bkd->bqk"}> : () -> ()
    %cst_153 = arith.constant dense<0.000000e+00> : vector<2x8x16xf32>
    %248 = tpu.matmul %246, %247, %cst_153 {dimension_numbers = #tpu.dot_dimension_numbers<[2], [2], [1], [1], [0, 0, 0, 1, 1, 1], [0], [0]>} : vector<2x8x8xbf16>, vector<2x16x8xbf16>, vector<2x8x16xf32> -> vector<2x8x16xf32>
    "tpu.trace_stop"() : () -> ()
    %cst_154 = arith.constant dense<0xFF800000> : vector<2x8xf32>
    %249 = vector.multi_reduction <maximumf>, %248, %cst_154 [2] : vector<2x8x16xf32> to vector<2x8xf32>
    %250 = vector.shape_cast %249 : vector<2x8xf32> to vector<2x8x1xf32>
    %251 = vector.broadcast %250 : vector<2x8x1xf32> to vector<2x8x16xf32>
    %252 = arith.subf %248, %251 : vector<2x8x16xf32>
    %253 = math.exp %252 : vector<2x8x16xf32>
    %cst_155 = arith.constant dense<0.000000e+00> : vector<2x8xf32>
    %254 = vector.multi_reduction <add>, %253, %cst_155 [2] : vector<2x8x16xf32> to vector<2x8xf32>
    %255 = vector.shape_cast %254 : vector<2x8xf32> to vector<2x8x1xf32>
    %256 = tpu.reciprocal %255 {approx = true} : vector<2x8x1xf32> -> vector<2x8x1xf32>
    %257 = vector.broadcast %256 : vector<2x8x1xf32> to vector<2x8x16xf32>
    %258 = arith.mulf %253, %257 : vector<2x8x16xf32>
    %259 = arith.truncf %258 : vector<2x8x16xf32> to vector<2x8x16xbf16>
    %260 = vector.shape_cast %245 : vector<32x8xbf16> to vector<2x16x8xbf16>
    "tpu.trace_start"() <{level = 10 : i32, message = "bqk,bkd->bqd"}> : () -> ()
    %cst_156 = arith.constant dense<0.000000e+00> : vector<2x8x8xf32>
    %261 = tpu.matmul %259, %260, %cst_156 {dimension_numbers = #tpu.dot_dimension_numbers<[2], [1], [1], [2], [0, 0, 0, 1, 1, 2], [0], [0]>} : vector<2x8x16xbf16>, vector<2x16x8xbf16>, vector<2x8x8xf32> -> vector<2x8x8xf32>
    "tpu.trace_stop"() : () -> ()
    %262 = vector.shape_cast %261 : vector<2x8x8xf32> to vector<16x8xf32>
    %263 = arith.truncf %262 : vector<16x8xf32> to vector<16x8xbf16>
    %c0_157 = arith.constant 0 : index
    %c0_158 = arith.constant 0 : index
    %c0_159 = arith.constant 0 : index
    %264 = vector.load %arg18[%c0_157, %c0_158, %c0_159] : memref<4x8x32xbf16, #tpu.memory_space<vmem>>, vector<1x8x32xbf16>
    %265 = vector.shape_cast %264 : vector<1x8x32xbf16> to vector<8x32xbf16>
    %cst_160 = arith.constant dense<0.000000e+00> : vector<16x32xf32>
    %266 = tpu.matmul %263, %265, %cst_160 {dimension_numbers = #tpu.dot_dimension_numbers<[1], [0], [0], [1], [0, 0, 1, 1], [], []>} : vector<16x8xbf16>, vector<8x32xbf16>, vector<16x32xf32> -> vector<16x32xf32>
    %267 = arith.addf %215, %266 : vector<16x32xf32>
    %c1_161 = arith.constant 1 : index
    %c0_162 = arith.constant 0 : index
    %c0_163 = arith.constant 0 : index
    %268 = vector.load %arg12[%c1_161, %c0_162, %c0_163] : memref<4x32x8xbf16, #tpu.memory_space<vmem>>, vector<1x32x8xbf16>
    %269 = vector.shape_cast %268 : vector<1x32x8xbf16> to vector<32x8xbf16>
    %cst_164 = arith.constant dense<0.000000e+00> : vector<16x8xf32>
    %270 = tpu.matmul %220, %269, %cst_164 {dimension_numbers = #tpu.dot_dimension_numbers<[1], [0], [0], [1], [0, 0, 1, 1], [], []>} : vector<16x32xbf16>, vector<32x8xbf16>, vector<16x8xf32> -> vector<16x8xf32>
    %c1_165 = arith.constant 1 : index
    %c0_166 = arith.constant 0 : index
    %c0_167 = arith.constant 0 : index
    %271 = vector.load %arg13[%c1_165, %c0_166, %c0_167] : memref<4x1x8xf32, #tpu.memory_space<vmem>>, vector<1x1x8xf32>
    %272 = vector.shape_cast %271 : vector<1x1x8xf32> to vector<1x8xf32>
    %273 = vector.broadcast %272 : vector<1x8xf32> to vector<16x8xf32>
    %274 = arith.addf %270, %273 : vector<16x8xf32>
    %275 = arith.truncf %274 : vector<16x8xf32> to vector<16x8xbf16>
    %c1_168 = arith.constant 1 : index
    %c0_169 = arith.constant 0 : index
    %c0_170 = arith.constant 0 : index
    %276 = vector.load %arg14[%c1_168, %c0_169, %c0_170] : memref<4x32x8xbf16, #tpu.memory_space<vmem>>, vector<1x32x8xbf16>
    %277 = vector.shape_cast %276 : vector<1x32x8xbf16> to vector<32x8xbf16>
    %cst_171 = arith.constant dense<0.000000e+00> : vector<32x8xf32>
    %278 = tpu.matmul %221, %277, %cst_171 {dimension_numbers = #tpu.dot_dimension_numbers<[1], [0], [0], [1], [0, 0, 1, 1], [], []>} : vector<32x32xbf16>, vector<32x8xbf16>, vector<32x8xf32> -> vector<32x8xf32>
    %c1_172 = arith.constant 1 : index
    %c0_173 = arith.constant 0 : index
    %c0_174 = arith.constant 0 : index
    %279 = vector.load %arg15[%c1_172, %c0_173, %c0_174] : memref<4x1x8xf32, #tpu.memory_space<vmem>>, vector<1x1x8xf32>
    %280 = vector.shape_cast %279 : vector<1x1x8xf32> to vector<1x8xf32>
    %281 = vector.broadcast %280 : vector<1x8xf32> to vector<32x8xf32>
    %282 = arith.addf %278, %281 : vector<32x8xf32>
    %283 = arith.truncf %282 : vector<32x8xf32> to vector<32x8xbf16>
    %c1_175 = arith.constant 1 : index
    %c0_176 = arith.constant 0 : index
    %c0_177 = arith.constant 0 : index
    %284 = vector.load %arg16[%c1_175, %c0_176, %c0_177] : memref<4x32x8xbf16, #tpu.memory_space<vmem>>, vector<1x32x8xbf16>
    %285 = vector.shape_cast %284 : vector<1x32x8xbf16> to vector<32x8xbf16>
    %cst_178 = arith.constant dense<0.000000e+00> : vector<32x8xf32>
    %286 = tpu.matmul %221, %285, %cst_178 {dimension_numbers = #tpu.dot_dimension_numbers<[1], [0], [0], [1], [0, 0, 1, 1], [], []>} : vector<32x32xbf16>, vector<32x8xbf16>, vector<32x8xf32> -> vector<32x8xf32>
    %c1_179 = arith.constant 1 : index
    %c0_180 = arith.constant 0 : index
    %c0_181 = arith.constant 0 : index
    %287 = vector.load %arg17[%c1_179, %c0_180, %c0_181] : memref<4x1x8xf32, #tpu.memory_space<vmem>>, vector<1x1x8xf32>
    %288 = vector.shape_cast %287 : vector<1x1x8xf32> to vector<1x8xf32>
    %289 = vector.broadcast %288 : vector<1x8xf32> to vector<32x8xf32>
    %290 = arith.addf %286, %289 : vector<32x8xf32>
    %291 = arith.truncf %290 : vector<32x8xf32> to vector<32x8xbf16>
    %292 = vector.shape_cast %275 : vector<16x8xbf16> to vector<2x8x8xbf16>
    %293 = vector.shape_cast %283 : vector<32x8xbf16> to vector<2x16x8xbf16>
    "tpu.trace_start"() <{level = 10 : i32, message = "bqd,bkd->bqk"}> : () -> ()
    %cst_182 = arith.constant dense<0.000000e+00> : vector<2x8x16xf32>
    %294 = tpu.matmul %292, %293, %cst_182 {dimension_numbers = #tpu.dot_dimension_numbers<[2], [2], [1], [1], [0, 0, 0, 1, 1, 1], [0], [0]>} : vector<2x8x8xbf16>, vector<2x16x8xbf16>, vector<2x8x16xf32> -> vector<2x8x16xf32>
    "tpu.trace_stop"() : () -> ()
    %cst_183 = arith.constant dense<0xFF800000> : vector<2x8xf32>
    %295 = vector.multi_reduction <maximumf>, %294, %cst_183 [2] : vector<2x8x16xf32> to vector<2x8xf32>
    %296 = vector.shape_cast %295 : vector<2x8xf32> to vector<2x8x1xf32>
    %297 = vector.broadcast %296 : vector<2x8x1xf32> to vector<2x8x16xf32>
    %298 = arith.subf %294, %297 : vector<2x8x16xf32>
    %299 = math.exp %298 : vector<2x8x16xf32>
    %cst_184 = arith.constant dense<0.000000e+00> : vector<2x8xf32>
    %300 = vector.multi_reduction <add>, %299, %cst_184 [2] : vector<2x8x16xf32> to vector<2x8xf32>
    %301 = vector.shape_cast %300 : vector<2x8xf32> to vector<2x8x1xf32>
    %302 = tpu.reciprocal %301 {approx = true} : vector<2x8x1xf32> -> vector<2x8x1xf32>
    %303 = vector.broadcast %302 : vector<2x8x1xf32> to vector<2x8x16xf32>
    %304 = arith.mulf %299, %303 : vector<2x8x16xf32>
    %305 = arith.truncf %304 : vector<2x8x16xf32> to vector<2x8x16xbf16>
    %306 = vector.shape_cast %291 : vector<32x8xbf16> to vector<2x16x8xbf16>
    "tpu.trace_start"() <{level = 10 : i32, message = "bqk,bkd->bqd"}> : () -> ()
    %cst_185 = arith.constant dense<0.000000e+00> : vector<2x8x8xf32>
    %307 = tpu.matmul %305, %306, %cst_185 {dimension_numbers = #tpu.dot_dimension_numbers<[2], [1], [1], [2], [0, 0, 0, 1, 1, 2], [0], [0]>} : vector<2x8x16xbf16>, vector<2x16x8xbf16>, vector<2x8x8xf32> -> vector<2x8x8xf32>
    "tpu.trace_stop"() : () -> ()
    %308 = vector.shape_cast %307 : vector<2x8x8xf32> to vector<16x8xf32>
    %309 = arith.truncf %308 : vector<16x8xf32> to vector<16x8xbf16>
    %c1_186 = arith.constant 1 : index
    %c0_187 = arith.constant 0 : index
    %c0_188 = arith.constant 0 : index
    %310 = vector.load %arg18[%c1_186, %c0_187, %c0_188] : memref<4x8x32xbf16, #tpu.memory_space<vmem>>, vector<1x8x32xbf16>
    %311 = vector.shape_cast %310 : vector<1x8x32xbf16> to vector<8x32xbf16>
    %cst_189 = arith.constant dense<0.000000e+00> : vector<16x32xf32>
    %312 = tpu.matmul %309, %311, %cst_189 {dimension_numbers = #tpu.dot_dimension_numbers<[1], [0], [0], [1], [0, 0, 1, 1], [], []>} : vector<16x8xbf16>, vector<8x32xbf16>, vector<16x32xf32> -> vector<16x32xf32>
    %313 = arith.addf %267, %312 : vector<16x32xf32>
    %c2_190 = arith.constant 2 : index
    %c0_191 = arith.constant 0 : index
    %c0_192 = arith.constant 0 : index
    %314 = vector.load %arg12[%c2_190, %c0_191, %c0_192] : memref<4x32x8xbf16, #tpu.memory_space<vmem>>, vector<1x32x8xbf16>
    %315 = vector.shape_cast %314 : vector<1x32x8xbf16> to vector<32x8xbf16>
    %cst_193 = arith.constant dense<0.000000e+00> : vector<16x8xf32>
    %316 = tpu.matmul %220, %315, %cst_193 {dimension_numbers = #tpu.dot_dimension_numbers<[1], [0], [0], [1], [0, 0, 1, 1], [], []>} : vector<16x32xbf16>, vector<32x8xbf16>, vector<16x8xf32> -> vector<16x8xf32>
    %c2_194 = arith.constant 2 : index
    %c0_195 = arith.constant 0 : index
    %c0_196 = arith.constant 0 : index
    %317 = vector.load %arg13[%c2_194, %c0_195, %c0_196] : memref<4x1x8xf32, #tpu.memory_space<vmem>>, vector<1x1x8xf32>
    %318 = vector.shape_cast %317 : vector<1x1x8xf32> to vector<1x8xf32>
    %319 = vector.broadcast %318 : vector<1x8xf32> to vector<16x8xf32>
    %320 = arith.addf %316, %319 : vector<16x8xf32>
    %321 = arith.truncf %320 : vector<16x8xf32> to vector<16x8xbf16>
    %c2_197 = arith.constant 2 : index
    %c0_198 = arith.constant 0 : index
    %c0_199 = arith.constant 0 : index
    %322 = vector.load %arg14[%c2_197, %c0_198, %c0_199] : memref<4x32x8xbf16, #tpu.memory_space<vmem>>, vector<1x32x8xbf16>
    %323 = vector.shape_cast %322 : vector<1x32x8xbf16> to vector<32x8xbf16>
    %cst_200 = arith.constant dense<0.000000e+00> : vector<32x8xf32>
    %324 = tpu.matmul %221, %323, %cst_200 {dimension_numbers = #tpu.dot_dimension_numbers<[1], [0], [0], [1], [0, 0, 1, 1], [], []>} : vector<32x32xbf16>, vector<32x8xbf16>, vector<32x8xf32> -> vector<32x8xf32>
    %c2_201 = arith.constant 2 : index
    %c0_202 = arith.constant 0 : index
    %c0_203 = arith.constant 0 : index
    %325 = vector.load %arg15[%c2_201, %c0_202, %c0_203] : memref<4x1x8xf32, #tpu.memory_space<vmem>>, vector<1x1x8xf32>
    %326 = vector.shape_cast %325 : vector<1x1x8xf32> to vector<1x8xf32>
    %327 = vector.broadcast %326 : vector<1x8xf32> to vector<32x8xf32>
    %328 = arith.addf %324, %327 : vector<32x8xf32>
    %329 = arith.truncf %328 : vector<32x8xf32> to vector<32x8xbf16>
    %c2_204 = arith.constant 2 : index
    %c0_205 = arith.constant 0 : index
    %c0_206 = arith.constant 0 : index
    %330 = vector.load %arg16[%c2_204, %c0_205, %c0_206] : memref<4x32x8xbf16, #tpu.memory_space<vmem>>, vector<1x32x8xbf16>
    %331 = vector.shape_cast %330 : vector<1x32x8xbf16> to vector<32x8xbf16>
    %cst_207 = arith.constant dense<0.000000e+00> : vector<32x8xf32>
    %332 = tpu.matmul %221, %331, %cst_207 {dimension_numbers = #tpu.dot_dimension_numbers<[1], [0], [0], [1], [0, 0, 1, 1], [], []>} : vector<32x32xbf16>, vector<32x8xbf16>, vector<32x8xf32> -> vector<32x8xf32>
    %c2_208 = arith.constant 2 : index
    %c0_209 = arith.constant 0 : index
    %c0_210 = arith.constant 0 : index
    %333 = vector.load %arg17[%c2_208, %c0_209, %c0_210] : memref<4x1x8xf32, #tpu.memory_space<vmem>>, vector<1x1x8xf32>
    %334 = vector.shape_cast %333 : vector<1x1x8xf32> to vector<1x8xf32>
    %335 = vector.broadcast %334 : vector<1x8xf32> to vector<32x8xf32>
    %336 = arith.addf %332, %335 : vector<32x8xf32>
    %337 = arith.truncf %336 : vector<32x8xf32> to vector<32x8xbf16>
    %338 = vector.shape_cast %321 : vector<16x8xbf16> to vector<2x8x8xbf16>
    %339 = vector.shape_cast %329 : vector<32x8xbf16> to vector<2x16x8xbf16>
    "tpu.trace_start"() <{level = 10 : i32, message = "bqd,bkd->bqk"}> : () -> ()
    %cst_211 = arith.constant dense<0.000000e+00> : vector<2x8x16xf32>
    %340 = tpu.matmul %338, %339, %cst_211 {dimension_numbers = #tpu.dot_dimension_numbers<[2], [2], [1], [1], [0, 0, 0, 1, 1, 1], [0], [0]>} : vector<2x8x8xbf16>, vector<2x16x8xbf16>, vector<2x8x16xf32> -> vector<2x8x16xf32>
    "tpu.trace_stop"() : () -> ()
    %cst_212 = arith.constant dense<0xFF800000> : vector<2x8xf32>
    %341 = vector.multi_reduction <maximumf>, %340, %cst_212 [2] : vector<2x8x16xf32> to vector<2x8xf32>
    %342 = vector.shape_cast %341 : vector<2x8xf32> to vector<2x8x1xf32>
    %343 = vector.broadcast %342 : vector<2x8x1xf32> to vector<2x8x16xf32>
    %344 = arith.subf %340, %343 : vector<2x8x16xf32>
    %345 = math.exp %344 : vector<2x8x16xf32>
    %cst_213 = arith.constant dense<0.000000e+00> : vector<2x8xf32>
    %346 = vector.multi_reduction <add>, %345, %cst_213 [2] : vector<2x8x16xf32> to vector<2x8xf32>
    %347 = vector.shape_cast %346 : vector<2x8xf32> to vector<2x8x1xf32>
    %348 = tpu.reciprocal %347 {approx = true} : vector<2x8x1xf32> -> vector<2x8x1xf32>
    %349 = vector.broadcast %348 : vector<2x8x1xf32> to vector<2x8x16xf32>
    %350 = arith.mulf %345, %349 : vector<2x8x16xf32>
    %351 = arith.truncf %350 : vector<2x8x16xf32> to vector<2x8x16xbf16>
    %352 = vector.shape_cast %337 : vector<32x8xbf16> to vector<2x16x8xbf16>
    "tpu.trace_start"() <{level = 10 : i32, message = "bqk,bkd->bqd"}> : () -> ()
    %cst_214 = arith.constant dense<0.000000e+00> : vector<2x8x8xf32>
    %353 = tpu.matmul %351, %352, %cst_214 {dimension_numbers = #tpu.dot_dimension_numbers<[2], [1], [1], [2], [0, 0, 0, 1, 1, 2], [0], [0]>} : vector<2x8x16xbf16>, vector<2x16x8xbf16>, vector<2x8x8xf32> -> vector<2x8x8xf32>
    "tpu.trace_stop"() : () -> ()
    %354 = vector.shape_cast %353 : vector<2x8x8xf32> to vector<16x8xf32>
    %355 = arith.truncf %354 : vector<16x8xf32> to vector<16x8xbf16>
    %c2_215 = arith.constant 2 : index
    %c0_216 = arith.constant 0 : index
    %c0_217 = arith.constant 0 : index
    %356 = vector.load %arg18[%c2_215, %c0_216, %c0_217] : memref<4x8x32xbf16, #tpu.memory_space<vmem>>, vector<1x8x32xbf16>
    %357 = vector.shape_cast %356 : vector<1x8x32xbf16> to vector<8x32xbf16>
    %cst_218 = arith.constant dense<0.000000e+00> : vector<16x32xf32>
    %358 = tpu.matmul %355, %357, %cst_218 {dimension_numbers = #tpu.dot_dimension_numbers<[1], [0], [0], [1], [0, 0, 1, 1], [], []>} : vector<16x8xbf16>, vector<8x32xbf16>, vector<16x32xf32> -> vector<16x32xf32>
    %359 = arith.addf %313, %358 : vector<16x32xf32>
    %c3_219 = arith.constant 3 : index
    %c0_220 = arith.constant 0 : index
    %c0_221 = arith.constant 0 : index
    %360 = vector.load %arg12[%c3_219, %c0_220, %c0_221] : memref<4x32x8xbf16, #tpu.memory_space<vmem>>, vector<1x32x8xbf16>
    %361 = vector.shape_cast %360 : vector<1x32x8xbf16> to vector<32x8xbf16>
    %cst_222 = arith.constant dense<0.000000e+00> : vector<16x8xf32>
    %362 = tpu.matmul %220, %361, %cst_222 {dimension_numbers = #tpu.dot_dimension_numbers<[1], [0], [0], [1], [0, 0, 1, 1], [], []>} : vector<16x32xbf16>, vector<32x8xbf16>, vector<16x8xf32> -> vector<16x8xf32>
    %c3_223 = arith.constant 3 : index
    %c0_224 = arith.constant 0 : index
    %c0_225 = arith.constant 0 : index
    %363 = vector.load %arg13[%c3_223, %c0_224, %c0_225] : memref<4x1x8xf32, #tpu.memory_space<vmem>>, vector<1x1x8xf32>
    %364 = vector.shape_cast %363 : vector<1x1x8xf32> to vector<1x8xf32>
    %365 = vector.broadcast %364 : vector<1x8xf32> to vector<16x8xf32>
    %366 = arith.addf %362, %365 : vector<16x8xf32>
    %367 = arith.truncf %366 : vector<16x8xf32> to vector<16x8xbf16>
    %c3_226 = arith.constant 3 : index
    %c0_227 = arith.constant 0 : index
    %c0_228 = arith.constant 0 : index
    %368 = vector.load %arg14[%c3_226, %c0_227, %c0_228] : memref<4x32x8xbf16, #tpu.memory_space<vmem>>, vector<1x32x8xbf16>
    %369 = vector.shape_cast %368 : vector<1x32x8xbf16> to vector<32x8xbf16>
    %cst_229 = arith.constant dense<0.000000e+00> : vector<32x8xf32>
    %370 = tpu.matmul %221, %369, %cst_229 {dimension_numbers = #tpu.dot_dimension_numbers<[1], [0], [0], [1], [0, 0, 1, 1], [], []>} : vector<32x32xbf16>, vector<32x8xbf16>, vector<32x8xf32> -> vector<32x8xf32>
    %c3_230 = arith.constant 3 : index
    %c0_231 = arith.constant 0 : index
    %c0_232 = arith.constant 0 : index
    %371 = vector.load %arg15[%c3_230, %c0_231, %c0_232] : memref<4x1x8xf32, #tpu.memory_space<vmem>>, vector<1x1x8xf32>
    %372 = vector.shape_cast %371 : vector<1x1x8xf32> to vector<1x8xf32>
    %373 = vector.broadcast %372 : vector<1x8xf32> to vector<32x8xf32>
    %374 = arith.addf %370, %373 : vector<32x8xf32>
    %375 = arith.truncf %374 : vector<32x8xf32> to vector<32x8xbf16>
    %c3_233 = arith.constant 3 : index
    %c0_234 = arith.constant 0 : index
    %c0_235 = arith.constant 0 : index
    %376 = vector.load %arg16[%c3_233, %c0_234, %c0_235] : memref<4x32x8xbf16, #tpu.memory_space<vmem>>, vector<1x32x8xbf16>
    %377 = vector.shape_cast %376 : vector<1x32x8xbf16> to vector<32x8xbf16>
    %cst_236 = arith.constant dense<0.000000e+00> : vector<32x8xf32>
    %378 = tpu.matmul %221, %377, %cst_236 {dimension_numbers = #tpu.dot_dimension_numbers<[1], [0], [0], [1], [0, 0, 1, 1], [], []>} : vector<32x32xbf16>, vector<32x8xbf16>, vector<32x8xf32> -> vector<32x8xf32>
    %c3_237 = arith.constant 3 : index
    %c0_238 = arith.constant 0 : index
    %c0_239 = arith.constant 0 : index
    %379 = vector.load %arg17[%c3_237, %c0_238, %c0_239] : memref<4x1x8xf32, #tpu.memory_space<vmem>>, vector<1x1x8xf32>
    %380 = vector.shape_cast %379 : vector<1x1x8xf32> to vector<1x8xf32>
    %381 = vector.broadcast %380 : vector<1x8xf32> to vector<32x8xf32>
    %382 = arith.addf %378, %381 : vector<32x8xf32>
    %383 = arith.truncf %382 : vector<32x8xf32> to vector<32x8xbf16>
    %384 = vector.shape_cast %367 : vector<16x8xbf16> to vector<2x8x8xbf16>
    %385 = vector.shape_cast %375 : vector<32x8xbf16> to vector<2x16x8xbf16>
    "tpu.trace_start"() <{level = 10 : i32, message = "bqd,bkd->bqk"}> : () -> ()
    %cst_240 = arith.constant dense<0.000000e+00> : vector<2x8x16xf32>
    %386 = tpu.matmul %384, %385, %cst_240 {dimension_numbers = #tpu.dot_dimension_numbers<[2], [2], [1], [1], [0, 0, 0, 1, 1, 1], [0], [0]>} : vector<2x8x8xbf16>, vector<2x16x8xbf16>, vector<2x8x16xf32> -> vector<2x8x16xf32>
    "tpu.trace_stop"() : () -> ()
    %cst_241 = arith.constant dense<0xFF800000> : vector<2x8xf32>
    %387 = vector.multi_reduction <maximumf>, %386, %cst_241 [2] : vector<2x8x16xf32> to vector<2x8xf32>
    %388 = vector.shape_cast %387 : vector<2x8xf32> to vector<2x8x1xf32>
    %389 = vector.broadcast %388 : vector<2x8x1xf32> to vector<2x8x16xf32>
    %390 = arith.subf %386, %389 : vector<2x8x16xf32>
    %391 = math.exp %390 : vector<2x8x16xf32>
    %cst_242 = arith.constant dense<0.000000e+00> : vector<2x8xf32>
    %392 = vector.multi_reduction <add>, %391, %cst_242 [2] : vector<2x8x16xf32> to vector<2x8xf32>
    %393 = vector.shape_cast %392 : vector<2x8xf32> to vector<2x8x1xf32>
    %394 = tpu.reciprocal %393 {approx = true} : vector<2x8x1xf32> -> vector<2x8x1xf32>
    %395 = vector.broadcast %394 : vector<2x8x1xf32> to vector<2x8x16xf32>
    %396 = arith.mulf %391, %395 : vector<2x8x16xf32>
    %397 = arith.truncf %396 : vector<2x8x16xf32> to vector<2x8x16xbf16>
    %398 = vector.shape_cast %383 : vector<32x8xbf16> to vector<2x16x8xbf16>
    "tpu.trace_start"() <{level = 10 : i32, message = "bqk,bkd->bqd"}> : () -> ()
    %cst_243 = arith.constant dense<0.000000e+00> : vector<2x8x8xf32>
    %399 = tpu.matmul %397, %398, %cst_243 {dimension_numbers = #tpu.dot_dimension_numbers<[2], [1], [1], [2], [0, 0, 0, 1, 1, 2], [0], [0]>} : vector<2x8x16xbf16>, vector<2x16x8xbf16>, vector<2x8x8xf32> -> vector<2x8x8xf32>
    "tpu.trace_stop"() : () -> ()
    %400 = vector.shape_cast %399 : vector<2x8x8xf32> to vector<16x8xf32>
    %401 = arith.truncf %400 : vector<16x8xf32> to vector<16x8xbf16>
    %c3_244 = arith.constant 3 : index
    %c0_245 = arith.constant 0 : index
    %c0_246 = arith.constant 0 : index
    %402 = vector.load %arg18[%c3_244, %c0_245, %c0_246] : memref<4x8x32xbf16, #tpu.memory_space<vmem>>, vector<1x8x32xbf16>
    %403 = vector.shape_cast %402 : vector<1x8x32xbf16> to vector<8x32xbf16>
    %cst_247 = arith.constant dense<0.000000e+00> : vector<16x32xf32>
    %404 = tpu.matmul %401, %403, %cst_247 {dimension_numbers = #tpu.dot_dimension_numbers<[1], [0], [0], [1], [0, 0, 1, 1], [], []>} : vector<16x8xbf16>, vector<8x32xbf16>, vector<16x32xf32> -> vector<16x32xf32>
    %405 = arith.addf %359, %404 : vector<16x32xf32>
    %c0_248 = arith.constant 0 : index
    %c0_249 = arith.constant 0 : index
    %406 = vector.load %arg19[%c0_248, %c0_249] : memref<1x32xf32, #tpu.memory_space<vmem>>, vector<1x32xf32>
    %407 = vector.broadcast %406 : vector<1x32xf32> to vector<16x32xf32>
    %408 = arith.addf %405, %407 : vector<16x32xf32>
    %cst_250 = arith.constant dense<0.000000e+00> : vector<16xf32>
    %409 = vector.multi_reduction <add>, %408, %cst_250 [1] : vector<16x32xf32> to vector<16xf32>
    %410 = vector.shape_cast %409 : vector<16xf32> to vector<16x1xf32>
    %cst_251 = arith.constant 3.200000e+01 : f32
    %411 = vector.broadcast %cst_251 : f32 to vector<16x1xf32>
    %412 = arith.divf %410, %411 : vector<16x1xf32>
    %413 = vector.broadcast %412 : vector<16x1xf32> to vector<16x32xf32>
    %414 = arith.subf %408, %413 : vector<16x32xf32>
    %415 = arith.mulf %414, %414 : vector<16x32xf32>
    %cst_252 = arith.constant dense<0.000000e+00> : vector<16xf32>
    %416 = vector.multi_reduction <add>, %415, %cst_252 [1] : vector<16x32xf32> to vector<16xf32>
    %417 = vector.shape_cast %416 : vector<16xf32> to vector<16x1xf32>
    %cst_253 = arith.constant 3.200000e+01 : f32
    %418 = vector.broadcast %cst_253 : f32 to vector<16x1xf32>
    %419 = arith.divf %417, %418 : vector<16x1xf32>
    %420 = vector.broadcast %412 : vector<16x1xf32> to vector<16x32xf32>
    %421 = arith.subf %408, %420 : vector<16x32xf32>
    %cst_254 = arith.constant 9.99999974E-6 : f32
    %422 = vector.broadcast %cst_254 : f32 to vector<16x1xf32>
    %423 = arith.addf %419, %422 : vector<16x1xf32>
    %424 = math.rsqrt %423 : vector<16x1xf32>
    %425 = vector.broadcast %424 : vector<16x1xf32> to vector<16x32xf32>
    %426 = arith.mulf %421, %425 : vector<16x32xf32>
    %c0_255 = arith.constant 0 : index
    %c0_256 = arith.constant 0 : index
    %427 = vector.load %arg26[%c0_255, %c0_256] : memref<1x32xf32, #tpu.memory_space<vmem>>, vector<1x32xf32>
    %428 = vector.broadcast %427 : vector<1x32xf32> to vector<16x32xf32>
    %429 = arith.mulf %426, %428 : vector<16x32xf32>
    %c0_257 = arith.constant 0 : index
    %c0_258 = arith.constant 0 : index
    %430 = vector.load %arg27[%c0_257, %c0_258] : memref<1x32xf32, #tpu.memory_space<vmem>>, vector<1x32xf32>
    %431 = vector.broadcast %430 : vector<1x32xf32> to vector<16x32xf32>
    %432 = arith.addf %429, %431 : vector<16x32xf32>
    %433 = arith.truncf %432 : vector<16x32xf32> to vector<16x32xbf16>
    %c0_259 = arith.constant 0 : index
    %c0_260 = arith.constant 0 : index
    %434 = vector.load %arg20[%c0_259, %c0_260] : memref<32x64xbf16, #tpu.memory_space<vmem>>, vector<32x64xbf16>
    %cst_261 = arith.constant dense<0.000000e+00> : vector<16x64xf32>
    %435 = tpu.matmul %433, %434, %cst_261 {dimension_numbers = #tpu.dot_dimension_numbers<[1], [0], [0], [1], [0, 0, 1, 1], [], []>} : vector<16x32xbf16>, vector<32x64xbf16>, vector<16x64xf32> -> vector<16x64xf32>
    %c0_262 = arith.constant 0 : index
    %c0_263 = arith.constant 0 : index
    %436 = vector.load %arg21[%c0_262, %c0_263] : memref<1x64xf32, #tpu.memory_space<vmem>>, vector<1x64xf32>
    %437 = vector.broadcast %436 : vector<1x64xf32> to vector<16x64xf32>
    %438 = arith.addf %435, %437 : vector<16x64xf32>
    %cst_264 = arith.constant 0.000000e+00 : f32
    %439 = vector.broadcast %cst_264 : f32 to vector<16x64xf32>
    %440 = arith.maximumf %438, %439 : vector<16x64xf32>
    %441 = arith.truncf %440 : vector<16x64xf32> to vector<16x64xbf16>
    %c0_265 = arith.constant 0 : index
    %c0_266 = arith.constant 0 : index
    %442 = vector.load %arg22[%c0_265, %c0_266] : memref<64x32xbf16, #tpu.memory_space<vmem>>, vector<64x32xbf16>
    %cst_267 = arith.constant dense<0.000000e+00> : vector<16x32xf32>
    %443 = tpu.matmul %441, %442, %cst_267 {dimension_numbers = #tpu.dot_dimension_numbers<[1], [0], [0], [1], [0, 0, 1, 1], [], []>} : vector<16x64xbf16>, vector<64x32xbf16>, vector<16x32xf32> -> vector<16x32xf32>
    %c0_268 = arith.constant 0 : index
    %c0_269 = arith.constant 0 : index
    %444 = vector.load %arg23[%c0_268, %c0_269] : memref<1x32xf32, #tpu.memory_space<vmem>>, vector<1x32xf32>
    %445 = vector.broadcast %444 : vector<1x32xf32> to vector<16x32xf32>
    %446 = arith.addf %443, %445 : vector<16x32xf32>
    %447 = arith.addf %432, %446 : vector<16x32xf32>
    %cst_270 = arith.constant dense<0.000000e+00> : vector<16xf32>
    %448 = vector.multi_reduction <add>, %447, %cst_270 [1] : vector<16x32xf32> to vector<16xf32>
    %449 = vector.shape_cast %448 : vector<16xf32> to vector<16x1xf32>
    %cst_271 = arith.constant 3.200000e+01 : f32
    %450 = vector.broadcast %cst_271 : f32 to vector<16x1xf32>
    %451 = arith.divf %449, %450 : vector<16x1xf32>
    %452 = vector.broadcast %451 : vector<16x1xf32> to vector<16x32xf32>
    %453 = arith.subf %447, %452 : vector<16x32xf32>
    %454 = arith.mulf %453, %453 : vector<16x32xf32>
    %cst_272 = arith.constant dense<0.000000e+00> : vector<16xf32>
    %455 = vector.multi_reduction <add>, %454, %cst_272 [1] : vector<16x32xf32> to vector<16xf32>
    %456 = vector.shape_cast %455 : vector<16xf32> to vector<16x1xf32>
    %cst_273 = arith.constant 3.200000e+01 : f32
    %457 = vector.broadcast %cst_273 : f32 to vector<16x1xf32>
    %458 = arith.divf %456, %457 : vector<16x1xf32>
    %459 = vector.broadcast %451 : vector<16x1xf32> to vector<16x32xf32>
    %460 = arith.subf %447, %459 : vector<16x32xf32>
    %cst_274 = arith.constant 9.99999974E-6 : f32
    %461 = vector.broadcast %cst_274 : f32 to vector<16x1xf32>
    %462 = arith.addf %458, %461 : vector<16x1xf32>
    %463 = math.rsqrt %462 : vector<16x1xf32>
    %464 = vector.broadcast %463 : vector<16x1xf32> to vector<16x32xf32>
    %465 = arith.mulf %460, %464 : vector<16x32xf32>
    %c0_275 = arith.constant 0 : index
    %c0_276 = arith.constant 0 : index
    %466 = vector.load %arg28[%c0_275, %c0_276] : memref<1x32xf32, #tpu.memory_space<vmem>>, vector<1x32xf32>
    %467 = vector.broadcast %466 : vector<1x32xf32> to vector<16x32xf32>
    %468 = arith.mulf %465, %467 : vector<16x32xf32>
    %c0_277 = arith.constant 0 : index
    %c0_278 = arith.constant 0 : index
    %469 = vector.load %arg29[%c0_277, %c0_278] : memref<1x32xf32, #tpu.memory_space<vmem>>, vector<1x32xf32>
    %470 = vector.broadcast %469 : vector<1x32xf32> to vector<16x32xf32>
    %471 = arith.addf %468, %470 : vector<16x32xf32>
    %c0_279 = arith.constant 0 : index
    %c0_280 = arith.constant 0 : index
    %472 = vector.load %arg30[%c0_279, %c0_280] : memref<16x32xf32, #tpu.memory_space<vmem>>, vector<16x32xf32>
    tpu.vector_store %arg30[%c0_279, %c0_280], %471 {strides = array<i32>} : memref<16x32xf32, #tpu.memory_space<vmem>>, vector<16x32xf32>,
    return
  }
}

</mosaic_0001>

<bundles_post_ra>
// kernel: _lambda_.1
= control target key start
LH: loop header
LB: loop body
LE: loop exit
PB: predicated region body
PF: predicated region fallthrough
CT: control target
= control target key end

     0   :  { %v5419_v0 = vmov 0.0   ;;  %s5420_s3 = smov 6   ;;  %s5421_s7 = smov 4   ;;  %vm5422_vm0 = vmmov 0   ;;  %vm161_vm1 = vcmask 261120   ;;  %vm347_vm2 = vcmask 64512   ;;  %s6116_s0 = inlined_call_operand.smem [shape: u32[31], index: -1, kind: input, shape index: {}] }
   0x1   :  { %4813 = vmatprep.subr.bf16.mxu1 %v5419_v0  ;;  %s5460_s6 = sld [smem:[%s6116_s0 + %s5420_s3]]   ;;  %4805 = vmatprep.subr.bf16.mxu0 %v5419_v0  ;;  %s5423_s14 = smov 2   ;;  %vm472_vm3 = vcmask 1043456   ;;  %vm2429_vm4 = vcmask 130048   ;;  %vm4188_vm5 = vcmask 523264  }
   0x2   :  { %s5466_s10 = sld [smem:[%s6116_s0 + %s5421_s7]]   ;;  %4817 = vmatprep.mubr.msk.bf16.mxu1 %vm5422_vm0, %v5419_v0  ;;  %4809 = vmatprep.mubr.msk.bf16.mxu0 %vm5422_vm0, %v5419_v0  ;;  %s5424_s18 = smov 8  }
   0x3   :  { %s1_s13 = sld [smem:[%s6116_s0]]   ;;  %s5425_s22 = smov 7  }
   0x4   :  { %s5478_s17 = sld [smem:[%s6116_s0 + %s5423_s14]]   ;;  %s5426_s26 = smov 5  }
   0x5   :  { %s5483_s21 = sld [smem:[%s6116_s0 + %s5424_s18]]   ;;  %s5427_s30 = smov 9  }
   0x6   :  { %s5522_s25 = sld [smem:[%s6116_s0 + %s5425_s22]]   ;;  %s5428_s4 = smov 10  }
   0x7   :  { %v5289_v1 = vld [vmem:[%s5460_s6] sm:$0xff]   ;;  %v5290_v2 = vld [vmem:[%s5460_s6 + $0x8] sm:$0xff]   ;;  %s5527_s29 = sld [smem:[%s6116_s0 + %s5426_s26]]   ;;  %s5430_s12 = smov 14  }
   0x8   :  { %4814 = vmatpush3.bf16.msra.mxu1 %v5289_v1  ;;  %v5291_v3 = vld [vmem:[%s5466_s10] sm:$0xff]   ;;  %v5292_v10 = vld [vmem:[%s5466_s10 + $0x8] sm:$0xff]   ;;  %s5533_s3 = sld [smem:[%s6116_s0 + %s5427_s30]]   ;;  %s5431_s16 = smov 1  }
   0x9   :  { %4815 = vmatprep.subr.bf16.mxu1 %v5419_v0  ;;  %v5489_v4 = vld [vmem:[%s1_s13] sm:$0xff]  ;;  %v5491_v5 = vld [vmem:[%s1_s13 + $0x8] sm:$0xff]  ;;  %4806 = vmatpush3.bf16.msra.mxu0 %v5291_v3  ;;  %s5564_s8 = sld [smem:[%s6116_s0 + %s5428_s4]]   ;;  %s5438_s14 = smov 13  }
   0xa   :  { %v133_v6 = vld [vmem:[%s5478_s17] sm:$0xff]  ;;  %v134_v7 = vld [vmem:[%s5478_s17 + $0x8] sm:$0xff]  ;;  %4807 = vmatprep.subr.bf16.mxu0 %v5419_v0  ;;  %s5778_s15 = sld [smem:[%s6116_s0 + %s5430_s12]]   ;;  %s5442_s1 = smov 20  }
   0xb   :  { %v135_v8 = vadd.f32 %v133_v6, %v5489_v4  ;;  %v136_v9 = vadd.f32 %v134_v7, %v5491_v5  ;;  %v5293_v12 = vld [vmem:[%s5483_s21] sm:$0xff]   ;;  %v5294_v13 = vld [vmem:[%s5483_s21 + $0x8] sm:$0xff]   ;;  %s4285_s20 = sld [smem:[%s6116_s0 + %s5431_s16]]   ;;  %s5443_s5 = smov 22  }
   0xc   :  { %4816 = vmatpush3.bf16.msra.mxu1 %v5290_v2  ;;  %v4319_v14 = vld [vmem:[%s5522_s25] ss:$0 sm:$0xff]  ;;  %s5854_s19 = sld [smem:[%s6116_s0 + %s5438_s14]]   ;;  %s5444_s9 = smov 26  }
   0xd   :  { %v5499_v11 = vpack.c.bf16 %v136_v9, %v135_v8  ;;  %4829 = vmatprep.subr.bf16.mxu1 %v5419_v0  ;;  %4808 = vmatpush3.bf16.msra.mxu0 %v5292_v10  ;;  %v4315_v19 = vld [vmem:[%s5527_s29] ss:$0 sm:$0xff]  ;;  %s4304_s4 = sld [smem:[%s6116_s0 + %s5442_s1]]   ;;  %s5445_s12 = smov 27  }
   0xe   :  { %4821 = vmatprep.subr.bf16.mxu0 %v5419_v0  ;;  %v4323_v31 = vld [vmem:[%s5533_s3] ss:$0 sm:$0xff]  ;;  %s4311_s16 = sld [smem:[%s6116_s0 + %s5445_s12]]   ;;  %s5446_s18 = smov 21  }
   0xf   :  { %4818 = vmatmul.mubr.msk.bf16.vlgmr.msra.gmra.mrb[0].mxu1 %vm161_vm1, %v5499_v11  ;;  %s5447_s22 = smov 23   ;;  %s5448_s26 = smov 28  }
  0x10   :  { %4831 = vmatprep.mubr.msk.bf16.mxu1 %vm5422_vm0, %v5419_v0  ;;  %4810 = vmatmul.mubr.msk.bf16.vlgmr.msra.gmra.mrb[0].mxu0 %vm161_vm1, %v5499_v11 }
  0x11   :  { %4822 = vmatpush3.bf16.msra.mxu0 %v5293_v12  ;;  %4825 = vmatprep.mubr.msk.bf16.mxu0 %vm5422_vm0, %v5419_v0 }
  0x12   :  { %4823 = vmatprep.subr.bf16.mxu0 %v5419_v0 }
  0x15   :  { %4824 = vmatpush3.bf16.msra.mxu0 %v5294_v13  ;;  %v563_v13 = vld [vmem:[%s5564_s8] sm:$0xf] }
  0x16   :  { %4835 = vmatprep.subr.bf16.mxu0 %v5419_v0 }
  0x18   :  { %4826 = vmatmul.mubr.msk.bf16.vlgmr.msra.gmra.mrb[4].mxu0 %vm161_vm1, %v5499_v11 }
  0x19   :  { %4837 = vmatprep.mubr.msk.bf16.mxu0 %vm5422_vm0, %v5419_v0 }
  0xe2   :  { %v264_v15 = vpop.f32.mrb[0].mxu1 }
  0xe3   :  { %v265_v16 = vadd.f32 %v4319_v14, %v264_v15  ;;  %v4819_v17 = vpop.f32.mrb[1].mxu1  ;;  %v199_v20 = vpop.f32.mrb[0].mxu0  ;;  %v5297_v15 = vld [vmem:[%s5466_s10 + $0x10] sm:$0xff]  }
  0xe4   :  { %v267_v18 = vpop.f32.mrb[2].mxu1  ;;  %v4811_v24 = vpop.f32.mrb[1].mxu0  ;;  %v200_v28 = vadd.f32 %v4315_v19, %v199_v20 }
  0xe5   :  { %v4607_v21 = vpack.c.bf16 %v265_v16, %v265_v16  ;;  %v268_v22 = vadd.f32 %v4319_v14, %v267_v18  ;;  %v4820_v23 = vpop.f32.mrb[3].mxu1  ;;  %v202_v25 = vpop.f32.mrb[2].mxu0  ;;  %v568_v14 = vsel %vm472_vm3, %v563_v13, 0  ;;  %v5298_v16 = vld [vmem:[%s5466_s10 + $0x18] sm:$0xff]  }
  0xe6   :  { %v4812_v29 = vpop.f32.mrb[3].mxu0  ;;  %v4605_v32 = vpack.c.bf16 %v200_v28, %v200_v28  ;;  %v203_v33 = vadd.f32 %v4315_v19, %v202_v25  ;;  %v5299_v28 = vld [vmem:[%s5483_s21 + $0x10] sm:$0xff]  }
  0xe7   :  { %v352_v26 = vsel %vm347_vm2, %v4607_v21, 0  ;;  %v4608_v27 = vpack.c.bf16 %v268_v22, %v268_v22  ;;  %v5295_v22 = vld [vmem:[%s5460_s6 + $0x10] sm:$0xff]   ;;  %v5300_v29 = vld [vmem:[%s5483_s21 + $0x18] sm:$0xff]  }
  0xe8   :  { %4830 = vmatpush3.bf16.xpose.msra.mxu1 %v352_v26  ;;  %v4606_v38 = vpack.c.bf16 %v203_v33, %v203_v33 }
  0xe9   :  { %v398_v30 = vsel %vm347_vm2, %v4608_v27, 0  ;;  %4841 = vmatprep.subr.bf16.mxu1 %v5419_v0  ;;  %v5296_v27 = vld [vmem:[%s5460_s6 + $0x18] sm:$0xff]  }
  0xea   :  { %4836 = vmatpush3.bf16.xpose.msra.mxu0 %v398_v30 }
  0xeb   :  { %4847 = vmatprep.subr.bf16.mxu0 %v5419_v0  ;;  %v329_v34 = vpop.f32.mrb[4].mxu0 }
  0xec   :  { %v330_v35 = vadd.f32 %v4323_v31, %v329_v34  ;;  %v4827_v36 = vpop.f32.mrb[5].mxu0 }
  0xed   :  { %v332_v37 = vpop.f32.mrb[6].mxu0 }
  0xee   :  { %v4609_v39 = vpack.c.bf16 %v330_v35, %v330_v35  ;;  %v333_v40 = vadd.f32 %v4323_v31, %v332_v37  ;;  %v4828_v41 = vpop.f32.mrb[7].mxu0 }
  0xef   :  { %4832 = vmatmul.mubr.msk.bf16.vlgmr.msra.gmra.mrb[4].mxu1 %vm347_vm2, %v4605_v32 }
  0xf0   :  { %4843 = vmatprep.mubr.msk.bf16.mxu1 %vm5422_vm0, %v5419_v0  ;;  %v474_v42 = vsel %vm472_vm3, %v4609_v39, 0  ;;  %v4610_v43 = vpack.c.bf16 %v333_v40, %v333_v40 }
  0xf1   :  { %4838 = vmatmul.mubr.msk.bf16.vlgmr.msra.gmra.mrb[8].mxu0 %vm347_vm2, %v4606_v38  ;;  %4842 = vmatpush3.bf16.msra.mxu1 %v474_v42  ;;  %v4352_v38 = vld [vmem:[%s5522_s25 + $0x1] ss:$0 sm:$0xff] }
  0xf2   :  { %4849 = vmatprep.mubr.msk.bf16.mxu0 %vm5422_vm0, %v5419_v0  ;;  %v520_v44 = vsel %vm472_vm3, %v4610_v43, 0  ;;  %4853 = vmatprep.subr.bf16.mxu1 %v5419_v0  ;;  %v4343_v43 = vld [vmem:[%s5527_s29 + $0x1] ss:$0 sm:$0xff] }
  0xf3   :  { %4848 = vmatpush3.bf16.msra.mxu0 %v520_v44 }
  0xf4   :  { %4859 = vmatprep.subr.bf16.mxu0 %v5419_v0 }
 0x1c2   :  { %v388_v45 = vpop.f32.mrb[4].mxu1 }
 0x1c3   :  { %v4833_v46 = vpop.f32.mrb[5].mxu1  ;;  %v440_v47 = vsel %vm347_vm2, %v388_v45, -inf }
 0x1c4   :  { %441 = vmax.xlane.f32.xlu0 %v440_v47  ;;  %v391_v48 = vpop.f32.mrb[6].mxu1  ;;  %v434_v49 = vpop.f32.mrb[8].mxu0 }
 0x1c5   :  { %v4834_v50 = vpop.f32.mrb[7].mxu1  ;;  %v4839_v51 = vpop.f32.mrb[9].mxu0  ;;  %v443_v54 = vsel %vm347_vm2, %v434_v49, -inf }
 0x1c6   :  { %v437_v52 = vpop.f32.mrb[10].mxu0 }
 0x1c7   :  { %v4840_v53 = vpop.f32.mrb[11].mxu0 }
 0x1c8   :  { %444 = vmax.xlane.f32.xlu0 %v443_v54  ;;  %v4361_v54 = vld [vmem:[%s5533_s3 + $0x1] ss:$0 sm:$0xff] }
 0x251   :  { %v442_v55 = vpop.xlane.xlu0 %441 }
 0x252   :  { %v446_v56 = vsub.f32 %v388_v45, %v442_v55 }
 0x254   :  { %v448_v57 = vmul.f32 1.442695, %v446_v56 }
 0x255   :  { %v445_v58 = vpop.xlane.xlu0 %444 }
 0x256   :  { %5343 = vpow2.f32 %v448_v57  ;;  %v447_v59 = vsub.f32 %v434_v49, %v445_v58 }
 0x258   :  { %v450_v60 = vmul.f32 1.442695, %v447_v59 }
 0x25a   :  { %5345 = vpow2.f32 %v450_v60 }
 0x260   :  { %v5344_v61 = vpop.eup %5343 }
 0x261   :  { %v452_v62 = vsel %vm347_vm2, %v5344_v61, 0.0 }
 0x262   :  { %453 = vadd.xlane.f32.xlu1 %v452_v62 }
 0x264   :  { %v5346_v63 = vpop.eup %5345 }
 0x265   :  { %v455_v1 = vsel %vm347_vm2, %v5346_v63, 0.0 }
 0x266   :  { %456 = vadd.xlane.f32.xlu1 %v455_v1 }
 0x2ef   :  { %v454_v2 = vpop.xlane.xlu1 %453 }
 0x2f0   :  { %5347 = vrcp.f32 %v454_v2 }
 0x2f3   :  { %v457_v3 = vpop.xlane.xlu1 %456 }
 0x2f4   :  { %5349 = vrcp.f32 %v457_v3 }
 0x2fa   :  { %v5348_v6 = vpop.eup %5347 }
 0x2fb   :  { %v460_v7 = vmul.f32 %v5348_v6, %v5344_v61 }
 0x2fd   :  { %v462_v8 = vpack.c.bf16 %v460_v7, %v460_v7 }
 0x2fe   :  { %v5350_v9 = vpop.eup %5349 }
 0x2ff   :  { %v461_v10 = vmul.f32 %v5350_v9, %v5346_v63  ;;  %4844 = vmatmul.mubr.msk.bf16.vlgmr.msra.gmra.mrb[8].mxu1 %vm347_vm2, %v462_v8 }
 0x300   :  { %4855 = vmatprep.mubr.msk.bf16.mxu1 %vm5422_vm0, %v5419_v0  ;;  %4854 = vmatpush3.bf16.msra.mxu1 %v568_v14 }
 0x301   :  { %v463_v12 = vpack.c.bf16 %v461_v10, %v461_v10  ;;  %4867 = vmatprep.subr.bf16.mxu1 %v5419_v0 }
 0x303   :  { %4850 = vmatmul.mubr.msk.bf16.vlgmr.msra.gmra.mrb[12].mxu0 %vm347_vm2, %v463_v12 }
 0x304   :  { %4863 = vmatprep.mubr.msk.bf16.mxu0 %vm5422_vm0, %v5419_v0  ;;  %4860 = vmatpush3.bf16.msra.mxu0 %v5297_v15 }
 0x305   :  { %4861 = vmatprep.subr.bf16.mxu0 %v5419_v0 }
 0x308   :  { %4862 = vmatpush3.bf16.msra.mxu0 %v5298_v16 }
 0x309   :  { %4875 = vmatprep.subr.bf16.mxu0 %v5419_v0 }
 0x30b   :  { %4864 = vmatmul.mubr.msk.bf16.vlgmr.msra.gmra.mrb[16].mxu0 %vm161_vm1, %v5499_v11 }
 0x30c   :  { %4879 = vmatprep.mubr.msk.bf16.mxu0 %vm5422_vm0, %v5419_v0  ;;  %4876 = vmatpush3.bf16.msra.mxu0 %v5299_v28  ;;  %v4375_v28 = vld [vmem:[%s5564_s8 + $0x4] sm:$0xf] }
 0x30d   :  { %4877 = vmatprep.subr.bf16.mxu0 %v5419_v0 }
 0x310   :  { %4878 = vmatpush3.bf16.msra.mxu0 %v5300_v29 }
 0x311   :  { %4889 = vmatprep.subr.bf16.mxu0 %v5419_v0 }
 0x313   :  { %4880 = vmatmul.mubr.msk.bf16.vlgmr.msra.gmra.mrb[20].mxu0 %vm161_vm1, %v5499_v11 }
 0x314   :  { %4891 = vmatprep.mubr.msk.bf16.mxu0 %vm5422_vm0, %v5419_v0 }
 0x3d2   :  { %v510_v17 = vpop.f32.mrb[8].mxu1 }
 0x3d3   :  { %v4845_v18 = vpop.f32.mrb[9].mxu1 }
 0x3d4   :  { %v513_v19 = vpop.f32.mrb[10].mxu1 }
 0x3d5   :  { %v4846_v20 = vpop.f32.mrb[11].mxu1 }
 0x3d6   :  { %v556_v21 = vpop.f32.mrb[12].mxu0 }
 0x3d7   :  { %v562_v23 = vpack.c.bf16 %v556_v21, %v510_v17  ;;  %v4851_v24 = vpop.f32.mrb[13].mxu0 }
 0x3d8   :  { %v559_v25 = vpop.f32.mrb[14].mxu0 }
 0x3d9   :  { %v4852_v26 = vpop.f32.mrb[15].mxu0  ;;  %4856 = vmatmul.mubr.msk.bf16.vlgmr.msra.gmra.mrb[12].mxu1 %vm347_vm2, %v562_v23 }
 0x3da   :  { %4868 = vmatpush3.bf16.msra.mxu1 %v5295_v22  ;;  %4871 = vmatprep.mubr.msk.bf16.mxu1 %vm5422_vm0, %v5419_v0 }
 0x3db   :  { %4869 = vmatprep.subr.bf16.mxu1 %v5419_v0 }
 0x3de   :  { %4870 = vmatpush3.bf16.msra.mxu1 %v5296_v27  ;;  %v672_v30 = vpop.f32.mrb[16].mxu0 }
 0x3df   :  { %4883 = vmatprep.subr.bf16.mxu1 %v5419_v0  ;;  %v4865_v31 = vpop.f32.mrb[17].mxu0  ;;  %v673_v49 = vadd.f32 %v4343_v43, %v672_v30 }
 0x3e0   :  { %v675_v32 = vpop.f32.mrb[18].mxu0 }
 0x3e1   :  { %4872 = vmatmul.mubr.msk.bf16.vlgmr.msra.gmra.mrb[16].mxu1 %vm161_vm1, %v5499_v11  ;;  %v4866_v33 = vpop.f32.mrb[19].mxu0  ;;  %v4611_v51 = vpack.c.bf16 %v673_v49, %v673_v49  ;;  %v676_v52 = vadd.f32 %v4343_v43, %v675_v32  ;;  %v5301_v43 = vld [vmem:[%s5460_s6 + $0x20] sm:$0xff]   ;;  %v5302_v49 = vld [vmem:[%s5460_s6 + $0x28] sm:$0xff]  }
 0x3e2   :  { %4885 = vmatprep.mubr.msk.bf16.mxu1 %vm5422_vm0, %v5419_v0  ;;  %v1044_v33 = vsel %vm472_vm3, %v4375_v28, 0 }
 0x3e3   :  { %v4612_v53 = vpack.c.bf16 %v676_v52, %v676_v52 }
 0x3e6   :  { %v806_v55 = vpop.f32.mrb[20].mxu0 }
 0x3e7   :  { %v807_v56 = vadd.f32 %v4361_v54, %v806_v55  ;;  %v4881_v57 = vpop.f32.mrb[21].mxu0 }
 0x3e8   :  { %v809_v58 = vpop.f32.mrb[22].mxu0 }
 0x3e9   :  { %v4615_v59 = vpack.c.bf16 %v807_v56, %v807_v56  ;;  %v810_v60 = vadd.f32 %v4361_v54, %v809_v58  ;;  %v4882_v61 = vpop.f32.mrb[23].mxu0 }
 0x3eb   :  { %v949_v62 = vsel %vm472_vm3, %v4615_v59, 0  ;;  %v4616_v63 = vpack.c.bf16 %v810_v60, %v810_v60 }
 0x3ed   :  { %v995_v1 = vsel %vm472_vm3, %v4616_v63, 0 }
 0x4ac   :  { %v5596_v34 = vpop.f32.mrb[12].mxu1 }
 0x4ad   :  { %v4857_v35 = vpop.f32.mrb[13].mxu1  ;;  %v611_v56 = vadd.f32 %v5596_v34, %v5489_v4 }
 0x4ae   :  { %v5598_v36 = vpop.f32.mrb[14].mxu1 }
 0x4af   :  { %v4858_v37 = vpop.f32.mrb[15].mxu1  ;;  %v612_v58 = vadd.f32 %v5598_v36, %v5491_v5 }
 0x4b0   :  { %v5303_v37 = vld [vmem:[%s5466_s10 + $0x20] sm:$0xff]  }
 0x4b4   :  { %v739_v39 = vpop.f32.mrb[16].mxu1 }
 0x4b5   :  { %v740_v40 = vadd.f32 %v4352_v38, %v739_v39  ;;  %v4873_v41 = vpop.f32.mrb[17].mxu1 }
 0x4b6   :  { %v742_v42 = vpop.f32.mrb[18].mxu1 }
 0x4b7   :  { %v4613_v44 = vpack.c.bf16 %v740_v40, %v740_v40  ;;  %v743_v45 = vadd.f32 %v4352_v38, %v742_v42  ;;  %v4874_v46 = vpop.f32.mrb[19].mxu1  ;;  %v5304_v38 = vld [vmem:[%s5466_s10 + $0x28] sm:$0xff]  }
 0x4b9   :  { %v828_v47 = vsel %vm347_vm2, %v4613_v44, 0  ;;  %v4614_v48 = vpack.c.bf16 %v743_v45, %v743_v45 }
 0x4ba   :  { %4884 = vmatpush3.bf16.xpose.msra.mxu1 %v828_v47 }
 0x4bb   :  { %v874_v50 = vsel %vm347_vm2, %v4614_v48, 0  ;;  %4895 = vmatprep.subr.bf16.mxu1 %v5419_v0 }
 0x4bc   :  { %4890 = vmatpush3.bf16.xpose.msra.mxu0 %v874_v50  ;;  %v5305_v50 = vld [vmem:[%s5483_s21 + $0x20] sm:$0xff]  }
 0x4bd   :  { %4901 = vmatprep.subr.bf16.mxu0 %v5419_v0 }
 0x4c1   :  { %4886 = vmatmul.mubr.msk.bf16.vlgmr.msra.gmra.mrb[20].mxu1 %vm347_vm2, %v4611_v51  ;;  %v5306_v51 = vld [vmem:[%s5483_s21 + $0x28] sm:$0xff]  }
 0x4c2   :  { %4897 = vmatprep.mubr.msk.bf16.mxu1 %vm5422_vm0, %v5419_v0  ;;  %4896 = vmatpush3.bf16.msra.mxu1 %v949_v62 }
 0x4c3   :  { %4892 = vmatmul.mubr.msk.bf16.vlgmr.msra.gmra.mrb[24].mxu0 %vm347_vm2, %v4612_v53  ;;  %4907 = vmatprep.subr.bf16.mxu1 %v5419_v0 }
 0x4c4   :  { %4903 = vmatprep.mubr.msk.bf16.mxu0 %vm5422_vm0, %v5419_v0  ;;  %4902 = vmatpush3.bf16.msra.mxu0 %v995_v1  ;;  %v4391_v1 = vld [vmem:[%s5522_s25 + $0x2] ss:$0 sm:$0xff] }
 0x4c5   :  { %4913 = vmatprep.subr.bf16.mxu0 %v5419_v0 }
 0x594   :  { %v864_v2 = vpop.f32.mrb[20].mxu1 }
 0x595   :  { %v4887_v3 = vpop.f32.mrb[21].mxu1  ;;  %v916_v6 = vsel %vm347_vm2, %v864_v2, -inf }
 0x596   :  { %917 = vmax.xlane.f32.xlu0 %v916_v6  ;;  %v867_v7 = vpop.f32.mrb[22].mxu1  ;;  %v910_v8 = vpop.f32.mrb[24].mxu0 }
 0x597   :  { %v4888_v9 = vpop.f32.mrb[23].mxu1  ;;  %v4893_v10 = vpop.f32.mrb[25].mxu0  ;;  %v919_v12 = vsel %vm347_vm2, %v910_v8, -inf }
 0x598   :  { %920 = vmax.xlane.f32.xlu1 %v919_v12  ;;  %v913_v13 = vpop.f32.mrb[26].mxu0 }
 0x599   :  { %v4894_v14 = vpop.f32.mrb[27].mxu0 }
 0x623   :  { %v918_v15 = vpop.xlane.xlu0 %917 }
 0x624   :  { %v922_v16 = vsub.f32 %v864_v2, %v918_v15 }
 0x625   :  { %v921_v17 = vpop.xlane.xlu1 %920 }
 0x626   :  { %v924_v18 = vmul.f32 1.442695, %v922_v16  ;;  %v923_v19 = vsub.f32 %v910_v8, %v921_v17  ;;  %v4382_v8 = vld [vmem:[%s5527_s29 + $0x2] ss:$0 sm:$0xff] }
 0x627   :  { %v4400_v16 = vld [vmem:[%s5533_s3 + $0x2] ss:$0 sm:$0xff] }
 0x628   :  { %5351 = vpow2.f32 %v924_v18  ;;  %v926_v20 = vmul.f32 1.442695, %v923_v19 }
 0x62a   :  { %5353 = vpow2.f32 %v926_v20 }
 0x632   :  { %v5352_v21 = vpop.eup %5351 }
 0x633   :  { %v928_v22 = vsel %vm347_vm2, %v5352_v21, 0.0 }
 0x634   :  { %v5354_v23 = vpop.eup %5353  ;;  %929 = vadd.xlane.f32.xlu0 %v928_v22 }
 0x635   :  { %v931_v24 = vsel %vm347_vm2, %v5354_v23, 0.0 }
 0x636   :  { %932 = vadd.xlane.f32.xlu1 %v931_v24 }
 0x6c1   :  { %v930_v25 = vpop.xlane.xlu0 %929 }
 0x6c2   :  { %5355 = vrcp.f32 %v930_v25 }
 0x6c3   :  { %v933_v26 = vpop.xlane.xlu1 %932 }
 0x6c4   :  { %5357 = vrcp.f32 %v933_v26 }
 0x6cc   :  { %v5356_v27 = vpop.eup %5355 }
 0x6cd   :  { %v936_v29 = vmul.f32 %v5356_v27, %v5352_v21 }
 0x6ce   :  { %v5358_v30 = vpop.eup %5357 }
 0x6cf   :  { %v937_v31 = vmul.f32 %v5358_v30, %v5354_v23  ;;  %v938_v32 = vpack.c.bf16 %v936_v29, %v936_v29 }
 0x6d1   :  { %4898 = vmatmul.mubr.msk.bf16.vlgmr.msra.gmra.mrb[24].mxu1 %vm347_vm2, %v938_v32  ;;  %v939_v35 = vpack.c.bf16 %v937_v31, %v937_v31 }
 0x6d2   :  { %4908 = vmatpush3.bf16.msra.mxu1 %v1044_v33  ;;  %4909 = vmatprep.mubr.msk.bf16.mxu1 %vm5422_vm0, %v5419_v0 }
 0x6d3   :  { %4904 = vmatmul.mubr.msk.bf16.vlgmr.msra.gmra.mrb[28].mxu0 %vm347_vm2, %v939_v35  ;;  %4921 = vmatprep.subr.bf16.mxu1 %v5419_v0 }
 0x6d4   :  { %4917 = vmatprep.mubr.msk.bf16.mxu0 %vm5422_vm0, %v5419_v0  ;;  %4914 = vmatpush3.bf16.msra.mxu0 %v5303_v37 }
 0x6d5   :  { %4915 = vmatprep.subr.bf16.mxu0 %v5419_v0 }
 0x6d8   :  { %4916 = vmatpush3.bf16.msra.mxu0 %v5304_v38 }
 0x6d9   :  { %4929 = vmatprep.subr.bf16.mxu0 %v5419_v0 }
 0x6db   :  { %4918 = vmatmul.mubr.msk.bf16.vlgmr.msra.gmra.mrb[32].mxu0 %vm161_vm1, %v5499_v11 }
 0x6dc   :  { %4933 = vmatprep.mubr.msk.bf16.mxu0 %vm5422_vm0, %v5419_v0  ;;  %4930 = vmatpush3.bf16.msra.mxu0 %v5305_v50 }
 0x6dd   :  { %4931 = vmatprep.subr.bf16.mxu0 %v5419_v0 }
 0x6e0   :  { %4932 = vmatpush3.bf16.msra.mxu0 %v5306_v51 }
 0x6e1   :  { %4943 = vmatprep.subr.bf16.mxu0 %v5419_v0 }
 0x6e3   :  { %4934 = vmatmul.mubr.msk.bf16.vlgmr.msra.gmra.mrb[36].mxu0 %vm161_vm1, %v5499_v11 }
 0x6e4   :  { %4945 = vmatprep.mubr.msk.bf16.mxu0 %vm5422_vm0, %v5419_v0 }
 0x7a4   :  { %v985_v39 = vpop.f32.mrb[24].mxu1 }
 0x7a5   :  { %v4899_v40 = vpop.f32.mrb[25].mxu1 }
 0x7a6   :  { %v988_v41 = vpop.f32.mrb[26].mxu1  ;;  %v1031_v42 = vpop.f32.mrb[28].mxu0 }
 0x7a7   :  { %v1037_v44 = vpack.c.bf16 %v1031_v42, %v985_v39  ;;  %v4900_v45 = vpop.f32.mrb[27].mxu1  ;;  %v4905_v46 = vpop.f32.mrb[29].mxu0 }
 0x7a8   :  { %v1034_v47 = vpop.f32.mrb[30].mxu0 }
 0x7a9   :  { %v4906_v48 = vpop.f32.mrb[31].mxu0  ;;  %4910 = vmatmul.mubr.msk.bf16.vlgmr.msra.gmra.mrb[28].mxu1 %vm347_vm2, %v1037_v44 }
 0x7aa   :  { %4922 = vmatpush3.bf16.msra.mxu1 %v5301_v43  ;;  %4925 = vmatprep.mubr.msk.bf16.mxu1 %vm5422_vm0, %v5419_v0 }
 0x7ab   :  { %4923 = vmatprep.subr.bf16.mxu1 %v5419_v0 }
 0x7ae   :  { %4924 = vmatpush3.bf16.msra.mxu1 %v5302_v49  ;;  %v1148_v52 = vpop.f32.mrb[32].mxu0 }
 0x7af   :  { %4937 = vmatprep.subr.bf16.mxu1 %v5419_v0  ;;  %v4919_v53 = vpop.f32.mrb[33].mxu0  ;;  %v1149_v36 = vadd.f32 %v4382_v8, %v1148_v52  ;;  %v4414_v52 = vld [vmem:[%s5564_s8 + $0x8] sm:$0xf] }
 0x7b0   :  { %v1151_v54 = vpop.f32.mrb[34].mxu0 }
 0x7b1   :  { %4926 = vmatmul.mubr.msk.bf16.vlgmr.msra.gmra.mrb[32].mxu1 %vm161_vm1, %v5499_v11  ;;  %v4920_v55 = vpop.f32.mrb[35].mxu0  ;;  %v4617_v13 = vpack.c.bf16 %v1149_v36, %v1149_v36  ;;  %v1152_v14 = vadd.f32 %v4382_v8, %v1151_v54  ;;  %v5312_v36 = vld [vmem:[%s5483_s21 + $0x38] sm:$0xff]  }
 0x7b2   :  { %4939 = vmatprep.mubr.msk.bf16.mxu1 %vm5422_vm0, %v5419_v0 }
 0x7b3   :  { %v4618_v15 = vpack.c.bf16 %v1152_v14, %v1152_v14 }
 0x7b6   :  { %v1282_v17 = vpop.f32.mrb[36].mxu0 }
 0x7b7   :  { %v1283_v18 = vadd.f32 %v4400_v16, %v1282_v17  ;;  %v4935_v19 = vpop.f32.mrb[37].mxu0 }
 0x7b8   :  { %v1285_v20 = vpop.f32.mrb[38].mxu0 }
 0x7b9   :  { %v4621_v21 = vpack.c.bf16 %v1283_v18, %v1283_v18  ;;  %v1286_v22 = vadd.f32 %v4400_v16, %v1285_v20  ;;  %v4936_v23 = vpop.f32.mrb[39].mxu0 }
 0x7bb   :  { %v1425_v24 = vsel %vm472_vm3, %v4621_v21, 0  ;;  %v4622_v25 = vpack.c.bf16 %v1286_v22, %v1286_v22  ;;  %v4430_v22 = vld [vmem:[%s5522_s25 + $0x3] ss:$0 sm:$0xff]  ;;  %s5433_s25 = smov 12  }
 0x7bc   :  { %s5791_s28 = sld [smem:[%s6116_s0 + %s5433_s25]]  }
 0x7bd   :  { %v1471_v26 = vsel %vm472_vm3, %v4622_v25, 0  ;;  %s4307_s25 = sld [smem:[%s6116_s0 + %s5447_s22]]  }
 0x87c   :  { %v1080_v57 = vpop.f32.mrb[28].mxu1 }
 0x87d   :  { %v5661_v59 = vadd.f32 %v1080_v57, %v611_v56  ;;  %v4911_v60 = vpop.f32.mrb[29].mxu1  ;;  %v1520_v57 = vsel %vm472_vm3, %v4414_v52, 0 }
 0x87e   :  { %v1083_v61 = vpop.f32.mrb[30].mxu1  ;;  %v5309_v60 = vld [vmem:[%s5466_s10 + $0x30] sm:$0xff]  }
 0x87f   :  { %v5663_v62 = vadd.f32 %v1083_v61, %v612_v58  ;;  %v4912_v63 = vpop.f32.mrb[31].mxu1  ;;  %v5310_v61 = vld [vmem:[%s5466_s10 + $0x38] sm:$0xff]  }
 0x884   :  { %v1215_v2 = vpop.f32.mrb[32].mxu1 }
 0x885   :  { %v1216_v3 = vadd.f32 %v4391_v1, %v1215_v2  ;;  %v4927_v6 = vpop.f32.mrb[33].mxu1 }
 0x886   :  { %v1218_v7 = vpop.f32.mrb[34].mxu1  ;;  %v5307_v6 = vld [vmem:[%s5460_s6 + $0x30] sm:$0xff]  }
 0x887   :  { %v4619_v9 = vpack.c.bf16 %v1216_v3, %v1216_v3  ;;  %v1219_v10 = vadd.f32 %v4391_v1, %v1218_v7  ;;  %v4928_v4 = vpop.f32.mrb[35].mxu1 }
 0x889   :  { %v1304_v34 = vsel %vm347_vm2, %v4619_v9, 0  ;;  %v4620_v5 = vpack.c.bf16 %v1219_v10, %v1219_v10 }
 0x88a   :  { %4938 = vmatpush3.bf16.xpose.msra.mxu1 %v1304_v34  ;;  %v5308_v34 = vld [vmem:[%s5460_s6 + $0x38] sm:$0xff]   ;;  %s5429_s6 = smov 11  }
 0x88b   :  { %v1350_v12 = vsel %vm347_vm2, %v4620_v5, 0  ;;  %4949 = vmatprep.subr.bf16.mxu1 %v5419_v0  ;;  %v5311_v5 = vld [vmem:[%s5483_s21 + $0x30] sm:$0xff]   ;;  %s4295_s11 = sld [smem:[%s6116_s0 + %s5429_s6]]   ;;  %s5432_s21 = smov 3  }
 0x88c   :  { %4944 = vmatpush3.bf16.xpose.msra.mxu0 %v1350_v12  ;;  %s4287_s24 = sld [smem:[%s6116_s0 + %s5432_s21]]  }
 0x88d   :  { %4955 = vmatprep.subr.bf16.mxu0 %v5419_v0  ;;  %s6079_s6 = sld [smem:[%s6116_s0 + %s5443_s5]]  }
 0x88e   :  { %s4305_s21 = sld [smem:[%s6116_s0 + %s5446_s18]]  }
 0x891   :  { %4940 = vmatmul.mubr.msk.bf16.vlgmr.msra.gmra.mrb[36].mxu1 %vm347_vm2, %v4617_v13 }
 0x892   :  { %4951 = vmatprep.mubr.msk.bf16.mxu1 %vm5422_vm0, %v5419_v0  ;;  %4950 = vmatpush3.bf16.msra.mxu1 %v1425_v24 }
 0x893   :  { %4946 = vmatmul.mubr.msk.bf16.vlgmr.msra.gmra.mrb[40].mxu0 %vm347_vm2, %v4618_v15  ;;  %4961 = vmatprep.subr.bf16.mxu1 %v5419_v0 }
 0x894   :  { %4957 = vmatprep.mubr.msk.bf16.mxu0 %vm5422_vm0, %v5419_v0  ;;  %4956 = vmatpush3.bf16.msra.mxu0 %v1471_v26  ;;  %v4421_v26 = vld [vmem:[%s5527_s29 + $0x3] ss:$0 sm:$0xff]  ;;  %s5434_s29 = smov 16  }
 0x895   :  { %4967 = vmatprep.subr.bf16.mxu0 %v5419_v0  ;;  %s5810_s2 = sld [smem:[%s6116_s0 + %s5434_s29]]   ;;  %s5449_s29 = smov 29  }
 0x964   :  { %v1340_v27 = vpop.f32.mrb[36].mxu1 }
 0x965   :  { %v4941_v28 = vpop.f32.mrb[37].mxu1  ;;  %v1392_v29 = vsel %vm347_vm2, %v1340_v27, -inf }
 0x966   :  { %1393 = vmax.xlane.f32.xlu0 %v1392_v29  ;;  %v1343_v30 = vpop.f32.mrb[38].mxu1  ;;  %v1386_v31 = vpop.f32.mrb[40].mxu0 }
 0x967   :  { %v4942_v32 = vpop.f32.mrb[39].mxu1  ;;  %v4947_v33 = vpop.f32.mrb[41].mxu0  ;;  %v1395_v35 = vsel %vm347_vm2, %v1386_v31, -inf }
 0x968   :  { %1396 = vmax.xlane.f32.xlu1 %v1395_v35  ;;  %v1389_v37 = vpop.f32.mrb[42].mxu0 }
 0x969   :  { %v4948_v38 = vpop.f32.mrb[43].mxu0  ;;  %v4439_v37 = vld [vmem:[%s5533_s3 + $0x3] ss:$0 sm:$0xff]  ;;  %s5435_s3 = smov 24  }
 0x96a   :  { %s4308_s7 = sld [smem:[%s6116_s0 + %s5435_s3]]   ;;  %s5450_s3 = smov 30  }
 0x9f3   :  { %v1394_v39 = vpop.xlane.xlu0 %1393 }
 0x9f4   :  { %v1398_v40 = vsub.f32 %v1340_v27, %v1394_v39 }
 0x9f5   :  { %v1397_v41 = vpop.xlane.xlu1 %1396 }
 0x9f6   :  { %v1400_v42 = vmul.f32 1.442695, %v1398_v40  ;;  %v1399_v43 = vsub.f32 %v1386_v31, %v1397_v41 }
 0x9f8   :  { %5359 = vpow2.f32 %v1400_v42  ;;  %v1402_v44 = vmul.f32 1.442695, %v1399_v43 }
 0x9fa   :  { %5361 = vpow2.f32 %v1402_v44 }
 0xa02   :  { %v5360_v45 = vpop.eup %5359 }
 0xa03   :  { %v1404_v46 = vsel %vm347_vm2, %v5360_v45, 0.0 }
 0xa04   :  { %v5362_v47 = vpop.eup %5361  ;;  %1405 = vadd.xlane.f32.xlu0 %v1404_v46 }
 0xa05   :  { %v1407_v48 = vsel %vm347_vm2, %v5362_v47, 0.0 }
 0xa06   :  { %1408 = vadd.xlane.f32.xlu1 %v1407_v48 }
 0xa91   :  { %v1406_v49 = vpop.xlane.xlu0 %1405 }
 0xa92   :  { %5363 = vrcp.f32 %v1406_v49 }
 0xa93   :  { %v1409_v50 = vpop.xlane.xlu1 %1408 }
 0xa94   :  { %5365 = vrcp.f32 %v1409_v50 }
 0xa9c   :  { %v5364_v51 = vpop.eup %5363 }
 0xa9d   :  { %v1412_v53 = vmul.f32 %v5364_v51, %v5360_v45 }
 0xa9e   :  { %v5366_v54 = vpop.eup %5365 }
 0xa9f   :  { %v1413_v55 = vmul.f32 %v5366_v54, %v5362_v47  ;;  %v1414_v56 = vpack.c.bf16 %v1412_v53, %v1412_v53 }
 0xaa1   :  { %4952 = vmatmul.mubr.msk.bf16.vlgmr.msra.gmra.mrb[40].mxu1 %vm347_vm2, %v1414_v56  ;;  %v1415_v58 = vpack.c.bf16 %v1413_v55, %v1413_v55 }
 0xaa2   :  { %4962 = vmatpush3.bf16.msra.mxu1 %v1520_v57  ;;  %4963 = vmatprep.mubr.msk.bf16.mxu1 %vm5422_vm0, %v5419_v0 }
 0xaa3   :  { %4958 = vmatmul.mubr.msk.bf16.vlgmr.msra.gmra.mrb[44].mxu0 %vm347_vm2, %v1415_v58  ;;  %4975 = vmatprep.subr.bf16.mxu1 %v5419_v0 }
 0xaa4   :  { %4971 = vmatprep.mubr.msk.bf16.mxu0 %vm5422_vm0, %v5419_v0  ;;  %4968 = vmatpush3.bf16.msra.mxu0 %v5309_v60 }
 0xaa5   :  { %4969 = vmatprep.subr.bf16.mxu0 %v5419_v0 }
 0xaa8   :  { %4970 = vmatpush3.bf16.msra.mxu0 %v5310_v61 }
 0xaa9   :  { %4983 = vmatprep.subr.bf16.mxu0 %v5419_v0 }
 0xaab   :  { %4972 = vmatmul.mubr.msk.bf16.vlgmr.msra.gmra.mrb[48].mxu0 %vm161_vm1, %v5499_v11 }
 0xaac   :  { %4987 = vmatprep.mubr.msk.bf16.mxu0 %vm5422_vm0, %v5419_v0  ;;  %4984 = vmatpush3.bf16.msra.mxu0 %v5311_v5 }
 0xaad   :  { %4985 = vmatprep.subr.bf16.mxu0 %v5419_v0 }
 0xab0   :  { %4986 = vmatpush3.bf16.msra.mxu0 %v5312_v36 }
 0xab1   :  { %4997 = vmatprep.subr.bf16.mxu0 %v5419_v0 }
 0xab3   :  { %4988 = vmatmul.mubr.msk.bf16.vlgmr.msra.gmra.mrb[52].mxu0 %vm161_vm1, %v5499_v11 }
 0xab4   :  { %4999 = vmatprep.mubr.msk.bf16.mxu0 %vm5422_vm0, %v5419_v0 }
 0xb74   :  { %v1461_v63 = vpop.f32.mrb[40].mxu1 }
 0xb75   :  { %v4953_v1 = vpop.f32.mrb[41].mxu1 }
 0xb76   :  { %v1464_v2 = vpop.f32.mrb[42].mxu1  ;;  %v1507_v3 = vpop.f32.mrb[44].mxu0 }
 0xb77   :  { %v1513_v7 = vpack.c.bf16 %v1507_v3, %v1461_v63  ;;  %v4954_v8 = vpop.f32.mrb[43].mxu1  ;;  %v4959_v9 = vpop.f32.mrb[45].mxu0 }
 0xb78   :  { %v1510_v10 = vpop.f32.mrb[46].mxu0 }
 0xb79   :  { %v4960_v4 = vpop.f32.mrb[47].mxu0  ;;  %4964 = vmatmul.mubr.msk.bf16.vlgmr.msra.gmra.mrb[44].mxu1 %vm347_vm2, %v1513_v7 }
 0xb7a   :  { %4976 = vmatpush3.bf16.msra.mxu1 %v5307_v6  ;;  %4979 = vmatprep.mubr.msk.bf16.mxu1 %vm5422_vm0, %v5419_v0 }
 0xb7b   :  { %4977 = vmatprep.subr.bf16.mxu1 %v5419_v0 }
 0xb7e   :  { %4978 = vmatpush3.bf16.msra.mxu1 %v5308_v34  ;;  %v1624_v12 = vpop.f32.mrb[48].mxu0  ;;  %v4453_v34 = vld [vmem:[%s5564_s8 + $0xc] sm:$0xf]  ;;  %s5436_s8 = smov 25  }
 0xb7f   :  { %4991 = vmatprep.subr.bf16.mxu1 %v5419_v0  ;;  %v4973_v13 = vpop.f32.mrb[49].mxu0  ;;  %v1625_v31 = vadd.f32 %v4421_v26, %v1624_v12  ;;  %s4309_s10 = sld [smem:[%s6116_s0 + %s5436_s8]]  }
 0xb80   :  { %v1627_v14 = vpop.f32.mrb[50].mxu0 }
 0xb81   :  { %4980 = vmatmul.mubr.msk.bf16.vlgmr.msra.gmra.mrb[48].mxu1 %vm161_vm1, %v5499_v11  ;;  %v4974_v15 = vpop.f32.mrb[51].mxu0  ;;  %v1628_v33 = vadd.f32 %v4421_v26, %v1627_v14  ;;  %v1996_v14 = vsel %vm472_vm3, %v4453_v34, 0  ;;  %v4456_v34 = vld [vmem:[%s4308_s7] ss:$0 sm:$0xff]  ;;  %s4314_s7 = sld [smem:[%s6116_s0 + %s5450_s3]]  }
 0xb82   :  { %4993 = vmatprep.mubr.msk.bf16.mxu1 %vm5422_vm0, %v5419_v0 }
 0xb83   :  { %v4624_v35 = vpack.c.bf16 %v1628_v33, %v1628_v33 }
 0xb86   :  { %v1758_v38 = vpop.f32.mrb[52].mxu0 }
 0xb87   :  { %v1759_v39 = vadd.f32 %v4439_v37, %v1758_v38  ;;  %v4989_v40 = vpop.f32.mrb[53].mxu0 }
 0xb88   :  { %v1761_v41 = vpop.f32.mrb[54].mxu0 }
 0xb89   :  { %v4627_v42 = vpack.c.bf16 %v1759_v39, %v1759_v39  ;;  %v1762_v43 = vadd.f32 %v4439_v37, %v1761_v41  ;;  %v4990_v44 = vpop.f32.mrb[55].mxu0 }
 0xb8b   :  { %v1901_v45 = vsel %vm472_vm3, %v4627_v42, 0  ;;  %v4628_v46 = vpack.c.bf16 %v1762_v43, %v1762_v43 }
 0xb8d   :  { %v1947_v47 = vsel %vm472_vm3, %v4628_v46, 0  ;;  %v5314_v46 = vld [vmem:[%s5778_s15 + $0x8] sm:$0xff]  }
 0xc4c   :  { %v1556_v16 = vpop.f32.mrb[44].mxu1 }
 0xc4d   :  { %v5723_v17 = vadd.f32 %v1556_v16, %v5661_v59  ;;  %v4965_v18 = vpop.f32.mrb[45].mxu1 }
 0xc4e   :  { %v1559_v19 = vpop.f32.mrb[46].mxu1 }
 0xc4f   :  { %v5726_v20 = vadd.f32 %v1559_v19, %v5663_v62  ;;  %v4966_v21 = vpop.f32.mrb[47].mxu1  ;;  %v4623_v62 = vpack.c.bf16 %v1625_v31, %v1625_v31 }
 0xc54   :  { %v1691_v11 = vpop.f32.mrb[48].mxu1 }
 0xc55   :  { %v1692_v23 = vadd.f32 %v4430_v22, %v1691_v11  ;;  %v4981_v24 = vpop.f32.mrb[49].mxu1 }
 0xc56   :  { %v1694_v25 = vpop.f32.mrb[50].mxu1 }
 0xc57   :  { %v4625_v27 = vpack.c.bf16 %v1692_v23, %v1692_v23  ;;  %v1695_v28 = vadd.f32 %v4430_v22, %v1694_v25  ;;  %v4982_v29 = vpop.f32.mrb[51].mxu1 }
 0xc59   :  { %v1780_v30 = vsel %vm347_vm2, %v4625_v27, 0  ;;  %v4626_v59 = vpack.c.bf16 %v1695_v28, %v1695_v28  ;;  %v4455_v27 = vld [vmem:[%s4295_s11] ss:$0 sm:$0xff]  ;;  %s4310_s11 = sld [smem:[%s6116_s0 + %s5444_s9]]  }
 0xc5a   :  { %4992 = vmatpush3.bf16.xpose.msra.mxu1 %v1780_v30 }
 0xc5b   :  { %v1826_v32 = vsel %vm347_vm2, %v4626_v59, 0  ;;  %5003 = vmatprep.subr.bf16.mxu1 %v5419_v0 }
 0xc5c   :  { %4998 = vmatpush3.bf16.xpose.msra.mxu0 %v1826_v32 }
 0xc5d   :  { %5009 = vmatprep.subr.bf16.mxu0 %v5419_v0 }
 0xc61   :  { %4994 = vmatmul.mubr.msk.bf16.vlgmr.msra.gmra.mrb[52].mxu1 %vm347_vm2, %v4623_v62 }
 0xc62   :  { %5005 = vmatprep.mubr.msk.bf16.mxu1 %vm5422_vm0, %v5419_v0  ;;  %5004 = vmatpush3.bf16.msra.mxu1 %v1901_v45  ;;  %v5313_v45 = vld [vmem:[%s5778_s15] sm:$0xff]  }
 0xc63   :  { %5000 = vmatmul.mubr.msk.bf16.vlgmr.msra.gmra.mrb[56].mxu0 %vm347_vm2, %v4624_v35  ;;  %5015 = vmatprep.subr.bf16.mxu1 %v5419_v0 }
 0xc64   :  { %5011 = vmatprep.mubr.msk.bf16.mxu0 %vm5422_vm0, %v5419_v0  ;;  %5010 = vmatpush3.bf16.msra.mxu0 %v1947_v47  ;;  %v129_v47 = vld [vmem:[%s4285_s20] sm:$0xff] }
 0xc65   :  { %5021 = vmatprep.subr.bf16.mxu0 %v5419_v0 }
 0xd34   :  { %v1816_v48 = vpop.f32.mrb[52].mxu1 }
 0xd35   :  { %v4995_v49 = vpop.f32.mrb[53].mxu1  ;;  %v1868_v50 = vsel %vm347_vm2, %v1816_v48, -inf }
 0xd36   :  { %1869 = vmax.xlane.f32.xlu0 %v1868_v50  ;;  %v1819_v51 = vpop.f32.mrb[54].mxu1  ;;  %v1862_v52 = vpop.f32.mrb[56].mxu0  ;;  %v2099_v49 = vld [vmem:[%s4287_s24] sm:$0xff]  ;;  %v2100_v50 = vld [vmem:[%s4287_s24 + $0x8] sm:$0xff] }
 0xd37   :  { %v4996_v53 = vpop.f32.mrb[55].mxu1  ;;  %v5001_v54 = vpop.f32.mrb[57].mxu0  ;;  %v1871_v55 = vsel %vm347_vm2, %v1862_v52, -inf  ;;  %v131_v51 = vld [vmem:[%s4285_s20 + $0x10] sm:$0xff] }
 0xd38   :  { %1872 = vmax.xlane.f32.xlu1 %v1871_v55  ;;  %v1865_v56 = vpop.f32.mrb[58].mxu0  ;;  %v132_v54 = vld [vmem:[%s4285_s20 + $0x18] sm:$0xff]  ;;  %v2101_v55 = vld [vmem:[%s4287_s24 + $0x10] sm:$0xff] }
 0xd39   :  { %v5002_v57 = vpop.f32.mrb[59].mxu0  ;;  %v2102_v56 = vld [vmem:[%s4287_s24 + $0x18] sm:$0xff]  ;;  %s5440_s24 = smov 18  }
 0xd3a   :  { %v2105_v57 = vadd.f32 %v2101_v55, %v131_v51  ;;  %s5878_s27 = sld [smem:[%s6116_s0 + %s5440_s24]]  }
 0xdc3   :  { %v1870_v58 = vpop.xlane.xlu0 %1869 }
 0xdc4   :  { %v1874_v60 = vsub.f32 %v1816_v48, %v1870_v58  ;;  %v130_v48 = vld [vmem:[%s4285_s20 + $0x8] sm:$0xff]  ;;  %v2106_v58 = vadd.f32 %v2102_v56, %v132_v54  ;;  %s5439_s20 = smov 17  }
 0xdc5   :  { %v1873_v61 = vpop.xlane.xlu1 %1872  ;;  %v2104_v53 = vadd.f32 %v2100_v50, %v130_v48  ;;  %s5860_s23 = sld [smem:[%s6116_s0 + %s5439_s20]]  }
 0xdc6   :  { %v1876_v63 = vmul.f32 1.442695, %v1874_v60  ;;  %v1875_v1 = vsub.f32 %v1862_v52, %v1873_v61  ;;  %v2103_v52 = vadd.f32 %v2099_v49, %v129_v47  ;;  %v5796_v61 = vpack.c.bf16 %v2106_v58, %v2105_v57 }
 0xdc8   :  { %5367 = vpow2.f32 %v1876_v63  ;;  %v1878_v2 = vmul.f32 1.442695, %v1875_v1  ;;  %v5793_v60 = vpack.c.bf16 %v2104_v53, %v2103_v52  ;;  %v5315_v63 = vld [vmem:[%s5791_s28] sm:$0xff]   ;;  %v5316_v1 = vld [vmem:[%s5791_s28 + $0x8] sm:$0xff]  }
 0xdca   :  { %5369 = vpow2.f32 %v1878_v2  ;;  %v5317_v2 = vld [vmem:[%s5810_s2] sm:$0xff]  }
 0xdd2   :  { %v5368_v3 = vpop.eup %5367 }
 0xdd3   :  { %v1880_v6 = vsel %vm347_vm2, %v5368_v3, 0.0 }
 0xdd4   :  { %v5370_v7 = vpop.eup %5369  ;;  %1881 = vadd.xlane.f32.xlu0 %v1880_v6 }
 0xdd5   :  { %v1883_v8 = vsel %vm347_vm2, %v5370_v7, 0.0 }
 0xdd6   :  { %1884 = vadd.xlane.f32.xlu1 %v1883_v8 }
 0xe61   :  { %v1882_v9 = vpop.xlane.xlu0 %1881 }
 0xe62   :  { %5371 = vrcp.f32 %v1882_v9 }
 0xe63   :  { %v1885_v10 = vpop.xlane.xlu1 %1884 }
 0xe64   :  { %5373 = vrcp.f32 %v1885_v10 }
 0xe6c   :  { %v5372_v4 = vpop.eup %5371 }
 0xe6d   :  { %v1888_v5 = vmul.f32 %v5372_v4, %v5368_v3 }
 0xe6e   :  { %v5374_v36 = vpop.eup %5373 }
 0xe6f   :  { %v1889_v12 = vmul.f32 %v5374_v36, %v5370_v7  ;;  %v1890_v13 = vpack.c.bf16 %v1888_v5, %v1888_v5 }
 0xe71   :  { %5006 = vmatmul.mubr.msk.bf16.vlgmr.msra.gmra.mrb[56].mxu1 %vm347_vm2, %v1890_v13  ;;  %v1891_v15 = vpack.c.bf16 %v1889_v12, %v1889_v12  ;;  %v4457_v12 = vld [vmem:[%s4309_s10] ss:$0 sm:$0xff] }
 0xe72   :  { %5016 = vmatpush3.bf16.msra.mxu1 %v1996_v14  ;;  %5017 = vmatprep.mubr.msk.bf16.mxu1 %vm5422_vm0, %v5419_v0 }
 0xe73   :  { %5012 = vmatmul.mubr.msk.bf16.vlgmr.msra.gmra.mrb[60].mxu0 %vm347_vm2, %v1891_v15  ;;  %5029 = vmatprep.subr.bf16.mxu1 %v5313_v45 }
 0xe74   :  { %5025 = vmatprep.mubr.msk.bf16.mxu0 %vm5422_vm0, %v5419_v0  ;;  %5022 = vmatpush3.bf16.msra.mxu0 %v5315_v63 }
 0xe75   :  { %5023 = vmatprep.subr.bf16.mxu0 %v5419_v0 }
 0xe78   :  { %5024 = vmatpush3.bf16.msra.mxu0 %v5316_v1 }
 0xe79   :  { %5037 = vmatprep.subr.bf16.mxu0 %v5317_v2 }
 0xf44   :  { %v1937_v16 = vpop.f32.mrb[56].mxu1 }
 0xf45   :  { %v5007_v18 = vpop.f32.mrb[57].mxu1 }
 0xf46   :  { %v1940_v19 = vpop.f32.mrb[58].mxu1  ;;  %v1983_v21 = vpop.f32.mrb[60].mxu0  ;;  %v2095_v18 = vld [vmem:[%s5478_s17] sm:$0xff] }
 0xf47   :  { %v1989_v22 = vpack.c.bf16 %v1983_v21, %v1937_v16  ;;  %v5008_v11 = vpop.f32.mrb[59].mxu1  ;;  %v5013_v23 = vpop.f32.mrb[61].mxu0  ;;  %v2096_v19 = vld [vmem:[%s5478_s17 + $0x8] sm:$0xff]  ;;  %s5437_s17 = smov 15  }
 0xf48   :  { %v1986_v24 = vpop.f32.mrb[62].mxu0  ;;  %s5844_s13 = sld [smem:[%s6116_s0 + %s5437_s17]]  }
 0xf49   :  { %v5014_v25 = vpop.f32.mrb[63].mxu0  ;;  %5018 = vmatmul.mubr.msk.bf16.vlgmr.msra.gmra.mrb[60].mxu1 %vm347_vm2, %v1989_v22  ;;  %v5318_v24 = vld [vmem:[%s5810_s2 + $0x8] sm:$0xff]  }
 0xf4a   :  { %5030 = vmatpush3.bf16.msra.mxu1 %v5313_v45  ;;  %5033 = vmatprep.mubr.msk.bf16.mxu1 %vm161_vm1, %v5793_v60  ;;  %v4467_v45 = vld [vmem:[%s5860_s23] ss:$0 sm:$0xff] }
 0xf4b   :  { %5031 = vmatprep.subr.bf16.mxu1 %v5314_v46 }
 0xf4e   :  { %5032 = vmatpush3.bf16.msra.mxu1 %v5314_v46  ;;  %v4462_v25 = vld [vmem:[%s5844_s13] ss:$0 sm:$0xff] }
 0xf4f   :  { %5045 = vmatprep.subr.bf16.mxu1 %v5419_v0 }
 0xf51   :  { %5034 = vmatmul.mubr.msk.bf16.vlgmr.msra.gmra.mrb[64].mxu1 %vm161_vm1, %v5796_v61 }
 0xf52   :  { %5047 = vmatprep.mubr.msk.bf16.mxu1 %vm5422_vm0, %v5419_v0 }
0x101c   :  { %v2032_v26 = vpop.f32.mrb[60].mxu1 }
0x101d   :  { %v2039_v28 = vadd.f32 %v2032_v26, %v5723_v17  ;;  %v5019_v29 = vpop.f32.mrb[61].mxu1 }
0x101e   :  { %v2035_v30 = vpop.f32.mrb[62].mxu1 }
0x101f   :  { %v2040_v59 = vadd.f32 %v2035_v30, %v5726_v20  ;;  %v5020_v31 = vpop.f32.mrb[63].mxu1  ;;  %v2048_v32 = vadd.f32 %v4455_v27, %v2039_v28 }
0x1021   :  { %v2050_v62 = vsel %vm161_vm1, %v2048_v32, 0.0  ;;  %v2049_v33 = vadd.f32 %v4455_v27, %v2040_v59 }
0x1022   :  { %2051 = vadd.xlane.f32.xlu0 %v2050_v62 }
0x1023   :  { %v2053_v35 = vsel %vm161_vm1, %v2049_v33, 0.0 }
0x1024   :  { %2054 = vadd.xlane.f32.xlu1 %v2053_v35  ;;  %v5035_v26 = vpop.f32.mrb[64].mxu1 }
0x1025   :  { %v2250_v27 = vadd.f32 %v5035_v26, %v4462_v25  ;;  %v2241_v28 = vpop.f32.mrb[65].mxu1 }
0x1026   :  { %v2242_v29 = vadd.f32 %v4462_v25, %v2241_v28  ;;  %v5036_v30 = vpop.f32.mrb[66].mxu1 }
0x1027   :  { %v2253_v59 = vadd.f32 %v5036_v30, %v4462_v25  ;;  %v2244_v31 = vpop.f32.mrb[67].mxu1 }
0x1029   :  { %v2257_v62 = vpack.c.bf16 %v2253_v59, %v2250_v27  ;;  %v5320_v59 = vld [vmem:[%s5791_s28 + $0x18] sm:$0xff]  }
0x102b   :  { %v2387_v35 = vsel %vm347_vm2, %v2257_v62, 0 }
0x10af   :  { %v2052_v37 = vpop.xlane.xlu0 %2051 }
0x10b0   :  { %v2057_v38 = vmul.f32 0.03125, %v2052_v37 }
0x10b1   :  { %v2055_v39 = vpop.xlane.xlu1 %2054 }
0x10b2   :  { %v5765_v40 = vsub.f32 %v2048_v32, %v2057_v38  ;;  %v2058_v41 = vmul.f32 0.03125, %v2055_v39  ;;  %v2245_v32 = vadd.f32 %v4462_v25, %v2244_v31  ;;  %v4458_v38 = vld [vmem:[%s5854_s19] ss:$0 sm:$0xff]  ;;  %v5321_v31 = vld [vmem:[%s5778_s15 + $0x10] sm:$0xff]  }
0x10b4   :  { %v5767_v17 = vsub.f32 %v2049_v33, %v2058_v41  ;;  %v2061_v20 = vmul.f32 %v5765_v40, %v5765_v40  ;;  %v2256_v33 = vpack.c.bf16 %v2245_v32, %v2242_v29  ;;  %v5319_v29 = vld [vmem:[%s5791_s28 + $0x10] sm:$0xff]  }
0x10b6   :  { %v2063_v42 = vsel %vm161_vm1, %v2061_v20, 0.0  ;;  %v2062_v43 = vmul.f32 %v5767_v17, %v5767_v17  ;;  %v2341_v37 = vsel %vm347_vm2, %v2256_v33, 0 }
0x10b7   :  { %2064 = vadd.xlane.f32.xlu0 %v2063_v42  ;;  %5046 = vmatpush3.bf16.xpose.msra.mxu1 %v2341_v37 }
0x10b8   :  { %v2066_v44 = vsel %vm161_vm1, %v2062_v43, 0.0  ;;  %5057 = vmatprep.subr.bf16.mxu1 %v5419_v0 }
0x10b9   :  { %2067 = vadd.xlane.f32.xlu1 %v2066_v44 }
0x1144   :  { %v2065_v3 = vpop.xlane.xlu0 %2064 }
0x1145   :  { %v2069_v6 = vmul.f32 0.03125, %v2065_v3 }
0x1146   :  { %v2068_v7 = vpop.xlane.xlu1 %2067 }
0x1147   :  { %v2071_v8 = vadd.f32 1e-05, %v2069_v6  ;;  %v2070_v9 = vmul.f32 0.03125, %v2068_v7 }
0x1149   :  { %5375 = vrsqrt.f32 %v2071_v8  ;;  %v2072_v10 = vadd.f32 1e-05, %v2070_v9 }
0x114b   :  { %5377 = vrsqrt.f32 %v2072_v10 }
0x1153   :  { %v5376_v4 = vpop.eup %5375 }
0x1154   :  { %v2075_v5 = vmul.f32 %v5376_v4, %v5765_v40 }
0x1155   :  { %v5378_v36 = vpop.eup %5377 }
0x1156   :  { %v2084_v13 = vmul.f32 %v4456_v34, %v2075_v5  ;;  %v2076_v14 = vmul.f32 %v5378_v36, %v5767_v17 }
0x1158   :  { %v2085_v15 = vmul.f32 %v4456_v34, %v2076_v14  ;;  %v5821_v16 = vadd.f32 %v4457_v12, %v2084_v13 }
0x115a   :  { %v5825_v21 = vadd.f32 %v4457_v12, %v2085_v15  ;;  %v2097_v22 = vadd.f32 %v2095_v18, %v5821_v16 }
0x115c   :  { %v2098_v11 = vadd.f32 %v2096_v19, %v5825_v21 }
0x115e   :  { %v5829_v23 = vpack.c.bf16 %v2098_v11, %v2097_v22  ;;  %v2541_v11 = vld [vmem:[%s5878_s27] sm:$0xf] }
0x115f   :  { %v2546_v28 = vsel %vm472_vm3, %v2541_v11, 0 }
0x1160   :  { %5026 = vmatmul.mubr.msk.bf16.vlgmr.msra.gmra.mrb[64].mxu0 %vm161_vm1, %v5829_v23 }
0x1161   :  { %5038 = vmatpush3.bf16.msra.mxu0 %v5317_v2  ;;  %5041 = vmatprep.mubr.msk.bf16.mxu0 %vm161_vm1, %v5793_v60 }
0x1162   :  { %5039 = vmatprep.subr.bf16.mxu0 %v5318_v24 }
0x1165   :  { %5040 = vmatpush3.bf16.msra.mxu0 %v5318_v24 }
0x1166   :  { %5051 = vmatprep.subr.bf16.mxu0 %v5419_v0 }
0x1168   :  { %5042 = vmatmul.mubr.msk.bf16.vlgmr.msra.gmra.mrb[68].mxu0 %vm161_vm1, %v5796_v61 }
0x1169   :  { %5053 = vmatprep.mubr.msk.bf16.mxu0 %vm5422_vm0, %v5419_v0 }
0x116e   :  { %5052 = vmatpush3.bf16.xpose.msra.mxu0 %v2387_v35 }
0x116f   :  { %5063 = vmatprep.subr.bf16.mxu0 %v5419_v0 }
0x1233   :  { %v2170_v39 = vpop.f32.mrb[64].mxu0 }
0x1234   :  { %v2171_v40 = vadd.f32 %v4458_v38, %v2170_v39  ;;  %v5027_v41 = vpop.f32.mrb[65].mxu0 }
0x1235   :  { %v2173_v17 = vpop.f32.mrb[66].mxu0 }
0x1236   :  { %v4629_v20 = vpack.c.bf16 %v2171_v40, %v2171_v40  ;;  %v2174_v42 = vadd.f32 %v4458_v38, %v2173_v17  ;;  %v5028_v43 = vpop.f32.mrb[67].mxu0  ;;  %v5322_v40 = vld [vmem:[%s5778_s15 + $0x18] sm:$0xff]  }
0x1238   :  { %v4630_v44 = vpack.c.bf16 %v2174_v42, %v2174_v42  ;;  %5048 = vmatmul.mubr.msk.bf16.vlgmr.msra.gmra.mrb[68].mxu1 %vm347_vm2, %v4629_v20 }
0x1239   :  { %5059 = vmatprep.mubr.msk.bf16.mxu1 %vm5422_vm0, %v5419_v0 }
0x123a   :  { %5054 = vmatmul.mubr.msk.bf16.vlgmr.msra.gmra.mrb[72].mxu0 %vm347_vm2, %v4630_v44 }
0x123b   :  { %v5043_v46 = vpop.f32.mrb[68].mxu0  ;;  %5065 = vmatprep.mubr.msk.bf16.mxu0 %vm5422_vm0, %v5419_v0 }
0x123c   :  { %v2324_v47 = vadd.f32 %v5043_v46, %v4467_v45  ;;  %v2315_v48 = vpop.f32.mrb[69].mxu0  ;;  %v5324_v46 = vld [vmem:[%s5810_s2 + $0x18] sm:$0xff]  }
0x123d   :  { %v2316_v49 = vadd.f32 %v4467_v45, %v2315_v48  ;;  %v5044_v50 = vpop.f32.mrb[70].mxu0 }
0x123e   :  { %v2327_v51 = vadd.f32 %v5044_v50, %v4467_v45  ;;  %v2318_v52 = vpop.f32.mrb[71].mxu0 }
0x123f   :  { %v2319_v53 = vadd.f32 %v4467_v45, %v2318_v52  ;;  %v5323_v45 = vld [vmem:[%s5810_s2 + $0x10] sm:$0xff]   ;;  %v4493_v52 = vld [vmem:[%s5844_s13 + $0x1] ss:$0 sm:$0xff] }
0x1240   :  { %v2331_v54 = vpack.c.bf16 %v2327_v51, %v2324_v47 }
0x1241   :  { %v2330_v55 = vpack.c.bf16 %v2319_v53, %v2316_v49 }
0x1242   :  { %5064 = vmatpush3.bf16.msra.mxu0 %v2331_v54 }
0x1243   :  { %5058 = vmatpush3.bf16.msra.mxu1 %v2330_v55  ;;  %5075 = vmatprep.subr.bf16.mxu0 %v5419_v0 }
0x1244   :  { %5069 = vmatprep.subr.bf16.mxu1 %v5419_v0 }
0x130b   :  { %v2377_v56 = vpop.f32.mrb[68].mxu1 }
0x130c   :  { %v5049_v57 = vpop.f32.mrb[69].mxu1  ;;  %v2430_v58 = vsel %vm2429_vm4, %v2377_v56, -inf }
0x130d   :  { %2431 = vmax.xlane.f32.xlu0 %v2430_v58  ;;  %v2380_v63 = vpop.f32.mrb[70].mxu1  ;;  %v2423_v1 = vpop.f32.mrb[72].mxu0 }
0x130e   :  { %v5050_v2 = vpop.f32.mrb[71].mxu1  ;;  %v5055_v3 = vpop.f32.mrb[73].mxu0  ;;  %v2433_v6 = vsel %vm2429_vm4, %v2423_v1, -inf }
0x130f   :  { %2434 = vmax.xlane.f32.xlu1 %v2433_v6  ;;  %v2426_v7 = vpop.f32.mrb[74].mxu0  ;;  %v4484_v3 = vld [vmem:[%s5854_s19 + $0x1] ss:$0 sm:$0xff] }
0x1310   :  { %v5056_v8 = vpop.f32.mrb[75].mxu0 }
0x139a   :  { %v2432_v9 = vpop.xlane.xlu0 %2431 }
0x139b   :  { %v2436_v10 = vsub.f32 %v2377_v56, %v2432_v9 }
0x139c   :  { %v2435_v4 = vpop.xlane.xlu1 %2434 }
0x139d   :  { %v2438_v34 = vmul.f32 1.442695, %v2436_v10  ;;  %v2437_v5 = vsub.f32 %v2423_v1, %v2435_v4 }
0x139f   :  { %5379 = vpow2.f32 %v2438_v34  ;;  %v2440_v36 = vmul.f32 1.442695, %v2437_v5  ;;  %v4503_v34 = vld [vmem:[%s5860_s23 + $0x1] ss:$0 sm:$0xff] }
0x13a1   :  { %5381 = vpow2.f32 %v2440_v36 }
0x13a9   :  { %v5380_v12 = vpop.eup %5379 }
0x13aa   :  { %v2442_v13 = vsel %vm2429_vm4, %v5380_v12, 0.0 }
0x13ab   :  { %v5382_v14 = vpop.eup %5381  ;;  %2443 = vadd.xlane.f32.xlu0 %v2442_v13 }
0x13ac   :  { %v2445_v15 = vsel %vm2429_vm4, %v5382_v14, 0.0 }
0x13ad   :  { %2446 = vadd.xlane.f32.xlu1 %v2445_v15 }
0x1438   :  { %v2444_v18 = vpop.xlane.xlu0 %2443 }
0x1439   :  { %5383 = vrcp.f32 %v2444_v18 }
0x143a   :  { %v2447_v19 = vpop.xlane.xlu1 %2446 }
0x143b   :  { %5385 = vrcp.f32 %v2447_v19 }
0x1443   :  { %v5384_v22 = vpop.eup %5383 }
0x1444   :  { %v2450_v24 = vmul.f32 %v5384_v22, %v5380_v12 }
0x1445   :  { %v5386_v25 = vpop.eup %5385 }
0x1446   :  { %v2451_v26 = vmul.f32 %v5386_v25, %v5382_v14  ;;  %v2452_v27 = vpack.c.bf16 %v2450_v24, %v2450_v24 }
0x1448   :  { %5060 = vmatmul.mubr.msk.bf16.vlgmr.msra.gmra.mrb[72].mxu1 %vm2429_vm4, %v2452_v27  ;;  %v2453_v30 = vpack.c.bf16 %v2451_v26, %v2451_v26 }
0x1449   :  { %5070 = vmatpush3.bf16.msra.mxu1 %v2546_v28  ;;  %5071 = vmatprep.mubr.msk.bf16.mxu1 %vm5422_vm0, %v5419_v0 }
0x144a   :  { %5066 = vmatmul.mubr.msk.bf16.vlgmr.msra.gmra.mrb[76].mxu0 %vm2429_vm4, %v2453_v30  ;;  %5083 = vmatprep.subr.bf16.mxu1 %v5321_v31 }
0x144b   :  { %5076 = vmatpush3.bf16.msra.mxu0 %v5319_v29  ;;  %5079 = vmatprep.mubr.msk.bf16.mxu0 %vm5422_vm0, %v5419_v0 }
0x144c   :  { %5077 = vmatprep.subr.bf16.mxu0 %v5419_v0 }
0x144f   :  { %5078 = vmatpush3.bf16.msra.mxu0 %v5320_v59 }
0x1450   :  { %5091 = vmatprep.subr.bf16.mxu0 %v5323_v45 }
0x1452   :  { %5080 = vmatmul.mubr.msk.bf16.vlgmr.msra.gmra.mrb[80].mxu0 %vm161_vm1, %v5829_v23 }
0x1453   :  { %5095 = vmatprep.mubr.msk.bf16.mxu0 %vm161_vm1, %v5793_v60  ;;  %5092 = vmatpush3.bf16.msra.mxu0 %v5323_v45 }
0x1454   :  { %5093 = vmatprep.subr.bf16.mxu0 %v5324_v46 }
0x1457   :  { %5094 = vmatpush3.bf16.msra.mxu0 %v5324_v46 }
0x1458   :  { %5105 = vmatprep.subr.bf16.mxu0 %v5419_v0 }
0x145a   :  { %5096 = vmatmul.mubr.msk.bf16.vlgmr.msra.gmra.mrb[84].mxu0 %vm161_vm1, %v5796_v61 }
0x145b   :  { %5107 = vmatprep.mubr.msk.bf16.mxu0 %vm5422_vm0, %v5419_v0 }
0x151b   :  { %v2491_v32 = vpop.f32.mrb[72].mxu1 }
0x151c   :  { %v5061_v62 = vpop.f32.mrb[73].mxu1 }
0x151d   :  { %v2494_v33 = vpop.f32.mrb[74].mxu1  ;;  %v2534_v35 = vpop.f32.mrb[76].mxu0 }
0x151e   :  { %v2540_v37 = vpack.c.bf16 %v2534_v35, %v2491_v32  ;;  %v5062_v38 = vpop.f32.mrb[75].mxu1  ;;  %v5067_v39 = vpop.f32.mrb[77].mxu0 }
0x151f   :  { %v2537_v41 = vpop.f32.mrb[78].mxu0 }
0x1520   :  { %v5068_v17 = vpop.f32.mrb[79].mxu0  ;;  %5072 = vmatmul.mubr.msk.bf16.vlgmr.msra.gmra.mrb[76].mxu1 %vm347_vm2, %v2540_v37 }
0x1521   :  { %5084 = vmatpush3.bf16.msra.mxu1 %v5321_v31  ;;  %5087 = vmatprep.mubr.msk.bf16.mxu1 %vm161_vm1, %v5793_v60 }
0x1522   :  { %5085 = vmatprep.subr.bf16.mxu1 %v5322_v40 }
0x1525   :  { %v2650_v20 = vpop.f32.mrb[80].mxu0  ;;  %5086 = vmatpush3.bf16.msra.mxu1 %v5322_v40 }
0x1526   :  { %v5081_v42 = vpop.f32.mrb[81].mxu0  ;;  %5099 = vmatprep.subr.bf16.mxu1 %v5419_v0  ;;  %v2651_v9 = vadd.f32 %v4484_v3, %v2650_v20 }
0x1527   :  { %v2653_v43 = vpop.f32.mrb[82].mxu0 }
0x1528   :  { %v5082_v44 = vpop.f32.mrb[83].mxu0  ;;  %5088 = vmatmul.mubr.msk.bf16.vlgmr.msra.gmra.mrb[80].mxu1 %vm161_vm1, %v5796_v61  ;;  %v2654_v8 = vadd.f32 %v4484_v3, %v2653_v43  ;;  %v4631_v4 = vpack.c.bf16 %v2651_v9, %v2651_v9 }
0x1529   :  { %5101 = vmatprep.mubr.msk.bf16.mxu1 %vm5422_vm0, %v5419_v0 }
0x152a   :  { %v4632_v10 = vpack.c.bf16 %v2654_v8, %v2654_v8 }
0x152d   :  { %v5097_v5 = vpop.f32.mrb[84].mxu0 }
0x152e   :  { %v2802_v36 = vadd.f32 %v5097_v5, %v4503_v34  ;;  %v2793_v12 = vpop.f32.mrb[85].mxu0 }
0x152f   :  { %v2794_v13 = vadd.f32 %v4503_v34, %v2793_v12  ;;  %v5098_v14 = vpop.f32.mrb[86].mxu0  ;;  %v5330_v12 = vld [vmem:[%s5810_s2 + $0x28] sm:$0xff]  }
0x1530   :  { %v2805_v15 = vadd.f32 %v5098_v14, %v4503_v34  ;;  %v2796_v18 = vpop.f32.mrb[87].mxu0 }
0x1531   :  { %v2797_v19 = vadd.f32 %v4503_v34, %v2796_v18 }
0x1532   :  { %v2809_v22 = vpack.c.bf16 %v2805_v15, %v2802_v36  ;;  %v5329_v36 = vld [vmem:[%s5810_s2 + $0x20] sm:$0xff]  }
0x1533   :  { %v2808_v11 = vpack.c.bf16 %v2797_v19, %v2794_v13 }
0x15f3   :  { %v5912_v47 = vpop.f32.mrb[76].mxu1 }
0x15f4   :  { %v5073_v48 = vpop.f32.mrb[77].mxu1  ;;  %v2589_v13 = vadd.f32 %v5912_v47, %v5821_v16 }
0x15f5   :  { %v5914_v49 = vpop.f32.mrb[78].mxu1 }
0x15f6   :  { %v5074_v50 = vpop.f32.mrb[79].mxu1  ;;  %v2590_v15 = vadd.f32 %v5914_v49, %v5825_v21  ;;  %v4521_v21 = vld [vmem:[%s5854_s19 + $0x2] ss:$0 sm:$0xff] }
0x15f7   :  { %v5325_v50 = vld [vmem:[%s5791_s28 + $0x20] sm:$0xff]  }
0x15fb   :  { %v5089_v51 = vpop.f32.mrb[80].mxu1 }
0x15fc   :  { %v2717_v53 = vpop.f32.mrb[81].mxu1  ;;  %v2726_v55 = vadd.f32 %v5089_v51, %v4493_v52  ;;  %v4514_v51 = vld [vmem:[%s5878_s27 + $0x4] sm:$0xf] }
0x15fd   :  { %v5090_v54 = vpop.f32.mrb[82].mxu1  ;;  %v2718_v58 = vadd.f32 %v4493_v52, %v2717_v53 }
0x15fe   :  { %v2729_v56 = vadd.f32 %v5090_v54, %v4493_v52  ;;  %v2720_v57 = vpop.f32.mrb[83].mxu1  ;;  %v3024_v54 = vsel %vm472_vm3, %v4514_v51, 0 }
0x15ff   :  { %v2721_v63 = vadd.f32 %v4493_v52, %v2720_v57 }
0x1600   :  { %v2733_v1 = vpack.c.bf16 %v2729_v56, %v2726_v55  ;;  %v5326_v55 = vld [vmem:[%s5791_s28 + $0x28] sm:$0xff]   ;;  %v5327_v56 = vld [vmem:[%s5778_s15 + $0x20] sm:$0xff]  }
0x1601   :  { %v2732_v2 = vpack.c.bf16 %v2721_v63, %v2718_v58 }
0x1602   :  { %v2865_v6 = vsel %vm347_vm2, %v2733_v1, 0 }
0x1603   :  { %5106 = vmatpush3.bf16.xpose.msra.mxu0 %v2865_v6  ;;  %v2819_v7 = vsel %vm347_vm2, %v2732_v2, 0  ;;  %v5328_v6 = vld [vmem:[%s5778_s15 + $0x28] sm:$0xff]  }
0x1604   :  { %5100 = vmatpush3.bf16.xpose.msra.mxu1 %v2819_v7  ;;  %5117 = vmatprep.subr.bf16.mxu0 %v5419_v0 }
0x1605   :  { %5111 = vmatprep.subr.bf16.mxu1 %v5419_v0 }
0x160a   :  { %5108 = vmatmul.mubr.msk.bf16.vlgmr.msra.gmra.mrb[88].mxu0 %vm347_vm2, %v4632_v10 }
0x160b   :  { %5102 = vmatmul.mubr.msk.bf16.vlgmr.msra.gmra.mrb[84].mxu1 %vm347_vm2, %v4631_v4  ;;  %5119 = vmatprep.mubr.msk.bf16.mxu0 %vm5422_vm0, %v5419_v0 }
0x160c   :  { %5113 = vmatprep.mubr.msk.bf16.mxu1 %vm5422_vm0, %v5419_v0  ;;  %5118 = vmatpush3.bf16.msra.mxu0 %v2809_v22 }
0x160d   :  { %5112 = vmatpush3.bf16.msra.mxu1 %v2808_v11  ;;  %5129 = vmatprep.subr.bf16.mxu0 %v5419_v0 }
0x160e   :  { %5123 = vmatprep.subr.bf16.mxu1 %v5419_v0 }
0x16dd   :  { %v2901_v24 = vpop.f32.mrb[88].mxu0 }
0x16de   :  { %v2855_v25 = vpop.f32.mrb[84].mxu1  ;;  %v5109_v26 = vpop.f32.mrb[89].mxu0  ;;  %v2910_v27 = vsel %vm2429_vm4, %v2901_v24, -inf }
0x16df   :  { %2911 = vmax.xlane.f32.xlu1 %v2910_v27  ;;  %v5103_v28 = vpop.f32.mrb[85].mxu1  ;;  %v2904_v29 = vpop.f32.mrb[90].mxu0  ;;  %v2907_v30 = vsel %vm2429_vm4, %v2855_v25, -inf  ;;  %v4530_v26 = vld [vmem:[%s5844_s13 + $0x2] ss:$0 sm:$0xff] }
0x16e0   :  { %v5110_v59 = vpop.f32.mrb[91].mxu0  ;;  %2908 = vmax.xlane.f32.xlu0 %v2907_v30  ;;  %v2858_v31 = vpop.f32.mrb[86].mxu1 }
0x16e1   :  { %v5104_v32 = vpop.f32.mrb[87].mxu1 }
0x176c   :  { %v2912_v62 = vpop.xlane.xlu1 %2911 }
0x176d   :  { %v2914_v33 = vsub.f32 %v2901_v24, %v2912_v62  ;;  %v2909_v35 = vpop.xlane.xlu0 %2908 }
0x176e   :  { %v2913_v37 = vsub.f32 %v2855_v25, %v2909_v35 }
0x176f   :  { %v2917_v38 = vmul.f32 1.442695, %v2914_v33 }
0x1770   :  { %v2915_v39 = vmul.f32 1.442695, %v2913_v37 }
0x1771   :  { %5387 = vpow2.f32 %v2917_v38 }
0x1772   :  { %5389 = vpow2.f32 %v2915_v39  ;;  %v4540_v39 = vld [vmem:[%s5860_s23 + $0x2] ss:$0 sm:$0xff] }
0x177b   :  { %v5388_v40 = vpop.eup %5387 }
0x177c   :  { %v5390_v41 = vpop.eup %5389  ;;  %v2922_v17 = vsel %vm2429_vm4, %v5388_v40, 0.0 }
0x177d   :  { %2923 = vadd.xlane.f32.xlu1 %v2922_v17  ;;  %v2919_v20 = vsel %vm2429_vm4, %v5390_v41, 0.0 }
0x177e   :  { %2920 = vadd.xlane.f32.xlu0 %v2919_v20 }
0x180a   :  { %v2924_v42 = vpop.xlane.xlu1 %2923 }
0x180b   :  { %5391 = vrcp.f32 %v2924_v42  ;;  %v2921_v43 = vpop.xlane.xlu0 %2920 }
0x180c   :  { %5393 = vrcp.f32 %v2921_v43 }
0x1815   :  { %v5392_v44 = vpop.eup %5391 }
0x1816   :  { %v5394_v45 = vpop.eup %5393  ;;  %v2928_v46 = vmul.f32 %v5392_v44, %v5388_v40 }
0x1817   :  { %v2927_v48 = vmul.f32 %v5394_v45, %v5390_v41 }
0x1818   :  { %v2930_v52 = vpack.c.bf16 %v2928_v46, %v2928_v46 }
0x1819   :  { %v2929_v53 = vpack.c.bf16 %v2927_v48, %v2927_v48 }
0x181a   :  { %5120 = vmatmul.mubr.msk.bf16.vlgmr.msra.gmra.mrb[92].mxu0 %vm2429_vm4, %v2930_v52 }
0x181b   :  { %5114 = vmatmul.mubr.msk.bf16.vlgmr.msra.gmra.mrb[88].mxu1 %vm2429_vm4, %v2929_v53  ;;  %5130 = vmatpush3.bf16.msra.mxu0 %v5325_v50 }
0x181c   :  { %5131 = vmatprep.subr.bf16.mxu0 %v5419_v0  ;;  %5133 = vmatprep.mubr.msk.bf16.mxu0 %vm5422_vm0, %v5419_v0 }
0x181d   :  { %5124 = vmatpush3.bf16.msra.mxu1 %v3024_v54  ;;  %5125 = vmatprep.mubr.msk.bf16.mxu1 %vm5422_vm0, %v5419_v0 }
0x181e   :  { %5137 = vmatprep.subr.bf16.mxu1 %v5327_v56 }
0x181f   :  { %5132 = vmatpush3.bf16.msra.mxu0 %v5326_v55 }
0x1820   :  { %5145 = vmatprep.subr.bf16.mxu0 %v5329_v36 }
0x1822   :  { %5134 = vmatmul.mubr.msk.bf16.vlgmr.msra.gmra.mrb[96].mxu0 %vm161_vm1, %v5829_v23 }
0x1823   :  { %5149 = vmatprep.mubr.msk.bf16.mxu0 %vm161_vm1, %v5793_v60  ;;  %5146 = vmatpush3.bf16.msra.mxu0 %v5329_v36 }
0x1824   :  { %5147 = vmatprep.subr.bf16.mxu0 %v5330_v12 }
0x1827   :  { %5148 = vmatpush3.bf16.msra.mxu0 %v5330_v12 }
0x1828   :  { %5159 = vmatprep.subr.bf16.mxu0 %v5419_v0 }
0x182a   :  { %5150 = vmatmul.mubr.msk.bf16.vlgmr.msra.gmra.mrb[100].mxu0 %vm161_vm1, %v5796_v61 }
0x182b   :  { %5161 = vmatprep.mubr.msk.bf16.mxu0 %vm5422_vm0, %v5419_v0 }
0x18ed   :  { %v3011_v57 = vpop.f32.mrb[92].mxu0 }
0x18ee   :  { %v2968_v58 = vpop.f32.mrb[88].mxu1  ;;  %v5121_v63 = vpop.f32.mrb[93].mxu0 }
0x18ef   :  { %v3017_v1 = vpack.c.bf16 %v3011_v57, %v2968_v58  ;;  %v5115_v2 = vpop.f32.mrb[89].mxu1  ;;  %v3014_v3 = vpop.f32.mrb[94].mxu0 }
0x18f0   :  { %v2971_v7 = vpop.f32.mrb[90].mxu1  ;;  %v5122_v8 = vpop.f32.mrb[95].mxu0 }
0x18f1   :  { %v5116_v9 = vpop.f32.mrb[91].mxu1  ;;  %5126 = vmatmul.mubr.msk.bf16.vlgmr.msra.gmra.mrb[92].mxu1 %vm347_vm2, %v3017_v1 }
0x18f2   :  { %5138 = vmatpush3.bf16.msra.mxu1 %v5327_v56  ;;  %5141 = vmatprep.mubr.msk.bf16.mxu1 %vm161_vm1, %v5793_v60 }
0x18f3   :  { %5139 = vmatprep.subr.bf16.mxu1 %v5328_v6 }
0x18f5   :  { %v3128_v10 = vpop.f32.mrb[96].mxu0 }
0x18f6   :  { %v5135_v4 = vpop.f32.mrb[97].mxu0  ;;  %5140 = vmatpush3.bf16.msra.mxu1 %v5328_v6  ;;  %v3129_v35 = vadd.f32 %v4521_v21, %v3128_v10 }
0x18f7   :  { %v3131_v34 = vpop.f32.mrb[98].mxu0  ;;  %5153 = vmatprep.subr.bf16.mxu1 %v5419_v0 }
0x18f8   :  { %v5136_v5 = vpop.f32.mrb[99].mxu0  ;;  %v3132_v33 = vadd.f32 %v4521_v21, %v3131_v34  ;;  %v4633_v38 = vpack.c.bf16 %v3129_v35, %v3129_v35 }
0x18f9   :  { %5142 = vmatmul.mubr.msk.bf16.vlgmr.msra.gmra.mrb[96].mxu1 %vm161_vm1, %v5796_v61 }
0x18fa   :  { %5155 = vmatprep.mubr.msk.bf16.mxu1 %vm5422_vm0, %v5419_v0  ;;  %v4634_v37 = vpack.c.bf16 %v3132_v33, %v3132_v33 }
0x18fd   :  { %v5151_v40 = vpop.f32.mrb[100].mxu0 }
0x18fe   :  { %v3280_v41 = vadd.f32 %v5151_v40, %v4540_v39  ;;  %v3271_v17 = vpop.f32.mrb[101].mxu0 }
0x18ff   :  { %v3272_v20 = vadd.f32 %v4540_v39, %v3271_v17  ;;  %v5152_v42 = vpop.f32.mrb[102].mxu0 }
0x1900   :  { %v3283_v43 = vadd.f32 %v5152_v42, %v4540_v39  ;;  %v3274_v44 = vpop.f32.mrb[103].mxu0 }
0x1901   :  { %v3275_v45 = vadd.f32 %v4540_v39, %v3274_v44  ;;  %v5336_v39 = vld [vmem:[%s5810_s2 + $0x38] sm:$0xff]   ;;  %v4567_v44 = vld [vmem:[%s5844_s13 + $0x3] ss:$0 sm:$0xff] }
0x1902   :  { %v3287_v46 = vpack.c.bf16 %v3283_v43, %v3280_v41 }
0x1903   :  { %v3286_v48 = vpack.c.bf16 %v3275_v45, %v3272_v20 }
0x19c4   :  { %v3060_v14 = vpop.f32.mrb[92].mxu1 }
0x19c5   :  { %v5971_v18 = vadd.f32 %v3060_v14, %v2589_v13  ;;  %v5127_v19 = vpop.f32.mrb[93].mxu1 }
0x19c6   :  { %v3063_v22 = vpop.f32.mrb[94].mxu1  ;;  %v5331_v19 = vld [vmem:[%s5791_s28 + $0x30] sm:$0xff]  }
0x19c7   :  { %v5973_v11 = vadd.f32 %v3063_v22, %v2590_v15  ;;  %v5128_v24 = vpop.f32.mrb[95].mxu1  ;;  %v4551_v22 = vld [vmem:[%s5878_s27 + $0x8] sm:$0xf] }
0x19cc   :  { %v5143_v25 = vpop.f32.mrb[96].mxu1 }
0x19cd   :  { %v3195_v27 = vpop.f32.mrb[97].mxu1  ;;  %v3204_v29 = vadd.f32 %v5143_v25, %v4530_v26 }
0x19ce   :  { %v5144_v28 = vpop.f32.mrb[98].mxu1  ;;  %v3196_v16 = vadd.f32 %v4530_v26, %v3195_v27  ;;  %v5332_v27 = vld [vmem:[%s5791_s28 + $0x38] sm:$0xff]   ;;  %s4312_s28 = sld [smem:[%s6116_s0 + %s5448_s26]]  }
0x19cf   :  { %v3207_v30 = vadd.f32 %v5144_v28, %v4530_v26  ;;  %v3198_v59 = vpop.f32.mrb[99].mxu1  ;;  %v5333_v28 = vld [vmem:[%s5778_s15 + $0x30] sm:$0xff]  }
0x19d0   :  { %v3199_v47 = vadd.f32 %v4530_v26, %v3198_v59  ;;  %v3502_v26 = vsel %vm472_vm3, %v4551_v22, 0 }
0x19d1   :  { %v3211_v31 = vpack.c.bf16 %v3207_v30, %v3204_v29 }
0x19d2   :  { %v3210_v32 = vpack.c.bf16 %v3199_v47, %v3196_v16 }
0x19d3   :  { %v3343_v49 = vsel %vm347_vm2, %v3211_v31, 0 }
0x19d4   :  { %5160 = vmatpush3.bf16.xpose.msra.mxu0 %v3343_v49  ;;  %v3297_v62 = vsel %vm347_vm2, %v3210_v32, 0  ;;  %v5334_v32 = vld [vmem:[%s5778_s15 + $0x38] sm:$0xff]   ;;  %s5441_s15 = smov 19  }
0x19d5   :  { %5154 = vmatpush3.bf16.xpose.msra.mxu1 %v3297_v62  ;;  %5171 = vmatprep.subr.bf16.mxu0 %v5419_v0  ;;  %s4303_s30 = sld [smem:[%s6116_s0 + %s5441_s15]]  }
0x19d6   :  { %5165 = vmatprep.subr.bf16.mxu1 %v5419_v0 }
0x19db   :  { %5162 = vmatmul.mubr.msk.bf16.vlgmr.msra.gmra.mrb[104].mxu0 %vm347_vm2, %v4634_v37 }
0x19dc   :  { %5156 = vmatmul.mubr.msk.bf16.vlgmr.msra.gmra.mrb[100].mxu1 %vm347_vm2, %v4633_v38  ;;  %5173 = vmatprep.mubr.msk.bf16.mxu0 %vm5422_vm0, %v5419_v0  ;;  %v5335_v38 = vld [vmem:[%s5810_s2 + $0x30] sm:$0xff]   ;;  %s4313_s2 = sld [smem:[%s6116_s0 + %s5449_s29]]  }
0x19dd   :  { %5167 = vmatprep.mubr.msk.bf16.mxu1 %vm5422_vm0, %v5419_v0  ;;  %5172 = vmatpush3.bf16.msra.mxu0 %v3287_v46 }
0x19de   :  { %5166 = vmatpush3.bf16.msra.mxu1 %v3286_v48  ;;  %5183 = vmatprep.subr.bf16.mxu0 %v5419_v0 }
0x19df   :  { %5177 = vmatprep.subr.bf16.mxu1 %v5419_v0 }
0x1aae   :  { %v3379_v50 = vpop.f32.mrb[104].mxu0 }
0x1aaf   :  { %v3333_v51 = vpop.f32.mrb[100].mxu1  ;;  %v5163_v52 = vpop.f32.mrb[105].mxu0  ;;  %v3388_v53 = vsel %vm2429_vm4, %v3379_v50, -inf }
0x1ab0   :  { %3389 = vmax.xlane.f32.xlu1 %v3388_v53  ;;  %v5157_v54 = vpop.f32.mrb[101].mxu1  ;;  %v3382_v55 = vpop.f32.mrb[106].mxu0  ;;  %v3385_v56 = vsel %vm2429_vm4, %v3333_v51, -inf }
0x1ab1   :  { %v5164_v57 = vpop.f32.mrb[107].mxu0  ;;  %3386 = vmax.xlane.f32.xlu0 %v3385_v56  ;;  %v3336_v58 = vpop.f32.mrb[102].mxu1 }
0x1ab2   :  { %v5158_v63 = vpop.f32.mrb[103].mxu1 }
0x1b3d   :  { %v3390_v1 = vpop.xlane.xlu1 %3389 }
0x1b3e   :  { %v3392_v2 = vsub.f32 %v3379_v50, %v3390_v1  ;;  %v3387_v3 = vpop.xlane.xlu0 %3386  ;;  %v4577_v1 = vld [vmem:[%s5860_s23 + $0x3] ss:$0 sm:$0xff] }
0x1b3f   :  { %v3391_v6 = vsub.f32 %v3333_v51, %v3387_v3 }
0x1b40   :  { %v3395_v7 = vmul.f32 1.442695, %v3392_v2 }
0x1b41   :  { %v3393_v8 = vmul.f32 1.442695, %v3391_v6 }
0x1b42   :  { %5395 = vpow2.f32 %v3395_v7 }
0x1b43   :  { %5397 = vpow2.f32 %v3393_v8 }
0x1b4c   :  { %v5396_v9 = vpop.eup %5395 }
0x1b4d   :  { %v5398_v10 = vpop.eup %5397  ;;  %v3400_v4 = vsel %vm2429_vm4, %v5396_v9, 0.0 }
0x1b4e   :  { %3401 = vadd.xlane.f32.xlu1 %v3400_v4  ;;  %v3397_v34 = vsel %vm2429_vm4, %v5398_v10, 0.0 }
0x1b4f   :  { %3398 = vadd.xlane.f32.xlu0 %v3397_v34 }
0x1bdb   :  { %v3402_v5 = vpop.xlane.xlu1 %3401 }
0x1bdc   :  { %5399 = vrcp.f32 %v3402_v5  ;;  %v3399_v36 = vpop.xlane.xlu0 %3398 }
0x1bdd   :  { %5401 = vrcp.f32 %v3399_v36 }
0x1be6   :  { %v5400_v12 = vpop.eup %5399 }
0x1be7   :  { %v5402_v13 = vpop.eup %5401  ;;  %v3406_v14 = vmul.f32 %v5400_v12, %v5396_v9 }
0x1be8   :  { %v3405_v15 = vmul.f32 %v5402_v13, %v5398_v10 }
0x1be9   :  { %v3408_v24 = vpack.c.bf16 %v3406_v14, %v3406_v14 }
0x1bea   :  { %v3407_v25 = vpack.c.bf16 %v3405_v15, %v3405_v15 }
0x1beb   :  { %5174 = vmatmul.mubr.msk.bf16.vlgmr.msra.gmra.mrb[108].mxu0 %vm2429_vm4, %v3408_v24 }
0x1bec   :  { %5168 = vmatmul.mubr.msk.bf16.vlgmr.msra.gmra.mrb[104].mxu1 %vm2429_vm4, %v3407_v25  ;;  %5184 = vmatpush3.bf16.msra.mxu0 %v5331_v19 }
0x1bed   :  { %5185 = vmatprep.subr.bf16.mxu0 %v5419_v0  ;;  %5187 = vmatprep.mubr.msk.bf16.mxu0 %vm5422_vm0, %v5419_v0 }
0x1bee   :  { %5178 = vmatpush3.bf16.msra.mxu1 %v3502_v26  ;;  %5179 = vmatprep.mubr.msk.bf16.mxu1 %vm5422_vm0, %v5419_v0 }
0x1bef   :  { %5191 = vmatprep.subr.bf16.mxu1 %v5333_v28 }
0x1bf0   :  { %5186 = vmatpush3.bf16.msra.mxu0 %v5332_v27 }
0x1bf1   :  { %5199 = vmatprep.subr.bf16.mxu0 %v5335_v38 }
0x1bf3   :  { %5188 = vmatmul.mubr.msk.bf16.vlgmr.msra.gmra.mrb[112].mxu0 %vm161_vm1, %v5829_v23 }
0x1bf4   :  { %5203 = vmatprep.mubr.msk.bf16.mxu0 %vm161_vm1, %v5793_v60  ;;  %5200 = vmatpush3.bf16.msra.mxu0 %v5335_v38 }
0x1bf5   :  { %5201 = vmatprep.subr.bf16.mxu0 %v5336_v39 }
0x1bf8   :  { %5202 = vmatpush3.bf16.msra.mxu0 %v5336_v39 }
0x1bf9   :  { %5213 = vmatprep.subr.bf16.mxu0 %v5419_v0 }
0x1bfb   :  { %5204 = vmatmul.mubr.msk.bf16.vlgmr.msra.gmra.mrb[116].mxu0 %vm161_vm1, %v5796_v61 }
0x1bfc   :  { %5215 = vmatprep.mubr.msk.bf16.mxu0 %vm5422_vm0, %v5419_v0 }
0x1cbe   :  { %v3489_v29 = vpop.f32.mrb[108].mxu0 }
0x1cbf   :  { %v3446_v30 = vpop.f32.mrb[104].mxu1  ;;  %v5175_v59 = vpop.f32.mrb[109].mxu0 }
0x1cc0   :  { %v3495_v16 = vpack.c.bf16 %v3489_v29, %v3446_v30  ;;  %v5169_v47 = vpop.f32.mrb[105].mxu1  ;;  %v3492_v31 = vpop.f32.mrb[110].mxu0 }
0x1cc1   :  { %v3449_v21 = vpop.f32.mrb[106].mxu1  ;;  %v5176_v49 = vpop.f32.mrb[111].mxu0 }
0x1cc2   :  { %v5170_v62 = vpop.f32.mrb[107].mxu1  ;;  %5180 = vmatmul.mubr.msk.bf16.vlgmr.msra.gmra.mrb[108].mxu1 %vm347_vm2, %v3495_v16 }
0x1cc3   :  { %5192 = vmatpush3.bf16.msra.mxu1 %v5333_v28  ;;  %5195 = vmatprep.mubr.msk.bf16.mxu1 %vm161_vm1, %v5793_v60 }
0x1cc4   :  { %5193 = vmatprep.subr.bf16.mxu1 %v5334_v32 }
0x1cc6   :  { %v3606_v23 = vpop.f32.mrb[112].mxu0 }
0x1cc7   :  { %v5189_v33 = vpop.f32.mrb[113].mxu0  ;;  %5194 = vmatpush3.bf16.msra.mxu1 %v5334_v32 }
0x1cc8   :  { %v3609_v35 = vpop.f32.mrb[114].mxu0  ;;  %5207 = vmatprep.subr.bf16.mxu1 %v5419_v0 }
0x1cc9   :  { %v5190_v37 = vpop.f32.mrb[115].mxu0 }
0x1cca   :  { %5196 = vmatmul.mubr.msk.bf16.vlgmr.msra.gmra.mrb[112].mxu1 %vm161_vm1, %v5796_v61  ;;  %v4588_v37 = vld [vmem:[%s5878_s27 + $0xc] sm:$0xf] }
0x1ccb   :  { %5209 = vmatprep.mubr.msk.bf16.mxu1 %vm5422_vm0, %v5419_v0 }
0x1cce   :  { %v5205_v2 = vpop.f32.mrb[116].mxu0 }
0x1ccf   :  { %v3758_v3 = vadd.f32 %v5205_v2, %v4577_v1  ;;  %v3749_v6 = vpop.f32.mrb[117].mxu0 }
0x1cd0   :  { %v3750_v7 = vadd.f32 %v4577_v1, %v3749_v6  ;;  %v5206_v8 = vpop.f32.mrb[118].mxu0 }
0x1cd1   :  { %v3761_v9 = vadd.f32 %v5206_v8, %v4577_v1  ;;  %v3752_v10 = vpop.f32.mrb[119].mxu0 }
0x1cd2   :  { %v3753_v4 = vadd.f32 %v4577_v1, %v3752_v10 }
0x1cd3   :  { %v3765_v34 = vpack.c.bf16 %v3761_v9, %v3758_v3 }
0x1cd4   :  { %v3764_v5 = vpack.c.bf16 %v3753_v4, %v3750_v7  ;;  %v5337_v4 = vld [vmem:[%s4304_s4] sm:$0xff]  }
0x1d95   :  { %v3538_v60 = vpop.f32.mrb[108].mxu1 }
0x1d96   :  { %v6027_v40 = vadd.f32 %v3538_v60, %v5971_v18  ;;  %v5181_v41 = vpop.f32.mrb[109].mxu1  ;;  %v4558_v18 = vld [vmem:[%s5854_s19 + $0x3] ss:$0 sm:$0xff] }
0x1d97   :  { %v3541_v17 = vpop.f32.mrb[110].mxu1  ;;  %v3610_v56 = vadd.f32 %v4558_v18, %v3609_v35  ;;  %v3607_v57 = vadd.f32 %v4558_v18, %v3606_v23  ;;  %v3980_v41 = vsel %vm472_vm3, %v4588_v37, 0 }
0x1d98   :  { %v6030_v20 = vadd.f32 %v3541_v17, %v5973_v11  ;;  %v5182_v42 = vpop.f32.mrb[111].mxu1 }
0x1d99   :  { %v4636_v58 = vpack.c.bf16 %v3610_v56, %v3610_v56  ;;  %v4635_v63 = vpack.c.bf16 %v3607_v57, %v3607_v57 }
0x1d9d   :  { %v5197_v43 = vpop.f32.mrb[112].mxu1 }
0x1d9e   :  { %v3673_v45 = vpop.f32.mrb[113].mxu1  ;;  %v3682_v48 = vadd.f32 %v5197_v43, %v4567_v44 }
0x1d9f   :  { %v5198_v46 = vpop.f32.mrb[114].mxu1  ;;  %v3674_v51 = vadd.f32 %v4567_v44, %v3673_v45 }
0x1da0   :  { %v3685_v61 = vadd.f32 %v5198_v46, %v4567_v44  ;;  %v3676_v50 = vpop.f32.mrb[115].mxu1 }
0x1da1   :  { %v3677_v52 = vadd.f32 %v4567_v44, %v3676_v50 }
0x1da2   :  { %v3689_v53 = vpack.c.bf16 %v3685_v61, %v3682_v48 }
0x1da3   :  { %v3688_v54 = vpack.c.bf16 %v3677_v52, %v3674_v51  ;;  %v4590_v52 = vld [vmem:[%s4303_s30] ss:$0 sm:$0xff] }
0x1da4   :  { %v3821_v55 = vsel %vm347_vm2, %v3689_v53, 0 }
0x1da5   :  { %5214 = vmatpush3.bf16.xpose.msra.mxu0 %v3821_v55  ;;  %v3775_v11 = vsel %vm347_vm2, %v3688_v54, 0 }
0x1da6   :  { %5208 = vmatpush3.bf16.xpose.msra.mxu1 %v3775_v11  ;;  %5225 = vmatprep.subr.bf16.mxu0 %v5419_v0 }
0x1da7   :  { %5219 = vmatprep.subr.bf16.mxu1 %v5419_v0 }
0x1dac   :  { %5216 = vmatmul.mubr.msk.bf16.vlgmr.msra.gmra.mrb[120].mxu0 %vm347_vm2, %v4636_v58 }
0x1dad   :  { %5210 = vmatmul.mubr.msk.bf16.vlgmr.msra.gmra.mrb[116].mxu1 %vm347_vm2, %v4635_v63  ;;  %5227 = vmatprep.mubr.msk.bf16.mxu0 %vm5422_vm0, %v5419_v0 }
0x1dae   :  { %5221 = vmatprep.mubr.msk.bf16.mxu1 %vm5422_vm0, %v5419_v0  ;;  %5226 = vmatpush3.bf16.msra.mxu0 %v3765_v34  ;;  %v5338_v34 = vld [vmem:[%s4304_s4 + $0x8] sm:$0xff]  }
0x1daf   :  { %5220 = vmatpush3.bf16.msra.mxu1 %v3764_v5  ;;  %5237 = vmatprep.subr.bf16.mxu0 %v5419_v0  ;;  %v5339_v5 = vld [vmem:[%s6079_s6] sm:$0xff]  }
0x1db0   :  { %5231 = vmatprep.subr.bf16.mxu1 %v5419_v0 }
0x1e7f   :  { %v3857_v36 = vpop.f32.mrb[120].mxu0 }
0x1e80   :  { %v3811_v12 = vpop.f32.mrb[116].mxu1  ;;  %v5217_v13 = vpop.f32.mrb[121].mxu0  ;;  %v3866_v14 = vsel %vm2429_vm4, %v3857_v36, -inf }
0x1e81   :  { %3867 = vmax.xlane.f32.xlu1 %v3866_v14  ;;  %v5211_v15 = vpop.f32.mrb[117].mxu1  ;;  %v3860_v19 = vpop.f32.mrb[122].mxu0  ;;  %v3863_v22 = vsel %vm2429_vm4, %v3811_v12, -inf }
0x1e82   :  { %v5218_v24 = vpop.f32.mrb[123].mxu0  ;;  %3864 = vmax.xlane.f32.xlu0 %v3863_v22  ;;  %v3814_v25 = vpop.f32.mrb[118].mxu1 }
0x1e83   :  { %v5212_v26 = vpop.f32.mrb[119].mxu1  ;;  %v4591_v25 = vld [vmem:[%s4310_s11] ss:$0 sm:$0xff] }
0x1f0e   :  { %v3868_v27 = vpop.xlane.xlu1 %3867 }
0x1f0f   :  { %v3870_v28 = vsub.f32 %v3857_v36, %v3868_v27  ;;  %v3865_v29 = vpop.xlane.xlu0 %3864  ;;  %v5340_v36 = vld [vmem:[%s6079_s6 + $0x8] sm:$0xff]  }
0x1f10   :  { %v3869_v30 = vsub.f32 %v3811_v12, %v3865_v29 }
0x1f11   :  { %v3873_v59 = vmul.f32 1.442695, %v3870_v28 }
0x1f12   :  { %v3871_v16 = vmul.f32 1.442695, %v3869_v30  ;;  %v4592_v30 = vld [vmem:[%s4311_s16] ss:$0 sm:$0xff] }
0x1f13   :  { %5403 = vpow2.f32 %v3873_v59 }
0x1f14   :  { %5405 = vpow2.f32 %v3871_v16 }
0x1f1d   :  { %v5404_v47 = vpop.eup %5403 }
0x1f1e   :  { %v5406_v31 = vpop.eup %5405  ;;  %v3878_v32 = vsel %vm2429_vm4, %v5404_v47, 0.0 }
0x1f1f   :  { %3879 = vadd.xlane.f32.xlu1 %v3878_v32  ;;  %v3875_v21 = vsel %vm2429_vm4, %v5406_v31, 0.0  ;;  %v5341_v32 = vld [vmem:[%s6079_s6 + $0x10] sm:$0xff]  }
0x1f20   :  { %3876 = vadd.xlane.f32.xlu0 %v3875_v21  ;;  %v5342_v21 = vld [vmem:[%s6079_s6 + $0x18] sm:$0xff]  }
0x1fac   :  { %v3880_v49 = vpop.xlane.xlu1 %3879 }
0x1fad   :  { %5407 = vrcp.f32 %v3880_v49  ;;  %v3877_v62 = vpop.xlane.xlu0 %3876  ;;  %v4593_v49 = vld [vmem:[%s4305_s21] ss:$0 sm:$0xff] }
0x1fae   :  { %5409 = vrcp.f32 %v3877_v62 }
0x1fb7   :  { %v5408_v23 = vpop.eup %5407 }
0x1fb8   :  { %v5410_v33 = vpop.eup %5409  ;;  %v3884_v35 = vmul.f32 %v5408_v23, %v5404_v47 }
0x1fb9   :  { %v3883_v38 = vmul.f32 %v5410_v33, %v5406_v31 }
0x1fba   :  { %v3886_v39 = vpack.c.bf16 %v3884_v35, %v3884_v35 }
0x1fbb   :  { %v3885_v60 = vpack.c.bf16 %v3883_v38, %v3883_v38 }
0x1fbc   :  { %5228 = vmatmul.mubr.msk.bf16.vlgmr.msra.gmra.mrb[124].mxu0 %vm2429_vm4, %v3886_v39 }
0x1fbd   :  { %5222 = vmatmul.mubr.msk.bf16.vlgmr.msra.gmra.mrb[120].mxu1 %vm2429_vm4, %v3885_v60  ;;  %5241 = vmatprep.mubr.msk.bf16.mxu0 %vm5422_vm0, %v5419_v0 }
0x1fbe   :  { %5232 = vmatpush3.bf16.msra.mxu1 %v3980_v41  ;;  %5233 = vmatprep.mubr.msk.bf16.mxu1 %vm5422_vm0, %v5419_v0 }
0x1fbf   :  { %5245 = vmatprep.subr.bf16.mxu1 %v5419_v0  ;;  %5238 = vmatpush3.bf16.msra.mxu0 %v5337_v4  ;;  %v4604_v4 = vld [vmem:[%s4313_s2] ss:$0 sm:$0xff] }
0x1fc0   :  { %5239 = vmatprep.subr.bf16.mxu0 %v5419_v0 }
0x1fc3   :  { %5240 = vmatpush3.bf16.msra.mxu0 %v5338_v34 }
0x208f   :  { %v3967_v17 = vpop.f32.mrb[124].mxu0 }
0x2090   :  { %v3924_v42 = vpop.f32.mrb[120].mxu1  ;;  %v5229_v43 = vpop.f32.mrb[125].mxu0 }
0x2091   :  { %v3973_v44 = vpack.c.bf16 %v3967_v17, %v3924_v42  ;;  %v5223_v45 = vpop.f32.mrb[121].mxu1  ;;  %v3970_v46 = vpop.f32.mrb[126].mxu0 }
0x2092   :  { %v3927_v48 = vpop.f32.mrb[122].mxu1  ;;  %v5230_v61 = vpop.f32.mrb[127].mxu0 }
0x2093   :  { %v5224_v50 = vpop.f32.mrb[123].mxu1  ;;  %5234 = vmatmul.mubr.msk.bf16.vlgmr.msra.gmra.mrb[124].mxu1 %vm347_vm2, %v3973_v44 }
0x2094   :  { %5253 = vmatprep.mubr.msk.bf16.mxu1 %vm5422_vm0, %v5419_v0  ;;  %5246 = vmatpush3.bf16.msra.mxu1 %v5339_v5 }
0x2095   :  { %5247 = vmatprep.subr.bf16.mxu1 %v5419_v0 }
0x2098   :  { %5248 = vmatpush3.bf16.msra.mxu1 %v5340_v36 }
0x2099   :  { %5249 = vmatprep.subr.bf16.mxu1 %v5419_v0 }
0x209c   :  { %5250 = vmatpush3.bf16.msra.mxu1 %v5341_v32 }
0x209d   :  { %5251 = vmatprep.subr.bf16.mxu1 %v5419_v0  ;;  %v4597_v0 = vld [vmem:[%s4307_s25] ss:$0 sm:$0xff] }
0x20a0   :  { %5252 = vmatpush3.bf16.msra.mxu1 %v5342_v21 }
0x2166   :  { %v4016_v51 = vpop.f32.mrb[124].mxu1 }
0x2167   :  { %v4023_v53 = vadd.f32 %v4016_v51, %v6027_v40  ;;  %v5235_v54 = vpop.f32.mrb[125].mxu1 }
0x2168   :  { %v4019_v18 = vpop.f32.mrb[126].mxu1 }
0x2169   :  { %v4024_v55 = vadd.f32 %v4019_v18, %v6030_v20  ;;  %v5236_v11 = vpop.f32.mrb[127].mxu1  ;;  %v4032_v56 = vadd.f32 %v4590_v52, %v4023_v53 }
0x216b   :  { %v4034_v57 = vsel %vm161_vm1, %v4032_v56, 0.0  ;;  %v4033_v58 = vadd.f32 %v4590_v52, %v4024_v55 }
0x216c   :  { %4035 = vadd.xlane.f32.xlu0 %v4034_v57 }
0x216d   :  { %v4037_v63 = vsel %vm161_vm1, %v4033_v58, 0.0 }
0x216e   :  { %4038 = vadd.xlane.f32.xlu1 %v4037_v63 }
0x21f9   :  { %v4036_v1 = vpop.xlane.xlu0 %4035 }
0x21fa   :  { %v4040_v2 = vmul.f32 0.03125, %v4036_v1 }
0x21fb   :  { %v4039_v3 = vpop.xlane.xlu1 %4038 }
0x21fc   :  { %v4042_v6 = vsub.f32 %v4032_v56, %v4040_v2  ;;  %v4041_v7 = vmul.f32 0.03125, %v4039_v3 }
0x21fe   :  { %v4043_v8 = vsub.f32 %v4033_v58, %v4041_v7  ;;  %v4044_v40 = vmul.f32 %v4042_v6, %v4042_v6 }
0x2200   :  { %v4046_v9 = vsel %vm161_vm1, %v4044_v40, 0.0  ;;  %v4045_v10 = vmul.f32 %v4043_v8, %v4043_v8 }
0x2201   :  { %4047 = vadd.xlane.f32.xlu0 %v4046_v9  ;;  %v4603_v9 = vld [vmem:[%s4312_s28] ss:$0 sm:$0xff] }
0x2202   :  { %v4049_v20 = vsel %vm161_vm1, %v4045_v10, 0.0 }
0x2203   :  { %4050 = vadd.xlane.f32.xlu1 %v4049_v20 }
0x228e   :  { %v4048_v12 = vpop.xlane.xlu0 %4047 }
0x228f   :  { %v4052_v13 = vmul.f32 0.03125, %v4048_v12 }
0x2290   :  { %v4051_v14 = vpop.xlane.xlu1 %4050 }
0x2291   :  { %v4054_v15 = vadd.f32 1e-05, %v4052_v13  ;;  %v4053_v19 = vmul.f32 0.03125, %v4051_v14 }
0x2293   :  { %5411 = vrsqrt.f32 %v4054_v15  ;;  %v4055_v22 = vadd.f32 1e-05, %v4053_v19 }
0x2295   :  { %5413 = vrsqrt.f32 %v4055_v22 }
0x229d   :  { %v5412_v24 = vpop.eup %5411 }
0x229e   :  { %v4058_v26 = vmul.f32 %v5412_v24, %v4042_v6 }
0x229f   :  { %v5414_v27 = vpop.eup %5413 }
0x22a0   :  { %v4067_v28 = vmul.f32 %v4591_v25, %v4058_v26  ;;  %v4059_v29 = vmul.f32 %v5414_v27, %v4043_v8 }
0x22a2   :  { %v4068_v59 = vmul.f32 %v4591_v25, %v4059_v29  ;;  %v4076_v16 = vadd.f32 %v4592_v30, %v4067_v28 }
0x22a4   :  { %v4077_v47 = vadd.f32 %v4592_v30, %v4068_v59 }
0x22a6   :  { %v4078_v31 = vpack.c.bf16 %v4077_v47, %v4076_v16 }
0x22a8   :  { %5242 = vmatmul.mubr.msk.bf16.vlgmr.msra.gmra.mrb[128].mxu0 %vm161_vm1, %v4078_v31 }
0x237b   :  { %v4139_v62 = vpop.f32.mrb[128].mxu0 }
0x237c   :  { %v4140_v23 = vadd.f32 %v4593_v49, %v4139_v62  ;;  %v5243_v33 = vpop.f32.mrb[129].mxu0 }
0x237d   :  { %v4142_v35 = vpop.f32.mrb[130].mxu0 }
0x237e   :  { %v4143_v37 = vadd.f32 %v4593_v49, %v4142_v35  ;;  %v5244_v38 = vpop.f32.mrb[131].mxu0  ;;  %v4146_v39 = vmax.f32 %v4140_v23, 0.0 }
0x2380   :  { %v4147_v60 = vmax.f32 %v4143_v37, 0.0 }
0x2382   :  { %v4148_v41 = vpack.c.bf16 %v4147_v60, %v4146_v39 }
0x2384   :  { %5254 = vmatmul.mubr.msk.bf16.vlgmr.msra.gmra.mrb[128].mxu1 %vm4188_vm5, %v4148_v41 }
0x2457   :  { %v4226_v17 = vpop.f32.mrb[128].mxu1 }
0x2458   :  { %v4227_v42 = vadd.f32 %v4597_v0, %v4226_v17  ;;  %v5255_v43 = vpop.f32.mrb[129].mxu1 }
0x2459   :  { %v4229_v44 = vpop.f32.mrb[130].mxu1 }
0x245a   :  { %v4230_v45 = vadd.f32 %v4597_v0, %v4229_v44  ;;  %v5256_v46 = vpop.f32.mrb[131].mxu1  ;;  %v4233_v48 = vadd.f32 %v4227_v42, %v4076_v16 }
0x245c   :  { %v4235_v61 = vsel %vm161_vm1, %v4233_v48, 0.0  ;;  %v4234_v50 = vadd.f32 %v4230_v45, %v4077_v47 }
0x245d   :  { %4236 = vadd.xlane.f32.xlu0 %v4235_v61 }
0x245e   :  { %v4238_v51 = vsel %vm161_vm1, %v4234_v50, 0.0 }
0x245f   :  { %4239 = vadd.xlane.f32.xlu1 %v4238_v51 }
0x24ea   :  { %v4237_v52 = vpop.xlane.xlu0 %4236 }
0x24eb   :  { %v4241_v53 = vmul.f32 0.03125, %v4237_v52 }
0x24ec   :  { %v4240_v54 = vpop.xlane.xlu1 %4239 }
0x24ed   :  { %v4243_v18 = vsub.f32 %v4233_v48, %v4241_v53  ;;  %v4242_v55 = vmul.f32 0.03125, %v4240_v54 }
0x24ef   :  { %v4244_v11 = vsub.f32 %v4234_v50, %v4242_v55  ;;  %v4245_v56 = vmul.f32 %v4243_v18, %v4243_v18 }
0x24f1   :  { %v4247_v57 = vsel %vm161_vm1, %v4245_v56, 0.0  ;;  %v4246_v58 = vmul.f32 %v4244_v11, %v4244_v11 }
0x24f2   :  { %4248 = vadd.xlane.f32.xlu0 %v4247_v57 }
0x24f3   :  { %v4250_v63 = vsel %vm161_vm1, %v4246_v58, 0.0 }
0x24f4   :  { %4251 = vadd.xlane.f32.xlu1 %v4250_v63 }
0x257f   :  { %v4249_v1 = vpop.xlane.xlu0 %4248 }
0x2580   :  { %v4253_v2 = vmul.f32 0.03125, %v4249_v1 }
0x2581   :  { %v4252_v3 = vpop.xlane.xlu1 %4251 }
0x2582   :  { %v4255_v6 = vadd.f32 1e-05, %v4253_v2  ;;  %v4254_v7 = vmul.f32 0.03125, %v4252_v3 }
0x2584   :  { %5415 = vrsqrt.f32 %v4255_v6  ;;  %v4256_v8 = vadd.f32 1e-05, %v4254_v7 }
0x2586   :  { %5417 = vrsqrt.f32 %v4256_v8 }
0x258e   :  { %v5416_v40 = vpop.eup %5415 }
0x258f   :  { %v4259_v10 = vmul.f32 %v5416_v40, %v4243_v18 }
0x2590   :  { %v5418_v20 = vpop.eup %5417 }
0x2591   :  { %v4268_v34 = vmul.f32 %v4603_v9, %v4259_v10  ;;  %v4260_v5 = vmul.f32 %v5418_v20, %v4244_v11 }
0x2593   :  { %v4277_v36 = vadd.f32 %v4604_v4, %v4268_v34  ;;  %v4269_v12 = vmul.f32 %v4603_v9, %v4260_v5 }
0x2595   :  { %4279 = vst.msk [vmem:[%s4314_s7] sm:$0xff] %vm161_vm1, %v4277_v36  ;;  %v4278_v13 = vadd.f32 %v4604_v4, %v4269_v12 }
0x2597   :  { %4280 = vst.msk [vmem:[%s4314_s7 + $0x8] sm:$0xff] %vm161_vm1, %v4278_v13 }

</bundles_post_ra>
